<compile_context>
chip_gen: v7x
topology: tpu7x:2x2x1
jax: 0.10.0
libtpu: 0.0.40
codegen_flags: <defaults>
</compile_context>

<pallas_src>
import jax
import jax.numpy as jnp
from jax.experimental import pallas as pl
from jax.experimental.pallas import tpu as pltpu


LN_EPS = 1e-5


def critic_kernel(
    state_ref, action_ref,
    w1s_ref, w1a_ref, b15_ref, w2_ref, b2_ref, w6_ref, b6_ref,
    w48_ref, b48_ref,
    q_ref,
):
    hd = w2_ref.shape[0]

    s = state_ref[...].astype(jnp.float32)
    a = action_ref[...]

    # LayerNorm over the state feature dim (eps = 1e-5).  The affine
    # (gamma, beta) is folded into w1s / b15 at pack time.
    # NOTE: zero-padded batch rows give 0 * rsqrt(0 + eps) -> finite; keep
    # eps inside the rsqrt.
    mean = jnp.mean(s, axis=-1, keepdims=True)
    cent = s - mean
    var = jnp.mean(cent * cent, axis=-1, keepdims=True)
    sn = cent * jax.lax.rsqrt(var + LN_EPS)

    # Fused first layer for both Q branches: (TB, 2*hd), bf16 operands,
    # f32 accumulation.  Concat([state, action]) is handled by splitting the
    # weight into a state part and an action part (no lane concat in-kernel).
    h = (jnp.dot(sn.astype(w1s_ref.dtype), w1s_ref[...],
                 preferred_element_type=jnp.float32)
         + jnp.dot(a.astype(w1a_ref.dtype), w1a_ref[...],
                   preferred_element_type=jnp.float32)
         + b15_ref[...])
    h = jnp.maximum(h, 0.0)
    h1 = h[:, :hd]
    h2 = h[:, hd:]

    # Second layers (separate weights per branch).
    h1 = jnp.maximum(
        jnp.dot(h1.astype(w2_ref.dtype), w2_ref[...],
                preferred_element_type=jnp.float32) + b2_ref[...], 0.0)
    h2 = jnp.maximum(
        jnp.dot(h2.astype(w6_ref.dtype), w6_ref[...],
                preferred_element_type=jnp.float32) + b6_ref[...], 0.0)

    # Final (hd -> 1) projections as VPU multiply + lane reduce (avoids N=1
    # MXU dots), merged into a single lane-packed (TB, 2) output.
    w4_row = w48_ref[0:1, :].astype(jnp.float32)
    w8_row = w48_ref[1:2, :].astype(jnp.float32)
    q1 = jnp.sum(h1 * w4_row, axis=-1, keepdims=True)
    q2 = jnp.sum(h2 * w8_row, axis=-1, keepdims=True)
    q_ref[...] = (jnp.concatenate([q1, q2], axis=-1)
                  + b48_ref[...]).astype(q_ref.dtype)


def make_critic_params(key, state_dim, action_dim, hidden_dim=512):
    """Deterministic synthetic parameters.

    Returns (packed, raw): `packed` is the bf16 / fused / LN-folded layout fed
    to the kernel; `raw` keeps the original f32 (in, out) weights plus the
    LayerNorm affine for the pure-JAX reference.
    """
    assert hidden_dim % 128 == 0, "hidden_dim must be a multiple of 128"
    ks = jax.random.split(key, 8)

    def lin(k, fin, fout):
        kw, kb = jax.random.split(k)
        bound = 1.0 / jnp.sqrt(jnp.float32(fin))
        w = jax.random.uniform(kw, (fin, fout), jnp.float32, -bound, bound)
        b = jax.random.uniform(kb, (1, fout), jnp.float32, -bound, bound)
        return w, b

    sd, ad, hd = state_dim, action_dim, hidden_dim
    w1, b1 = lin(ks[0], sd + ad, hd)
    w2, b2 = lin(ks[1], hd, hd)
    w4, b4 = lin(ks[2], hd, 1)
    w5, b5 = lin(ks[3], sd + ad, hd)
    w6, b6 = lin(ks[4], hd, hd)
    w8, b8 = lin(ks[5], hd, 1)
    # Non-trivial affine so the LN-fold path is actually exercised/verified.
    gamma = 1.0 + 0.1 * jax.random.normal(ks[6], (1, sd), jnp.float32)
    beta = 0.1 * jax.random.normal(ks[7], (1, sd), jnp.float32)

    # Fused first layer across both Q branches, with the LayerNorm affine
    # folded in (done in f32, then cast to bf16):
    #   (sn*gamma + beta) @ W1s = sn @ (gamma[:,None] * W1s) + (beta @ W1s)
    w1s_cat = jnp.concatenate([w1[:sd], w5[:sd]], axis=1)      # (sd, 2*hd)
    w1a_cat = jnp.concatenate([w1[sd:], w5[sd:]], axis=1)      # (ad, 2*hd)
    b15_cat = jnp.concatenate([b1, b5], axis=1)                # (1, 2*hd)
    w1s_fold = w1s_cat * gamma.reshape(sd, 1)
    b15_fold = b15_cat + beta @ w1s_cat

    bf16 = jnp.bfloat16
    packed = dict(
        w1s=w1s_fold.astype(bf16),
        w1a=w1a_cat.astype(bf16),
        b15=b15_fold,
        w2=w2.astype(bf16), b2=b2,
        w6=w6.astype(bf16), b6=b6,
        # Final projections packed as rows of a (2, hd) matrix.
        w48=jnp.concatenate([w4.T, w8.T], axis=0).astype(bf16),
        b48=jnp.concatenate([b4, b8], axis=1),
    )
    raw = dict(gamma=gamma, beta=beta,
               w1=w1, b1=b1, w2=w2, b2=b2, w4=w4, b4=b4,
               w5=w5, b5=b5, w6=w6, b6=b6, w8=w8, b8=b8)
    return packed, raw


def _pick_block_b(B):
    """Batch-tile heuristic (see perf notes at top of file)."""
    if B <= 128:
        # Fixed small-batch bucket: avoids a fresh compile per distinct B and
        # keeps an MXU-friendly M.  Kernel is latency-bound here anyway.
        return 128
    if B <= 256:
        return 256
    # For larger batches aim for >= 2 grid steps (v7x: 2 TensorCores) with
    # per-step M in [256, 512] (fills the 256-wide v6e/v7x MXU, amortizes the
    # fixed per-step overhead).
    half = pl.cdiv(B, 2)
    return min(512, max(256, pl.cdiv(half, 256) * 256))


def critic_forward(state, action, p, *, block_b=None):
    B, sd = state.shape
    ad = action.shape[1]
    hd = p["w2"].shape[0]
    assert hd % 128 == 0, (
        "hidden_dim must be a multiple of 128 (lane slicing of the fused "
        "first layer and the (2, hd) w48 packing assume it)")

    if block_b is None:
        block_b = _pick_block_b(B)
    b_pad = pl.cdiv(B, block_b) * block_b
    if b_pad != B:
        pad = b_pad - B
        # Zero rows are numerically safe through LN (0 * rsqrt(eps)) and are
        # sliced off below.
        state = jnp.pad(state, ((0, pad), (0, 0)))
        action = jnp.pad(action, ((0, pad), (0, 0)))

    grid = (b_pad // block_b,)

    def act_spec(dim):
        return pl.BlockSpec((block_b, dim), lambda i: (i, 0))

    def const_spec(shape):
        return pl.BlockSpec(shape, lambda i: (0, 0))

    args = (state, action,
            p["w1s"], p["w1a"], p["b15"], p["w2"], p["b2"],
            p["w6"], p["b6"], p["w48"], p["b48"])
    in_specs = [
        act_spec(sd), act_spec(ad),
        const_spec((sd, 2 * hd)), const_spec((ad, 2 * hd)),
        const_spec((1, 2 * hd)),
        const_spec((hd, hd)), const_spec((1, hd)),
        const_spec((hd, hd)), const_spec((1, hd)),
        const_spec((2, hd)), const_spec((1, 2)),
    ]

    # Advisory cost hint so XLA schedules/overlaps this call sensibly inside
    # a surrounding training step.
    flops = 2 * b_pad * ((sd + ad) * 2 * hd + 2 * hd * hd + 2 * hd)
    weight_bytes = sum(int(jnp.asarray(v).size) * jnp.asarray(v).dtype.itemsize
                       for v in args[2:])
    bytes_accessed = (state.size * 4 + action.size * 4
                      + weight_bytes + b_pad * 2 * 4)
    cost = pl.CostEstimate(flops=int(flops), transcendentals=int(b_pad),
                           bytes_accessed=int(bytes_accessed))

    q = pl.pallas_call(
        critic_kernel,
        out_shape=jax.ShapeDtypeStruct((b_pad, 2), jnp.float32),
        grid=grid,
        in_specs=in_specs,
        out_specs=pl.BlockSpec((block_b, 2), lambda i: (i, 0)),
        compiler_params=pltpu.CompilerParams(
            dimension_semantics=("parallel",)),
        cost_estimate=cost,
    )(*args)

    q = q[:B]
    return q[:, 0:1], q[:, 1:2]


def critic_forward_ref(state, action, p):
    """Pure-JAX f32 reference matching the PyTorch module semantics."""
    mean = jnp.mean(state, axis=-1, keepdims=True)
    var = jnp.mean((state - mean) ** 2, axis=-1, keepdims=True)
    sn = (state - mean) * jax.lax.rsqrt(var + LN_EPS) * p["gamma"] + p["beta"]
    sa = jnp.concatenate([sn, action], axis=1)
    h1 = jax.nn.relu(sa @ p["w1"] + p["b1"])
    h1 = jax.nn.relu(h1 @ p["w2"] + p["b2"])
    q1 = h1 @ p["w4"] + p["b4"]
    h2 = jax.nn.relu(sa @ p["w5"] + p["b5"])
    h2 = jax.nn.relu(h2 @ p["w6"] + p["b6"])
    q2 = h2 @ p["w8"] + p["b8"]
    return q1, q2


if __name__ == "__main__":
    state_dim, action_dim, batch = 16, 8, 8

    key = jax.random.PRNGKey(0)
    k_param, k_s, k_a = jax.random.split(key, 3)
    packed, raw = make_critic_params(k_param, state_dim, action_dim)

    state = jax.random.normal(k_s, (batch, state_dim), jnp.float32)
    action = jax.random.normal(k_a, (batch, action_dim), jnp.float32)

    q1, q2 = critic_forward(state, action, packed)
    jax.block_until_ready((q1, q2))

    q1_ref, q2_ref = critic_forward_ref(state, action, raw)
    # Tolerance loosened vs pure-f32 because weights/dot operands are bf16.
    assert q1.shape == (batch, 1) and q2.shape == (batch, 1)
    assert jnp.allclose(q1, q1_ref, atol=5e-2, rtol=5e-2), (q1, q1_ref)
    assert jnp.allclose(q2, q2_ref, atol=5e-2, rtol=5e-2), (q2, q2_ref)

    print("KERNEL_OK")
</pallas_src>

<mosaic_0001>
module attributes {stable_mosaic.version = 11 : i64} {
  func.func @critic_kernel(%arg0: i32, %arg1: memref<128x16xf32, #tpu.memory_space<vmem>>, %arg2: memref<128x8xf32, #tpu.memory_space<vmem>>, %arg3: memref<16x1024xbf16, #tpu.memory_space<vmem>>, %arg4: memref<8x1024xbf16, #tpu.memory_space<vmem>>, %arg5: memref<1x1024xf32, #tpu.memory_space<vmem>>, %arg6: memref<512x512xbf16, #tpu.memory_space<vmem>>, %arg7: memref<1x512xf32, #tpu.memory_space<vmem>>, %arg8: memref<512x512xbf16, #tpu.memory_space<vmem>>, %arg9: memref<1x512xf32, #tpu.memory_space<vmem>>, %arg10: memref<2x512xbf16, #tpu.memory_space<vmem>>, %arg11: memref<1x2xf32, #tpu.memory_space<vmem>>, %arg12: memref<128x2xf32, #tpu.memory_space<vmem>>) attributes {dimension_semantics = [#tpu.dimension_semantics<parallel>], iteration_bounds = array<i64: 1>, scalar_prefetch = 0 : i64, scratch_operands = 0 : i64, tpu.core_type = #tpu.core_type<tc>, window_params = [{transform_indices = @transform_0, window_bounds = array<i64: 128, 16>}, {transform_indices = @transform_1, window_bounds = array<i64: 128, 8>}, {pipeline_mode = #tpu.pipeline_mode<synchronous>, transform_indices = @transform_2, window_bounds = array<i64: 16, 1024>}, {pipeline_mode = #tpu.pipeline_mode<synchronous>, transform_indices = @transform_3, window_bounds = array<i64: 8, 1024>}, {pipeline_mode = #tpu.pipeline_mode<synchronous>, transform_indices = @transform_4, window_bounds = array<i64: 1, 1024>}, {pipeline_mode = #tpu.pipeline_mode<synchronous>, transform_indices = @transform_5, window_bounds = array<i64: 512, 512>}, {pipeline_mode = #tpu.pipeline_mode<synchronous>, transform_indices = @transform_6, window_bounds = array<i64: 1, 512>}, {pipeline_mode = #tpu.pipeline_mode<synchronous>, transform_indices = @transform_7, window_bounds = array<i64: 512, 512>}, {pipeline_mode = #tpu.pipeline_mode<synchronous>, transform_indices = @transform_8, window_bounds = array<i64: 1, 512>}, {pipeline_mode = #tpu.pipeline_mode<synchronous>, transform_indices = @transform_9, window_bounds = array<i64: 2, 512>}, {pipeline_mode = #tpu.pipeline_mode<synchronous>, transform_indices = @transform_10, window_bounds = array<i64: 1, 2>}, {transform_indices = @transform_11, window_bounds = array<i64: 128, 2>}]} {
    %c0 = arith.constant 0 : index
    %c0_0 = arith.constant 0 : index
    %0 = vector.load %arg1[%c0, %c0_0] : memref<128x16xf32, #tpu.memory_space<vmem>>, vector<128x16xf32>
    %c0_1 = arith.constant 0 : index
    %c0_2 = arith.constant 0 : index
    %1 = vector.load %arg2[%c0_1, %c0_2] : memref<128x8xf32, #tpu.memory_space<vmem>>, vector<128x8xf32>
    %cst = arith.constant dense<0.000000e+00> : vector<128xf32>
    %2 = vector.multi_reduction <add>, %0, %cst [1] : vector<128x16xf32> to vector<128xf32>
    %3 = vector.shape_cast %2 : vector<128xf32> to vector<128x1xf32>
    %cst_3 = arith.constant 1.600000e+01 : f32
    %4 = vector.broadcast %cst_3 : f32 to vector<128x1xf32>
    %5 = arith.divf %3, %4 : vector<128x1xf32>
    %6 = vector.broadcast %5 : vector<128x1xf32> to vector<128x16xf32>
    %7 = arith.subf %0, %6 : vector<128x16xf32>
    %8 = arith.mulf %7, %7 : vector<128x16xf32>
    %cst_4 = arith.constant dense<0.000000e+00> : vector<128xf32>
    %9 = vector.multi_reduction <add>, %8, %cst_4 [1] : vector<128x16xf32> to vector<128xf32>
    %10 = vector.shape_cast %9 : vector<128xf32> to vector<128x1xf32>
    %cst_5 = arith.constant 1.600000e+01 : f32
    %11 = vector.broadcast %cst_5 : f32 to vector<128x1xf32>
    %12 = arith.divf %10, %11 : vector<128x1xf32>
    %cst_6 = arith.constant 9.99999974E-6 : f32
    %13 = vector.broadcast %cst_6 : f32 to vector<128x1xf32>
    %14 = arith.addf %12, %13 : vector<128x1xf32>
    %15 = math.rsqrt %14 : vector<128x1xf32>
    %16 = vector.broadcast %15 : vector<128x1xf32> to vector<128x16xf32>
    %17 = arith.mulf %7, %16 : vector<128x16xf32>
    %18 = arith.truncf %17 : vector<128x16xf32> to vector<128x16xbf16>
    %c0_7 = arith.constant 0 : index
    %c0_8 = arith.constant 0 : index
    %19 = vector.load %arg3[%c0_7, %c0_8] : memref<16x1024xbf16, #tpu.memory_space<vmem>>, vector<16x1024xbf16>
    %cst_9 = arith.constant dense<0.000000e+00> : vector<128x1024xf32>
    %20 = tpu.matmul %18, %19, %cst_9 {dimension_numbers = #tpu.dot_dimension_numbers<[1], [0], [0], [1], [0, 0, 1, 1], [], []>} : vector<128x16xbf16>, vector<16x1024xbf16>, vector<128x1024xf32> -> vector<128x1024xf32>
    %21 = arith.truncf %1 : vector<128x8xf32> to vector<128x8xbf16>
    %c0_10 = arith.constant 0 : index
    %c0_11 = arith.constant 0 : index
    %22 = vector.load %arg4[%c0_10, %c0_11] : memref<8x1024xbf16, #tpu.memory_space<vmem>>, vector<8x1024xbf16>
    %cst_12 = arith.constant dense<0.000000e+00> : vector<128x1024xf32>
    %23 = tpu.matmul %21, %22, %cst_12 {dimension_numbers = #tpu.dot_dimension_numbers<[1], [0], [0], [1], [0, 0, 1, 1], [], []>} : vector<128x8xbf16>, vector<8x1024xbf16>, vector<128x1024xf32> -> vector<128x1024xf32>
    %24 = arith.addf %20, %23 : vector<128x1024xf32>
    %c0_13 = arith.constant 0 : index
    %c0_14 = arith.constant 0 : index
    %25 = vector.load %arg5[%c0_13, %c0_14] : memref<1x1024xf32, #tpu.memory_space<vmem>>, vector<1x1024xf32>
    %26 = vector.broadcast %25 : vector<1x1024xf32> to vector<128x1024xf32>
    %27 = arith.addf %24, %26 : vector<128x1024xf32>
    %cst_15 = arith.constant 0.000000e+00 : f32
    %28 = vector.broadcast %cst_15 : f32 to vector<128x1024xf32>
    %29 = arith.maximumf %27, %28 : vector<128x1024xf32>
    %30 = vector.extract_strided_slice %29 {offsets = [0, 0], sizes = [128, 512], strides = [1, 1]} : vector<128x1024xf32> to vector<128x512xf32>
    %31 = vector.extract_strided_slice %29 {offsets = [0, 512], sizes = [128, 512], strides = [1, 1]} : vector<128x1024xf32> to vector<128x512xf32>
    %32 = arith.truncf %30 : vector<128x512xf32> to vector<128x512xbf16>
    %c0_16 = arith.constant 0 : index
    %c0_17 = arith.constant 0 : index
    %33 = vector.load %arg6[%c0_16, %c0_17] : memref<512x512xbf16, #tpu.memory_space<vmem>>, vector<512x512xbf16>
    %cst_18 = arith.constant dense<0.000000e+00> : vector<128x512xf32>
    %34 = tpu.matmul %32, %33, %cst_18 {dimension_numbers = #tpu.dot_dimension_numbers<[1], [0], [0], [1], [0, 0, 1, 1], [], []>} : vector<128x512xbf16>, vector<512x512xbf16>, vector<128x512xf32> -> vector<128x512xf32>
    %c0_19 = arith.constant 0 : index
    %c0_20 = arith.constant 0 : index
    %35 = vector.load %arg7[%c0_19, %c0_20] : memref<1x512xf32, #tpu.memory_space<vmem>>, vector<1x512xf32>
    %36 = vector.broadcast %35 : vector<1x512xf32> to vector<128x512xf32>
    %37 = arith.addf %34, %36 : vector<128x512xf32>
    %cst_21 = arith.constant 0.000000e+00 : f32
    %38 = vector.broadcast %cst_21 : f32 to vector<128x512xf32>
    %39 = arith.maximumf %37, %38 : vector<128x512xf32>
    %40 = arith.truncf %31 : vector<128x512xf32> to vector<128x512xbf16>
    %c0_22 = arith.constant 0 : index
    %c0_23 = arith.constant 0 : index
    %41 = vector.load %arg8[%c0_22, %c0_23] : memref<512x512xbf16, #tpu.memory_space<vmem>>, vector<512x512xbf16>
    %cst_24 = arith.constant dense<0.000000e+00> : vector<128x512xf32>
    %42 = tpu.matmul %40, %41, %cst_24 {dimension_numbers = #tpu.dot_dimension_numbers<[1], [0], [0], [1], [0, 0, 1, 1], [], []>} : vector<128x512xbf16>, vector<512x512xbf16>, vector<128x512xf32> -> vector<128x512xf32>
    %c0_25 = arith.constant 0 : index
    %c0_26 = arith.constant 0 : index
    %43 = vector.load %arg9[%c0_25, %c0_26] : memref<1x512xf32, #tpu.memory_space<vmem>>, vector<1x512xf32>
    %44 = vector.broadcast %43 : vector<1x512xf32> to vector<128x512xf32>
    %45 = arith.addf %42, %44 : vector<128x512xf32>
    %cst_27 = arith.constant 0.000000e+00 : f32
    %46 = vector.broadcast %cst_27 : f32 to vector<128x512xf32>
    %47 = arith.maximumf %45, %46 : vector<128x512xf32>
    %c0_28 = arith.constant 0 : index
    %c0_29 = arith.constant 0 : index
    %48 = vector.load %arg10[%c0_28, %c0_29] : memref<2x512xbf16, #tpu.memory_space<vmem>>, vector<1x512xbf16>
    %49 = arith.extf %48 : vector<1x512xbf16> to vector<1x512xf32>
    %c1 = arith.constant 1 : index
    %c0_30 = arith.constant 0 : index
    %50 = vector.load %arg10[%c1, %c0_30] : memref<2x512xbf16, #tpu.memory_space<vmem>>, vector<1x512xbf16>
    %51 = arith.extf %50 : vector<1x512xbf16> to vector<1x512xf32>
    %52 = vector.broadcast %49 : vector<1x512xf32> to vector<128x512xf32>
    %53 = arith.mulf %39, %52 : vector<128x512xf32>
    %cst_31 = arith.constant dense<0.000000e+00> : vector<128xf32>
    %54 = vector.multi_reduction <add>, %53, %cst_31 [1] : vector<128x512xf32> to vector<128xf32>
    %55 = vector.shape_cast %54 : vector<128xf32> to vector<128x1xf32>
    %56 = vector.broadcast %51 : vector<1x512xf32> to vector<128x512xf32>
    %57 = arith.mulf %47, %56 : vector<128x512xf32>
    %cst_32 = arith.constant dense<0.000000e+00> : vector<128xf32>
    %58 = vector.multi_reduction <add>, %57, %cst_32 [1] : vector<128x512xf32> to vector<128xf32>
    %59 = vector.shape_cast %58 : vector<128xf32> to vector<128x1xf32>
    %60 = tpu.concatenate %55, %59 in 1 : vector<128x1xf32>, vector<128x1xf32> -> vector<128x2xf32>
    %c0_33 = arith.constant 0 : index
    %c0_34 = arith.constant 0 : index
    %61 = vector.load %arg11[%c0_33, %c0_34] : memref<1x2xf32, #tpu.memory_space<vmem>>, vector<1x2xf32>
    %62 = vector.broadcast %61 : vector<1x2xf32> to vector<128x2xf32>
    %63 = arith.addf %60, %62 : vector<128x2xf32>
    %c0_35 = arith.constant 0 : index
    %c0_36 = arith.constant 0 : index
    %64 = vector.load %arg12[%c0_35, %c0_36] : memref<128x2xf32, #tpu.memory_space<vmem>>, vector<128x2xf32>
    tpu.vector_store %arg12[%c0_35, %c0_36], %63 {strides = array<i32>} : memref<128x2xf32, #tpu.memory_space<vmem>>, vector<128x2xf32>,
    return
  }
  func.func @transform_0(%arg0: i32) -> (i32, i32) {
    %c0_i32 = arith.constant 0 : i32
    %c0_i32_0 = arith.constant 0 : i32
    return %arg0, %c0_i32 : i32, i32
  }
  func.func @transform_1(%arg0: i32) -> (i32, i32) {
    %c0_i32 = arith.constant 0 : i32
    %c0_i32_0 = arith.constant 0 : i32
    return %arg0, %c0_i32 : i32, i32
  }
  func.func @transform_2(%arg0: i32) -> (i32, i32) {
    %c0_i32 = arith.constant 0 : i32
    %c0_i32_0 = arith.constant 0 : i32
    %c0_i32_1 = arith.constant 0 : i32
    return %c0_i32, %c0_i32_0 : i32, i32
  }
  func.func @transform_3(%arg0: i32) -> (i32, i32) {
    %c0_i32 = arith.constant 0 : i32
    %c0_i32_0 = arith.constant 0 : i32
    %c0_i32_1 = arith.constant 0 : i32
    return %c0_i32, %c0_i32_0 : i32, i32
  }
  func.func @transform_4(%arg0: i32) -> (i32, i32) {
    %c0_i32 = arith.constant 0 : i32
    %c0_i32_0 = arith.constant 0 : i32
    %c0_i32_1 = arith.constant 0 : i32
    return %c0_i32, %c0_i32_0 : i32, i32
  }
  func.func @transform_5(%arg0: i32) -> (i32, i32) {
    %c0_i32 = arith.constant 0 : i32
    %c0_i32_0 = arith.constant 0 : i32
    %c0_i32_1 = arith.constant 0 : i32
    return %c0_i32, %c0_i32_0 : i32, i32
  }
  func.func @transform_6(%arg0: i32) -> (i32, i32) {
    %c0_i32 = arith.constant 0 : i32
    %c0_i32_0 = arith.constant 0 : i32
    %c0_i32_1 = arith.constant 0 : i32
    return %c0_i32, %c0_i32_0 : i32, i32
  }
  func.func @transform_7(%arg0: i32) -> (i32, i32) {
    %c0_i32 = arith.constant 0 : i32
    %c0_i32_0 = arith.constant 0 : i32
    %c0_i32_1 = arith.constant 0 : i32
    return %c0_i32, %c0_i32_0 : i32, i32
  }
  func.func @transform_8(%arg0: i32) -> (i32, i32) {
    %c0_i32 = arith.constant 0 : i32
    %c0_i32_0 = arith.constant 0 : i32
    %c0_i32_1 = arith.constant 0 : i32
    return %c0_i32, %c0_i32_0 : i32, i32
  }
  func.func @transform_9(%arg0: i32) -> (i32, i32) {
    %c0_i32 = arith.constant 0 : i32
    %c0_i32_0 = arith.constant 0 : i32
    %c0_i32_1 = arith.constant 0 : i32
    return %c0_i32, %c0_i32_0 : i32, i32
  }
  func.func @transform_10(%arg0: i32) -> (i32, i32) {
    %c0_i32 = arith.constant 0 : i32
    %c0_i32_0 = arith.constant 0 : i32
    %c0_i32_1 = arith.constant 0 : i32
    return %c0_i32, %c0_i32_0 : i32, i32
  }
  func.func @transform_11(%arg0: i32) -> (i32, i32) {
    %c0_i32 = arith.constant 0 : i32
    %c0_i32_0 = arith.constant 0 : i32
    return %arg0, %c0_i32 : i32, i32
  }
}

</mosaic_0001>

<bundles_post_ra>
// kernel: tpu_custom_call.1
= control target key start
LH: loop header
LB: loop body
LE: loop exit
PB: predicated region body
PF: predicated region fallthrough
CT: control target
= control target key end

     0   :  { %16 = vsyncpa [#allocation3], 0  ;;  %s7406_s0 = inlined_call_operand.vmem [shape: f32[128,16], index: 0, kind: input, shape index: {}]   ;;  %s7407_s1 = inlined_call_operand.vmem [shape: f32[128,8], index: 1, kind: input, shape index: {}]   ;;  %s7408_s2 = inlined_call_operand.vmem [shape: bf16[16,1024], index: 2, kind: input, shape index: {}]   ;;  %s7409_s3 = inlined_call_operand.vmem [shape: bf16[8,1024], index: 3, kind: input, shape index: {}]   ;;  %s7410_s4 = inlined_call_operand.vmem [shape: f32[1,1024], index: 4, kind: input, shape index: {}]   ;;  %s7411_s5 = inlined_call_operand.hbm [shape: bf16[512,512], index: 5, kind: input, shape index: {}]   ;;  %s7412_s6 = inlined_call_operand.vmem [shape: f32[1,512], index: 6, kind: input, shape index: {}]   ;;  %s7413_s7 = inlined_call_operand.hbm [shape: bf16[512,512], index: 7, kind: input, shape index: {}]   ;;  %s7414_s8 = inlined_call_operand.vmem [shape: f32[1,512], index: 8, kind: input, shape index: {}]   ;;  %s7415_s9 = inlined_call_operand.vmem [shape: bf16[2,512], index: 9, kind: input, shape index: {}]   ;;  %s7416_s10 = inlined_call_operand.vmem [shape: f32[1,2], index: 10, kind: input, shape index: {}]   ;;  %s7417_s11 = inlined_call_operand.vmem [shape: f32[128,2], index: 11, kind: output, shape index: {}]  }
   0x1   :  { %17 = vsyncpa [#allocation5], 0  ;;  %s5977_s17 = smov [#allocation2]   ;;  %s5929_s21 = scalar_lea.hbm %s7411_s5, 16384 }
   0x2   :  { %s33_s18 = sshll.u32 %s5977_s17, 4  ;;  %p5930_p0 = scmp.ne.s32.totalorder %s7411_s5, %s5929_s21  ;;  %s34_s18 = int_to_ptr.vmem [resolvable:$true] %s33_s18 }
   0x3   :  { %p5933_p1 = scmp.lt.u32.totalorder %s5929_s21, %s7411_s5 }
   0x5   :  { %p5935_p2 = pnand %p5933_p1, %p5930_p0 }
   0x7   :  { %5938 = shalt.err (!%p5935_p2)
}
   0x8   :  { %s5939_s26 = scalar_lea.vmem %s34_s18, 16384  ;;  %p5944_p4 = scmp.lt.s32.totalorder %s34_s18, %s34_s18 }
   0x9   :  { %p5940_p3 = scmp.ne.s32.totalorder %s34_s18, %s5939_s26  ;;  %p5945_p5 = scmp.lt.s32.totalorder %s5939_s26, %s5939_s26 }
   0xb   :  { %p5946_p6 = por %p5945_p5, %p5944_p4 }
   0xd   :  { %p5947_p7 = pnand %p5946_p6, %p5940_p3 }
   0xf   :  { %5950 = shalt.err (!%p5947_p7)
}
  0x10   :  { %s5978_s27 = smov 256   ;;  %s5979_s28 = smov 16  }
  0x11   :  { %39 = dma.hbm_to_vmem [thread:$0]  %s7411_s5, 16384, %s34_s18, [#allocation3], %s5978_s27, %s5978_s27, %s5979_s28  }
  0x12   :  { %s5980_s12 = smov [#allocation4]   ;;  %s5951_s16 = scalar_lea.hbm %s7413_s7, 16384 }
  0x13   :  { %s47_s13 = sshll.u32 %s5980_s12, 4  ;;  %p5952_p8 = scmp.ne.s32.totalorder %s7413_s7, %s5951_s16  ;;  %s48_s13 = int_to_ptr.vmem [resolvable:$true] %s47_s13 }
  0x14   :  { %p5955_p9 = scmp.lt.u32.totalorder %s5951_s16, %s7413_s7 }
  0x16   :  { %p5957_p10 = pnand %p5955_p9, %p5952_p8 }
  0x18   :  { %5960 = shalt.err (!%p5957_p10)
}
  0x19   :  { %s5961_s22 = scalar_lea.vmem %s48_s13, 16384  ;;  %p5966_p12 = scmp.lt.s32.totalorder %s48_s13, %s48_s13 }
  0x1a   :  { %p5962_p11 = scmp.ne.s32.totalorder %s48_s13, %s5961_s22  ;;  %p5967_p13 = scmp.lt.s32.totalorder %s5961_s22, %s5961_s22 }
  0x1c   :  { %p5968_p0 = por %p5967_p13, %p5966_p12 }
  0x1e   :  { %p5969_p1 = pnand %p5968_p0, %p5962_p11 }
  0x20   :  { %5972 = shalt.err (!%p5969_p1)
}
  0x21   :  { %53 = dma.hbm_to_vmem [thread:$0]  %s7413_s7, 16384, %s48_s13, [#allocation5], %s5978_s27, %s5978_s27, %s5979_s28  }
  0x22   :  { %5973 = dma.done.wait [#allocation3], 16384  }
  0x23   :  { %5974 = vsyncadd [#allocation3], 4294950912 }
  0x24   :  { %5975 = dma.done.wait [#allocation5], 16384  }
  0x25   :  { %5976 = vsyncadd [#allocation5], 4294950912  ;;  %vm99_vm0 = vcmask 130048   ;;  %v6069_v0 = vld [vmem:[%s7406_s0] sm:$0xff]  ;;  %v6074_v1 = vld [vmem:[%s7406_s0 + $0x10] sm:$0xff]  ;;  %vm382_vm1 = vcmask 1043456  }
  0x26   :  { %v6079_v2 = vld [vmem:[%s7406_s0 + $0x8] sm:$0xff]  ;;  %v100_v3 = vsel %vm99_vm0, %v6069_v0, 0.0  ;;  %v106_v4 = vsel %vm99_vm0, %v6074_v1, 0.0  ;;  %v6088_v5 = vld [vmem:[%s7406_s0 + $0x18] sm:$0xff]  ;;  %v6097_v8 = vld [vmem:[%s7406_s0 + $0x20] sm:$0xff]  ;;  %v5981_v43 = vmov 0  }
  0x27   :  { %101 = vadd.xlane.f32.xlu0 %v100_v3  ;;  %107 = vadd.xlane.f32.xlu1 %v106_v4  ;;  %v103_v6 = vsel %vm99_vm0, %v6079_v2, 0.0  ;;  %v109_v7 = vsel %vm99_vm0, %v6088_v5, 0.0  ;;  %v6102_v9 = vld [vmem:[%s7406_s0 + $0x28] sm:$0xff]  ;;  %v6107_v10 = vld [vmem:[%s7406_s0 + $0x30] sm:$0xff]  ;;  %v6112_v11 = vld [vmem:[%s7406_s0 + $0x38] sm:$0xff]  ;;  %v112_v12 = vsel %vm99_vm0, %v6097_v8, 0.0 }
  0x28   :  { %v115_v13 = vsel %vm99_vm0, %v6102_v9, 0.0  ;;  %v6121_v14 = vld [vmem:[%s7406_s0 + $0x40] sm:$0xff]  ;;  %v6126_v15 = vld [vmem:[%s7406_s0 + $0x48] sm:$0xff]  ;;  %v118_v16 = vsel %vm99_vm0, %v6107_v10, 0.0  ;;  %v121_v17 = vsel %vm99_vm0, %v6112_v11, 0.0  ;;  %v6135_v18 = vld [vmem:[%s7406_s0 + $0x50] sm:$0xff]  ;;  %439 = vmatprep.mubr.bf16.mxu0 %v5981_v43  ;;  %552 = vmatprep.mubr.bf16.mxu1 %v5981_v43 }
  0x29   :  { %v6140_v19 = vld [vmem:[%s7406_s0 + $0x58] sm:$0xff]  ;;  %v124_v20 = vsel %vm99_vm0, %v6121_v14, 0.0  ;;  %v127_v21 = vsel %vm99_vm0, %v6126_v15, 0.0  ;;  %v6149_v22 = vld [vmem:[%s7406_s0 + $0x60] sm:$0xff]  ;;  %v6154_v23 = vld [vmem:[%s7406_s0 + $0x68] sm:$0xff]  ;;  %v130_v24 = vsel %vm99_vm0, %v6135_v18, 0.0 }
  0x2a   :  { %v133_v25 = vsel %vm99_vm0, %v6140_v19, 0.0  ;;  %v6163_v26 = vld [vmem:[%s7406_s0 + $0x70] sm:$0xff]  ;;  %v6168_v27 = vld [vmem:[%s7406_s0 + $0x78] sm:$0xff]  ;;  %v136_v28 = vsel %vm99_vm0, %v6149_v22, 0.0  ;;  %v139_v29 = vsel %vm99_vm0, %v6154_v23, 0.0  ;;  %v333_v32 = vld [vmem:[%s7409_s3] sm:$0xff] }
  0x2b   :  { %104 = vadd.xlane.f32.xlu0 %v103_v6  ;;  %110 = vadd.xlane.f32.xlu1 %v109_v7  ;;  %v142_v30 = vsel %vm99_vm0, %v6163_v26, 0.0  ;;  %v145_v31 = vsel %vm99_vm0, %v6168_v27, 0.0  ;;  %v4776_v33 = vcombine.high %v333_v32, %v333_v32  ;;  %v334_v34 = vld [vmem:[%s7409_s3 + $0x8] sm:$0xff]  ;;  %v4775_v35 = vcombine.low %v333_v32, %v333_v32  ;;  %v335_v38 = vld [vmem:[%s7409_s3 + $0x10] sm:$0xff]  ;;  %v83_v39 = vld [vmem:[%s7407_s1] sm:$0xff] }
  0x2c   :  { %v4778_v36 = vcombine.high %v334_v34, %v334_v34  ;;  %v4777_v37 = vcombine.low %v334_v34, %v334_v34  ;;  %v84_v40 = vld [vmem:[%s7407_s1 + $0x8] sm:$0xff]  ;;  %v4780_v44 = vcombine.high %v335_v38, %v335_v38  ;;  %vm357_vm2 = vcmask 64512   ;;  %v85_v48 = vld [vmem:[%s7407_s1 + $0x10] sm:$0xff]  ;;  %v86_v49 = vld [vmem:[%s7407_s1 + $0x18] sm:$0xff] }
  0x2d   :  { %4783 = vmatprep.subr.msk.bf16.mxu0 %vm382_vm1, %v4776_v33  ;;  %v384_v41 = vsel %vm382_vm1, %v4775_v35, 0  ;;  %v6198_v45 = vpack.c.bf16 %v84_v40, %v83_v39  ;;  %v4779_v46 = vcombine.low %v335_v38, %v335_v38  ;;  %v336_v50 = vld [vmem:[%s7409_s3 + $0x18] sm:$0xff]  ;;  %v317_v53 = vld [vmem:[%s7408_s2] sm:$0xff]  ;;  %v326_v57 = vpack.c.bf16 %v86_v49, %v85_v48  ;;  %v88_v59 = vld [vmem:[%s7407_s1 + $0x28] sm:$0xff] }
  0x2e   :  { %4792 = vmatprep.subr.msk.bf16.mxu1 %vm382_vm1, %v4778_v36  ;;  %v390_v42 = vsel %vm382_vm1, %v4777_v37, 0  ;;  %408 = vmatpush1.bf16.msra.mxu0 %v384_v41  ;;  %v4782_v51 = vcombine.high %v336_v50, %v336_v50  ;;  %v4781_v52 = vcombine.low %v336_v50, %v336_v50  ;;  %v321_v54 = vld [vmem:[%s7408_s2 + $0x20] sm:$0xff]  ;;  %v89_v61 = vld [vmem:[%s7407_s1 + $0x30] sm:$0xff]  ;;  %v90_v62 = vld [vmem:[%s7407_s1 + $0x38] sm:$0xff]  ;;  %vm4712_vm3 = vcmask 7168  }
  0x2f   :  { %113 = vadd.xlane.f32.xlu0 %v112_v12  ;;  %116 = vadd.xlane.f32.xlu1 %v115_v13  ;;  %v396_v47 = vsel %vm382_vm1, %v4779_v46, 0  ;;  %v4820_v55 = vcombine.high %v317_v53, %v321_v54  ;;  %v87_v58 = vld [vmem:[%s7407_s1 + $0x20] sm:$0xff]  ;;  %v328_v63 = vpack.c.bf16 %v90_v62, %v89_v61  ;;  %v92_v4 = vld [vmem:[%s7407_s1 + $0x48] sm:$0xff]  ;;  %v93_v7 = vld [vmem:[%s7407_s1 + $0x50] sm:$0xff]  ;;  %vm4752_vm4 = vcmask 15360  }
  0x30   :  { %521 = vmatpush1.bf16.msra.mxu1 %v390_v42  ;;  %4801 = vmatprep.subr.msk.bf16.mxu0 %vm382_vm1, %v4780_v44  ;;  %v402_v56 = vsel %vm382_vm1, %v4781_v52, 0  ;;  %v327_v60 = vpack.c.bf16 %v88_v59, %v87_v58  ;;  %v91_v3 = vld [vmem:[%s7407_s1 + $0x40] sm:$0xff]  ;;  %v94_v12 = vld [vmem:[%s7407_s1 + $0x58] sm:$0xff] }
  0x31   :  { %4784 = vmatmul.mubr.msk.bf16.vlgmr.msra.gmra.mrb[0].mxu0 %vm357_vm2, %v6198_v45  ;;  %4810 = vmatprep.subr.msk.bf16.mxu1 %vm382_vm1, %v4782_v51  ;;  %v6256_v6 = vpack.c.bf16 %v92_v4, %v91_v3  ;;  %v6270_v13 = vpack.c.bf16 %v94_v12, %v93_v7 }
  0x32   :  { %634 = vmatpush1.bf16.msra.mxu0 %v396_v47  ;;  %449 = vmatprep.mubr.bf16.mxu0 %v5981_v43 }
  0x33   :  { %119 = vadd.xlane.f32.xlu0 %v118_v16  ;;  %122 = vadd.xlane.f32.xlu1 %v121_v17  ;;  %v95_v16 = vld [vmem:[%s7407_s1 + $0x60] sm:$0xff]  ;;  %v96_v17 = vld [vmem:[%s7407_s1 + $0x68] sm:$0xff] }
  0x34   :  { %4793 = vmatmul.mubr.msk.bf16.vlgmr.msra.gmra.mrb[0].mxu1 %vm357_vm2, %v6198_v45  ;;  %923 = vmatprep.subr.bf16.mxu0 %v4820_v55 }
  0x35   :  { %562 = vmatprep.mubr.bf16.mxu1 %v5981_v43  ;;  %747 = vmatpush1.bf16.msra.mxu1 %v402_v56 }
  0x37   :  { %125 = vadd.xlane.f32.xlu0 %v124_v20  ;;  %128 = vadd.xlane.f32.xlu1 %v127_v21  ;;  %v6284_v20 = vpack.c.bf16 %v96_v17, %v95_v16  ;;  %v97_v21 = vld [vmem:[%s7407_s1 + $0x70] sm:$0xff] }
  0x39   :  { %4785 = vmatmul.mubr.msk.bf16.gmra.mrb[4].mxu0 %vm357_vm2, %v326_v57 }
  0x3a   :  { %459 = vmatprep.mubr.bf16.mxu0 %v5981_v43 }
  0x3b   :  { %131 = vadd.xlane.f32.xlu0 %v130_v24  ;;  %134 = vadd.xlane.f32.xlu1 %v133_v25  ;;  %v98_v24 = vld [vmem:[%s7407_s1 + $0x78] sm:$0xff] }
  0x3c   :  { %4794 = vmatmul.mubr.msk.bf16.gmra.mrb[4].mxu1 %vm357_vm2, %v326_v57  ;;  %v6298_v25 = vpack.c.bf16 %v98_v24, %v97_v21 }
  0x3d   :  { %572 = vmatprep.mubr.bf16.mxu1 %v5981_v43 }
  0x3f   :  { %137 = vadd.xlane.f32.xlu0 %v136_v28  ;;  %140 = vadd.xlane.f32.xlu1 %v139_v29  ;;  %v4819_v28 = vcombine.low %v317_v53, %v321_v54 }
  0x41   :  { %4786 = vmatmul.mubr.msk.bf16.gmra.mrb[8].mxu0 %vm357_vm2, %v327_v60 }
  0x42   :  { %469 = vmatprep.mubr.bf16.mxu0 %v5981_v43 }
  0x43   :  { %143 = vadd.xlane.f32.xlu0 %v142_v30  ;;  %146 = vadd.xlane.f32.xlu1 %v145_v31 }
  0x44   :  { %4795 = vmatmul.mubr.msk.bf16.gmra.mrb[8].mxu1 %vm357_vm2, %v327_v60 }
  0x45   :  { %582 = vmatprep.mubr.bf16.mxu1 %v5981_v43 }
  0x49   :  { %4787 = vmatmul.mubr.msk.bf16.gmra.mrb[12].mxu0 %vm357_vm2, %v328_v63 }
  0x4a   :  { %479 = vmatprep.mubr.bf16.mxu0 %v5981_v43 }
  0x4c   :  { %4796 = vmatmul.mubr.msk.bf16.gmra.mrb[12].mxu1 %vm357_vm2, %v328_v63 }
  0x4d   :  { %592 = vmatprep.mubr.bf16.mxu1 %v5981_v43 }
  0x51   :  { %4788 = vmatmul.mubr.msk.bf16.gmra.mrb[16].mxu0 %vm357_vm2, %v6256_v6 }
  0x52   :  { %489 = vmatprep.mubr.bf16.mxu0 %v5981_v43 }
  0x54   :  { %4797 = vmatmul.mubr.msk.bf16.gmra.mrb[16].mxu1 %vm357_vm2, %v6256_v6 }
  0x55   :  { %602 = vmatprep.mubr.bf16.mxu1 %v5981_v43 }
  0x59   :  { %4789 = vmatmul.mubr.msk.bf16.gmra.mrb[20].mxu0 %vm357_vm2, %v6270_v13 }
  0x5a   :  { %499 = vmatprep.mubr.bf16.mxu0 %v5981_v43 }
  0x5c   :  { %4798 = vmatmul.mubr.msk.bf16.gmra.mrb[20].mxu1 %vm357_vm2, %v6270_v13 }
  0x5d   :  { %612 = vmatprep.mubr.bf16.mxu1 %v5981_v43 }
  0x61   :  { %4790 = vmatmul.mubr.msk.bf16.gmra.mrb[24].mxu0 %vm357_vm2, %v6284_v20 }
  0x62   :  { %509 = vmatprep.mubr.bf16.mxu0 %v5981_v43 }
  0x64   :  { %4799 = vmatmul.mubr.msk.bf16.gmra.mrb[24].mxu1 %vm357_vm2, %v6284_v20 }
  0x65   :  { %622 = vmatprep.mubr.bf16.mxu1 %v5981_v43 }
  0x69   :  { %4791 = vmatmul.mubr.msk.bf16.gmra.mrb[28].mxu0 %vm357_vm2, %v6298_v25 }
  0x6a   :  { %665 = vmatprep.mubr.bf16.mxu0 %v5981_v43 }
  0x6c   :  { %4800 = vmatmul.mubr.msk.bf16.gmra.mrb[28].mxu1 %vm357_vm2, %v6298_v25 }
  0x6d   :  { %778 = vmatprep.mubr.bf16.mxu1 %v5981_v43 }
  0x71   :  { %4802 = vmatmul.mubr.msk.bf16.vlgmr.msra.gmra.mrb[32].mxu0 %vm357_vm2, %v6198_v45 }
  0x72   :  { %924 = vmatpush1.bf16.msra.mxu0 %v4819_v28  ;;  %675 = vmatprep.mubr.bf16.mxu0 %v5981_v43 }
  0x74   :  { %4811 = vmatmul.mubr.msk.bf16.vlgmr.msra.gmra.mrb[32].mxu1 %vm357_vm2, %v6198_v45 }
  0x75   :  { %788 = vmatprep.mubr.bf16.mxu1 %v5981_v43 }
  0x79   :  { %4803 = vmatmul.mubr.msk.bf16.gmra.mrb[36].mxu0 %vm357_vm2, %v326_v57 }
  0x7a   :  { %685 = vmatprep.mubr.bf16.mxu0 %v5981_v43 }
  0x7c   :  { %4812 = vmatmul.mubr.msk.bf16.gmra.mrb[36].mxu1 %vm357_vm2, %v326_v57 }
  0x7d   :  { %798 = vmatprep.mubr.bf16.mxu1 %v5981_v43 }
  0x81   :  { %4804 = vmatmul.mubr.msk.bf16.gmra.mrb[40].mxu0 %vm357_vm2, %v327_v60 }
  0x82   :  { %695 = vmatprep.mubr.bf16.mxu0 %v5981_v43 }
  0x84   :  { %4813 = vmatmul.mubr.msk.bf16.gmra.mrb[40].mxu1 %vm357_vm2, %v327_v60 }
  0x85   :  { %808 = vmatprep.mubr.bf16.mxu1 %v5981_v43 }
  0x89   :  { %4805 = vmatmul.mubr.msk.bf16.gmra.mrb[44].mxu0 %vm357_vm2, %v328_v63 }
  0x8a   :  { %705 = vmatprep.mubr.bf16.mxu0 %v5981_v43 }
  0x8c   :  { %4814 = vmatmul.mubr.msk.bf16.gmra.mrb[44].mxu1 %vm357_vm2, %v328_v63 }
  0x8d   :  { %818 = vmatprep.mubr.bf16.mxu1 %v5981_v43 }
  0x91   :  { %4806 = vmatmul.mubr.msk.bf16.gmra.mrb[48].mxu0 %vm357_vm2, %v6256_v6 }
  0x92   :  { %715 = vmatprep.mubr.bf16.mxu0 %v5981_v43 }
  0x94   :  { %4815 = vmatmul.mubr.msk.bf16.gmra.mrb[48].mxu1 %vm357_vm2, %v6256_v6 }
  0x95   :  { %828 = vmatprep.mubr.bf16.mxu1 %v5981_v43 }
  0x99   :  { %4807 = vmatmul.mubr.msk.bf16.gmra.mrb[52].mxu0 %vm357_vm2, %v6270_v13 }
  0x9a   :  { %725 = vmatprep.mubr.bf16.mxu0 %v5981_v43 }
  0x9c   :  { %4816 = vmatmul.mubr.msk.bf16.gmra.mrb[52].mxu1 %vm357_vm2, %v6270_v13 }
  0x9d   :  { %838 = vmatprep.mubr.bf16.mxu1 %v5981_v43 }
  0xa1   :  { %4808 = vmatmul.mubr.msk.bf16.gmra.mrb[56].mxu0 %vm357_vm2, %v6284_v20 }
  0xa2   :  { %735 = vmatprep.mubr.bf16.mxu0 %v5981_v43 }
  0xa4   :  { %4817 = vmatmul.mubr.msk.bf16.gmra.mrb[56].mxu1 %vm357_vm2, %v6284_v20 }
  0xa5   :  { %848 = vmatprep.mubr.bf16.mxu1 %v5981_v43 }
  0xa9   :  { %4809 = vmatmul.mubr.msk.bf16.gmra.mrb[60].mxu0 %vm357_vm2, %v6298_v25 }
  0xaa   :  { %955 = vmatprep.mubr.bf16.mxu0 %v5981_v43 }
  0xac   :  { %4818 = vmatmul.mubr.msk.bf16.gmra.mrb[60].mxu1 %vm357_vm2, %v6298_v25  ;;  %v319_v25 = vld [vmem:[%s7408_s2 + $0x10] sm:$0xff] }
  0xad   :  { %1068 = vmatprep.mubr.bf16.mxu1 %v5981_v43 }
  0xb4   :  { %v102_v29 = vpop.xlane.xlu0 %101  ;;  %v108_v30 = vpop.xlane.xlu1 %107 }
  0xb5   :  { %v149_v31 = vmul.f32 0.0625, %v102_v29  ;;  %v151_v32 = vmul.f32 0.0625, %v108_v30 }
  0xb7   :  { %v6321_v33 = vsub.f32 %v6069_v0, %v149_v31  ;;  %v6324_v34 = vsub.f32 %v6074_v1, %v151_v32 }
  0xb8   :  { %v105_v35 = vpop.xlane.xlu0 %104  ;;  %v111_v36 = vpop.xlane.xlu1 %110 }
  0xb9   :  { %v150_v37 = vmul.f32 0.0625, %v105_v35  ;;  %v152_v38 = vmul.f32 0.0625, %v111_v36  ;;  %v181_v39 = vmul.f32 %v6321_v33, %v6321_v33  ;;  %v183_v40 = vmul.f32 %v6324_v34, %v6324_v34 }
  0xbb   :  { %v6335_v0 = vsub.f32 %v6079_v2, %v150_v37  ;;  %v6338_v1 = vsub.f32 %v6088_v5, %v152_v38  ;;  %v197_v41 = vsel %vm99_vm0, %v181_v39, 0.0  ;;  %v203_v45 = vsel %vm99_vm0, %v183_v40, 0.0 }
  0xbc   :  { %198 = vadd.xlane.f32.xlu0 %v197_v41  ;;  %v114_v42 = vpop.xlane.xlu0 %113  ;;  %v117_v44 = vpop.xlane.xlu1 %116 }
  0xbd   :  { %v153_v46 = vmul.f32 0.0625, %v114_v42  ;;  %v154_v47 = vmul.f32 0.0625, %v117_v44  ;;  %v182_v48 = vmul.f32 %v6335_v0, %v6335_v0  ;;  %v184_v49 = vmul.f32 %v6338_v1, %v6338_v1 }
  0xbf   :  { %v6347_v2 = vsub.f32 %v6097_v8, %v153_v46  ;;  %v6350_v5 = vsub.f32 %v6102_v9, %v154_v47  ;;  %v200_v50 = vsel %vm99_vm0, %v182_v48, 0.0  ;;  %v206_v53 = vsel %vm99_vm0, %v184_v49, 0.0 }
  0xc0   :  { %204 = vadd.xlane.f32.xlu0 %v203_v45  ;;  %201 = vadd.xlane.f32.xlu1 %v200_v50  ;;  %v120_v51 = vpop.xlane.xlu0 %119  ;;  %v123_v52 = vpop.xlane.xlu1 %122 }
  0xc1   :  { %v155_v54 = vmul.f32 0.0625, %v120_v51  ;;  %v156_v55 = vmul.f32 0.0625, %v123_v52  ;;  %v185_v56 = vmul.f32 %v6347_v2, %v6347_v2  ;;  %v186_v8 = vmul.f32 %v6350_v5, %v6350_v5  ;;  %v322_v51 = vld [vmem:[%s7408_s2 + $0x28] sm:$0xff] }
  0xc3   :  { %v6365_v9 = vsub.f32 %v6107_v10, %v155_v54  ;;  %v6368_v57 = vsub.f32 %v6112_v11, %v156_v55  ;;  %v209_v58 = vsel %vm99_vm0, %v185_v56, 0.0  ;;  %v212_v61 = vsel %vm99_vm0, %v186_v8, 0.0  ;;  %v323_v54 = vld [vmem:[%s7408_s2 + $0x30] sm:$0xff]  ;;  %v320_v55 = vld [vmem:[%s7408_s2 + $0x18] sm:$0xff] }
  0xc4   :  { %207 = vadd.xlane.f32.xlu1 %v206_v53  ;;  %210 = vadd.xlane.f32.xlu0 %v209_v58  ;;  %v126_v59 = vpop.xlane.xlu0 %125  ;;  %v129_v60 = vpop.xlane.xlu1 %128  ;;  %v4823_v56 = vcombine.low %v319_v25, %v323_v54  ;;  %v4824_v8 = vcombine.high %v319_v25, %v323_v54  ;;  %v324_v58 = vld [vmem:[%s7408_s2 + $0x38] sm:$0xff] }
  0xc5   :  { %v157_v62 = vmul.f32 0.0625, %v126_v59  ;;  %v158_v63 = vmul.f32 0.0625, %v129_v60  ;;  %v187_v3 = vmul.f32 %v6365_v9, %v6365_v9  ;;  %v188_v10 = vmul.f32 %v6368_v57, %v6368_v57 }
  0xc6   :  { %v4825_v59 = vcombine.low %v320_v55, %v324_v58  ;;  %v4826_v60 = vcombine.high %v320_v55, %v324_v58  ;;  %1149 = vmatprep.subr.bf16.mxu0 %v4824_v8 }
  0xc7   :  { %v6377_v4 = vsub.f32 %v6121_v14, %v157_v62  ;;  %v6380_v11 = vsub.f32 %v6126_v15, %v158_v63  ;;  %v215_v6 = vsel %vm99_vm0, %v187_v3, 0.0  ;;  %v218_v16 = vsel %vm99_vm0, %v188_v10, 0.0 }
  0xc8   :  { %213 = vadd.xlane.f32.xlu1 %v212_v61  ;;  %216 = vadd.xlane.f32.xlu0 %v215_v6  ;;  %v132_v7 = vpop.xlane.xlu0 %131  ;;  %v135_v12 = vpop.xlane.xlu1 %134 }
  0xc9   :  { %v159_v17 = vmul.f32 0.0625, %v132_v7  ;;  %v160_v21 = vmul.f32 0.0625, %v135_v12  ;;  %v189_v24 = vmul.f32 %v6377_v4, %v6377_v4  ;;  %v190_v14 = vmul.f32 %v6380_v11, %v6380_v11 }
  0xcb   :  { %v6395_v15 = vsub.f32 %v6135_v18, %v159_v17  ;;  %v6398_v28 = vsub.f32 %v6140_v19, %v160_v21  ;;  %v221_v29 = vsel %vm99_vm0, %v189_v24, 0.0  ;;  %v224_v32 = vsel %vm99_vm0, %v190_v14, 0.0 }
  0xcc   :  { %219 = vadd.xlane.f32.xlu1 %v218_v16  ;;  %222 = vadd.xlane.f32.xlu0 %v221_v29  ;;  %v138_v30 = vpop.xlane.xlu0 %137  ;;  %v141_v31 = vpop.xlane.xlu1 %140 }
  0xcd   :  { %v161_v35 = vmul.f32 0.0625, %v138_v30  ;;  %v162_v13 = vmul.f32 0.0625, %v141_v31  ;;  %v191_v36 = vmul.f32 %v6395_v15, %v6395_v15  ;;  %v192_v18 = vmul.f32 %v6398_v28, %v6398_v28 }
  0xcf   :  { %v6407_v37 = vsub.f32 %v6149_v22, %v161_v35  ;;  %v6410_v19 = vsub.f32 %v6154_v23, %v162_v13  ;;  %v227_v38 = vsel %vm99_vm0, %v191_v36, 0.0  ;;  %v230_v41 = vsel %vm99_vm0, %v192_v18, 0.0 }
  0xd0   :  { %225 = vadd.xlane.f32.xlu1 %v224_v32  ;;  %228 = vadd.xlane.f32.xlu0 %v227_v38  ;;  %v144_v39 = vpop.xlane.xlu0 %143  ;;  %v147_v40 = vpop.xlane.xlu1 %146 }
  0xd1   :  { %v163_v42 = vmul.f32 0.0625, %v144_v39  ;;  %v164_v44 = vmul.f32 0.0625, %v147_v40  ;;  %v193_v45 = vmul.f32 %v6407_v37, %v6407_v37  ;;  %v194_v22 = vmul.f32 %v6410_v19, %v6410_v19 }
  0xd3   :  { %v6425_v23 = vsub.f32 %v6163_v26, %v163_v42  ;;  %v6428_v46 = vsub.f32 %v6168_v27, %v164_v44  ;;  %v233_v47 = vsel %vm99_vm0, %v193_v45, 0.0  ;;  %v236_v48 = vsel %vm99_vm0, %v194_v22, 0.0  ;;  %v318_v27 = vld [vmem:[%s7408_s2 + $0x8] sm:$0xff]  ;;  %v5515_v22 = vld [vmem:[#allocation2 + $0x4] ss:$16 sps:$4 sm:$0xff]  }
  0xd4   :  { %231 = vadd.xlane.f32.xlu1 %v230_v41  ;;  %234 = vadd.xlane.f32.xlu0 %v233_v47  ;;  %v4822_v52 = vcombine.high %v318_v27, %v322_v51  ;;  %v4821_v53 = vcombine.low %v318_v27, %v322_v51  ;;  %v5518_v47 = vld [vmem:[#allocation2 + $0xc] ss:$16 sps:$4 sm:$0xff]  }
  0xd5   :  { %v195_v49 = vmul.f32 %v6425_v23, %v6425_v23  ;;  %v196_v20 = vmul.f32 %v6428_v46, %v6428_v46 }
  0xd6   :  { %1036 = vmatprep.subr.bf16.mxu1 %v4822_v52 }
  0xd7   :  { %v239_v50 = vsel %vm99_vm0, %v195_v49, 0.0  ;;  %v242_v26 = vsel %vm99_vm0, %v196_v20, 0.0  ;;  %1037 = vmatpush1.bf16.msra.mxu1 %v4821_v53 }
  0xd8   :  { %237 = vadd.xlane.f32.xlu1 %v236_v48  ;;  %240 = vadd.xlane.f32.xlu0 %v239_v50 }
  0xd9   :  { %1262 = vmatprep.subr.bf16.mxu1 %v4826_v60 }
  0xdc   :  { %243 = vadd.xlane.f32.xlu1 %v242_v26 }
 0x149   :  { %v199_v61 = vpop.xlane.xlu0 %198 }
 0x14a   :  { %v245_v62 = vmul.f32 0.0625, %v199_v61 }
 0x14c   :  { %v261_v63 = vadd.f32 1e-05, %v245_v62 }
 0x14d   :  { %v202_v3 = vpop.xlane.xlu1 %201  ;;  %v205_v10 = vpop.xlane.xlu0 %204 }
 0x14e   :  { %v246_v6 = vmul.f32 0.0625, %v202_v3  ;;  %5897 = vrsqrt.f32 %v261_v63  ;;  %v247_v12 = vmul.f32 0.0625, %v205_v10 }
 0x150   :  { %v262_v7 = vadd.f32 1e-05, %v246_v6  ;;  %v263_v21 = vadd.f32 1e-05, %v247_v12 }
 0x151   :  { %v208_v16 = vpop.xlane.xlu1 %207  ;;  %v211_v14 = vpop.xlane.xlu0 %210 }
 0x152   :  { %5899 = vrsqrt.f32 %v262_v7  ;;  %v248_v17 = vmul.f32 0.0625, %v208_v16  ;;  %v249_v31 = vmul.f32 0.0625, %v211_v14 }
 0x154   :  { %v264_v24 = vadd.f32 1e-05, %v248_v17  ;;  %v265_v18 = vadd.f32 1e-05, %v249_v31 }
 0x155   :  { %v214_v29 = vpop.xlane.xlu1 %213  ;;  %v217_v40 = vpop.xlane.xlu0 %216 }
 0x156   :  { %5901 = vrsqrt.f32 %v264_v24  ;;  %v250_v30 = vmul.f32 0.0625, %v214_v29  ;;  %v251_v45 = vmul.f32 0.0625, %v217_v40 }
 0x157   :  { %5903 = vrsqrt.f32 %v263_v21 }
 0x158   :  { %v5898_v32 = vpop.eup %5897  ;;  %v266_v35 = vadd.f32 1e-05, %v250_v30  ;;  %v267_v20 = vadd.f32 1e-05, %v251_v45 }
 0x159   :  { %v220_v13 = vpop.xlane.xlu1 %219  ;;  %v293_v38 = vmul.f32 %v5898_v32, %v6321_v33  ;;  %v223_v50 = vpop.xlane.xlu0 %222 }
 0x15a   :  { %5905 = vrsqrt.f32 %v266_v35  ;;  %v252_v41 = vmul.f32 0.0625, %v220_v13  ;;  %v253_v53 = vmul.f32 0.0625, %v223_v50  ;;  %v5530_v50 = vld [vmem:[#allocation2 + $0x4c] ss:$16 sps:$4 sm:$0xff]  }
 0x15b   :  { %5907 = vrsqrt.f32 %v265_v18 }
 0x15c   :  { %v5900_v36 = vpop.eup %5899  ;;  %v268_v33 = vadd.f32 1e-05, %v252_v41  ;;  %v269_v55 = vadd.f32 1e-05, %v253_v53  ;;  %v5531_v53 = vld [vmem:[#allocation2 + $0x60] ss:$16 sps:$4 sm:$0xff]  }
 0x15d   :  { %v294_v39 = vmul.f32 %v5900_v36, %v6335_v0  ;;  %v226_v0 = vpop.xlane.xlu1 %225 }
 0x15e   :  { %5909 = vrsqrt.f32 %v268_v33  ;;  %v254_v27 = vmul.f32 0.0625, %v226_v0  ;;  %v5516_v33 = vld [vmem:[#allocation2 + $0x8] ss:$16 sps:$4 sm:$0xff]   ;;  %v5521_v0 = vld [vmem:[#allocation2 + $0x24] ss:$16 sps:$4 sm:$0xff]  }
 0x15f   :  { %v6464_v42 = vpack.c.bf16 %v294_v39, %v293_v38  ;;  %5911 = vrsqrt.f32 %v267_v20  ;;  %v5527_v20 = vld [vmem:[#allocation2 + $0x44] ss:$16 sps:$4 sm:$0xff]  }
 0x160   :  { %v5902_v44 = vpop.eup %5901  ;;  %v270_v25 = vadd.f32 1e-05, %v254_v27  ;;  %v5528_v27 = vld [vmem:[#allocation2 + $0x48] ss:$16 sps:$4 sm:$0xff]  }
 0x161   :  { %4827 = vmatmul.mubr.msk.bf16.vlgmr.msra.gmra.mrb[0].mxu0 %vm99_vm0, %v6464_v42  ;;  %4835 = vmatmul.mubr.msk.bf16.vlgmr.msra.gmra.mrb[0].mxu1 %vm99_vm0, %v6464_v42  ;;  %v5904_v48 = vpop.eup %5903  ;;  %v296_v49 = vmul.f32 %v5902_v44, %v6338_v1 }
 0x162   :  { %965 = vmatprep.mubr.bf16.mxu0 %v5981_v43  ;;  %1078 = vmatprep.mubr.bf16.mxu1 %v5981_v43  ;;  %v295_v26 = vmul.f32 %v5904_v48, %v6324_v34  ;;  %v232_v34 = vpop.xlane.xlu1 %231  ;;  %5913 = vrsqrt.f32 %v270_v25  ;;  %v5539_v25 = vld [vmem:[#allocation2 + $0x84] ss:$16 sps:$4 sm:$0xff]  }
 0x163   :  { %1150 = vmatpush1.bf16.msra.mxu0 %v4823_v56  ;;  %1263 = vmatpush1.bf16.msra.mxu1 %v4825_v59  ;;  %v229_v56 = vpop.xlane.xlu0 %228  ;;  %v256_v58 = vmul.f32 0.0625, %v232_v34  ;;  %5915 = vrsqrt.f32 %v269_v55  ;;  %v5542_v34 = vld [vmem:[#allocation2 + $0x8c] ss:$16 sps:$4 sm:$0xff]   ;;  %v5540_v55 = vld [vmem:[#allocation2 + $0x88] ss:$16 sps:$4 sm:$0xff]  }
 0x164   :  { %2495 = vmatprep.subr.bf16.mxu0 %v5515_v22  ;;  %2721 = vmatprep.subr.bf16.mxu1 %v5518_v47  ;;  %v6474_v51 = vpack.c.bf16 %v296_v49, %v295_v26  ;;  %v5906_v52 = vpop.eup %5905  ;;  %v255_v61 = vmul.f32 0.0625, %v229_v56  ;;  %v5524_v49 = vld [vmem:[#allocation2 + $0x2c] ss:$16 sps:$4 sm:$0xff]   ;;  %v5525_v26 = vld [vmem:[#allocation2 + $0x40] ss:$16 sps:$4 sm:$0xff]  }
 0x165   :  { %v5908_v1 = vpop.eup %5907  ;;  %v298_v54 = vmul.f32 %v5906_v52, %v6350_v5  ;;  %v272_v63 = vadd.f32 1e-05, %v256_v58  ;;  %v5533_v52 = vld [vmem:[#allocation2 + $0x64] ss:$16 sps:$4 sm:$0xff]   ;;  %v5546_v58 = vld [vmem:[#allocation2 + $0xa8] ss:$16 sps:$4 sm:$0xff]  }
 0x166   :  { %v297_v8 = vmul.f32 %v5908_v1, %v6347_v2  ;;  %v238_v2 = vpop.xlane.xlu1 %237  ;;  %v271_v3 = vadd.f32 1e-05, %v255_v61  ;;  %v5534_v1 = vld [vmem:[#allocation2 + $0x68] ss:$16 sps:$4 sm:$0xff]   ;;  %v5545_v56 = vld [vmem:[#allocation2 + $0xa4] ss:$16 sps:$4 sm:$0xff]  }
 0x167   :  { %v235_v10 = vpop.xlane.xlu0 %234  ;;  %5917 = vrsqrt.f32 %v272_v63  ;;  %v258_v7 = vmul.f32 0.0625, %v238_v2  ;;  %v5554_v61 = vld [vmem:[#allocation2 + $0xcc] ss:$16 sps:$4 sm:$0xff]   ;;  %v5552_v63 = vld [vmem:[#allocation2 + $0xc8] ss:$16 sps:$4 sm:$0xff]  }
 0x168   :  { %v6484_v59 = vpack.c.bf16 %v298_v54, %v297_v8  ;;  %v5910_v60 = vpop.eup %5909  ;;  %5919 = vrsqrt.f32 %v271_v3  ;;  %v257_v17 = vmul.f32 0.0625, %v235_v10  ;;  %v5537_v54 = vld [vmem:[#allocation2 + $0x80] ss:$16 sps:$4 sm:$0xff]   ;;  %v5557_v2 = vld [vmem:[#allocation2 + $0xe4] ss:$16 sps:$4 sm:$0xff]  }
 0x169   :  { %4828 = vmatmul.mubr.msk.bf16.gmra.mrb[4].mxu0 %vm99_vm0, %v6474_v51  ;;  %4836 = vmatmul.mubr.msk.bf16.gmra.mrb[4].mxu1 %vm99_vm0, %v6474_v51  ;;  %v5912_v62 = vpop.eup %5911  ;;  %v300_v5 = vmul.f32 %v5910_v60, %v6368_v57  ;;  %v274_v24 = vadd.f32 1e-05, %v258_v7  ;;  %v5543_v8 = vld [vmem:[#allocation2 + $0xa0] ss:$16 sps:$4 sm:$0xff]   ;;  %v5551_v60 = vld [vmem:[#allocation2 + $0xc4] ss:$16 sps:$4 sm:$0xff]  }
 0x16a   :  { %975 = vmatprep.mubr.bf16.mxu0 %v5981_v43  ;;  %1088 = vmatprep.mubr.bf16.mxu1 %v5981_v43  ;;  %v299_v6 = vmul.f32 %v5912_v62, %v6365_v9  ;;  %v244_v9 = vpop.xlane.xlu1 %243  ;;  %v273_v14 = vadd.f32 1e-05, %v257_v17  ;;  %v5549_v62 = vld [vmem:[#allocation2 + $0xc0] ss:$16 sps:$4 sm:$0xff]   ;;  %v5558_v3 = vld [vmem:[#allocation2 + $0xe8] ss:$16 sps:$4 sm:$0xff]  }
 0x16b   :  { %v241_v29 = vpop.xlane.xlu0 %240  ;;  %5921 = vrsqrt.f32 %v274_v24  ;;  %v260_v31 = vmul.f32 0.0625, %v244_v9  ;;  %v5563_v10 = vld [vmem:[#allocation2 + $0x104] ss:$16 sps:$4 sm:$0xff]   ;;  %v5561_v7 = vld [vmem:[#allocation2 + $0x100] ss:$16 sps:$4 sm:$0xff]  }
 0x16c   :  { %v6494_v12 = vpack.c.bf16 %v300_v5, %v299_v6  ;;  %v5914_v16 = vpop.eup %5913  ;;  %5923 = vrsqrt.f32 %v273_v14  ;;  %v259_v13 = vmul.f32 0.0625, %v241_v29  ;;  %v5555_v5 = vld [vmem:[#allocation2 + $0xe0] ss:$16 sps:$4 sm:$0xff]   ;;  %v5566_v6 = vld [vmem:[#allocation2 + $0x10c] ss:$16 sps:$4 sm:$0xff]  }
 0x16d   :  { %v5916_v21 = vpop.eup %5915  ;;  %v302_v57 = vmul.f32 %v5914_v16, %v6380_v11  ;;  %v276_v18 = vadd.f32 1e-05, %v260_v31  ;;  %v5564_v16 = vld [vmem:[#allocation2 + $0x108] ss:$16 sps:$4 sm:$0xff]   ;;  %v5569_v17 = vld [vmem:[#allocation2 + $0x124] ss:$16 sps:$4 sm:$0xff]  }
 0x16e   :  { %v301_v30 = vmul.f32 %v5916_v21, %v6377_v4  ;;  %v275_v11 = vadd.f32 1e-05, %v259_v13  ;;  %v5567_v21 = vld [vmem:[#allocation2 + $0x120] ss:$16 sps:$4 sm:$0xff]   ;;  %v5570_v24 = vld [vmem:[#allocation2 + $0x128] ss:$16 sps:$4 sm:$0xff]  }
 0x16f   :  { %5925 = vrsqrt.f32 %v276_v18  ;;  %v5575_v9 = vld [vmem:[#allocation2 + $0x144] ss:$16 sps:$4 sm:$0xff]   ;;  %v5573_v14 = vld [vmem:[#allocation2 + $0x140] ss:$16 sps:$4 sm:$0xff]   ;;  %v5576_v29 = vld [vmem:[#allocation2 + $0x148] ss:$16 sps:$4 sm:$0xff]  }
 0x170   :  { %v6504_v32 = vpack.c.bf16 %v302_v57, %v301_v30  ;;  %5927 = vrsqrt.f32 %v275_v11  ;;  %v5578_v57 = vld [vmem:[#allocation2 + $0x14c] ss:$16 sps:$4 sm:$0xff]   ;;  %v5581_v30 = vld [vmem:[#allocation2 + $0x164] ss:$16 sps:$4 sm:$0xff]   ;;  %v5585_v18 = vld [vmem:[#allocation2 + $0x180] ss:$16 sps:$4 sm:$0xff]  }
 0x171   :  { %4829 = vmatmul.mubr.msk.bf16.gmra.mrb[8].mxu0 %vm99_vm0, %v6484_v59  ;;  %4837 = vmatmul.mubr.msk.bf16.gmra.mrb[8].mxu1 %vm99_vm0, %v6484_v59  ;;  %v5918_v35 = vpop.eup %5917  ;;  %v5584_v31 = vld [vmem:[#allocation2 + $0x16c] ss:$16 sps:$4 sm:$0xff]   ;;  %v5587_v13 = vld [vmem:[#allocation2 + $0x184] ss:$16 sps:$4 sm:$0xff]  }
 0x172   :  { %985 = vmatprep.mubr.bf16.mxu0 %v5981_v43  ;;  %1098 = vmatprep.mubr.bf16.mxu1 %v5981_v43  ;;  %v5920_v36 = vpop.eup %5919  ;;  %v304_v4 = vmul.f32 %v5918_v35, %v6398_v28  ;;  %v5582_v35 = vld [vmem:[#allocation2 + $0x168] ss:$16 sps:$4 sm:$0xff]   ;;  %v5593_v11 = vld [vmem:[#allocation2 + $0x1a4] ss:$16 sps:$4 sm:$0xff]  }
 0x173   :  { %v303_v38 = vmul.f32 %v5920_v36, %v6395_v15  ;;  %v5590_v36 = vld [vmem:[#allocation2 + $0x18c] ss:$16 sps:$4 sm:$0xff]  }
 0x175   :  { %v6514_v39 = vpack.c.bf16 %v304_v4, %v303_v38  ;;  %v5922_v40 = vpop.eup %5921  ;;  %v5588_v4 = vld [vmem:[#allocation2 + $0x188] ss:$16 sps:$4 sm:$0xff]   ;;  %v5596_v38 = vld [vmem:[#allocation2 + $0x1ac] ss:$16 sps:$4 sm:$0xff]  }
 0x176   :  { %v5924_v41 = vpop.eup %5923  ;;  %v306_v28 = vmul.f32 %v5922_v40, %v6410_v19  ;;  %v5594_v40 = vld [vmem:[#allocation2 + $0x1a8] ss:$16 sps:$4 sm:$0xff]  }
 0x177   :  { %v305_v15 = vmul.f32 %v5924_v41, %v6407_v37  ;;  %v5513_v37 = vld [vmem:[#allocation2] ss:$16 sps:$4 sm:$0xff]   ;;  %v5599_v41 = vld [vmem:[#allocation2 + $0x1c4] ss:$16 sps:$4 sm:$0xff]  }
 0x179   :  { %4830 = vmatmul.mubr.msk.bf16.gmra.mrb[12].mxu0 %vm99_vm0, %v6494_v12  ;;  %4838 = vmatmul.mubr.msk.bf16.gmra.mrb[12].mxu1 %vm99_vm0, %v6494_v12  ;;  %v6524_v44 = vpack.c.bf16 %v306_v28, %v305_v15  ;;  %v5926_v45 = vpop.eup %5925  ;;  %v5602_v28 = vld [vmem:[#allocation2 + $0x1cc] ss:$16 sps:$4 sm:$0xff]   ;;  %v5597_v15 = vld [vmem:[#allocation2 + $0x1c0] ss:$16 sps:$4 sm:$0xff]  }
 0x17a   :  { %995 = vmatprep.mubr.bf16.mxu0 %v5981_v43  ;;  %1108 = vmatprep.mubr.bf16.mxu1 %v5981_v43  ;;  %v5928_v22 = vpop.eup %5927  ;;  %v308_v47 = vmul.f32 %v5926_v45, %v6428_v46  ;;  %v5522_v46 = vld [vmem:[#allocation2 + $0x28] ss:$16 sps:$4 sm:$0xff]  }
 0x17b   :  { %v307_v19 = vmul.f32 %v5928_v22, %v6425_v23  ;;  %v5519_v23 = vld [vmem:[#allocation2 + $0x20] ss:$16 sps:$4 sm:$0xff]   ;;  %v5600_v45 = vld [vmem:[#allocation2 + $0x1c8] ss:$16 sps:$4 sm:$0xff]   ;;  %v5605_v22 = vld [vmem:[#allocation2 + $0x1e4] ss:$16 sps:$4 sm:$0xff]  }
 0x17d   :  { %v6534_v48 = vpack.c.bf16 %v308_v47, %v307_v19  ;;  %v5606_v47 = vld [vmem:[#allocation2 + $0x1e8] ss:$16 sps:$4 sm:$0xff]   ;;  %v5611_v19 = vld [vmem:[#allocation2 + $0x204] ss:$16 sps:$4 sm:$0xff]  }
 0x181   :  { %4831 = vmatmul.mubr.msk.bf16.gmra.mrb[16].mxu0 %vm99_vm0, %v6504_v32  ;;  %4839 = vmatmul.mubr.msk.bf16.gmra.mrb[16].mxu1 %vm99_vm0, %v6504_v32 }
 0x182   :  { %1005 = vmatprep.mubr.bf16.mxu0 %v5981_v43  ;;  %1118 = vmatprep.mubr.bf16.mxu1 %v5981_v43 }
 0x189   :  { %4832 = vmatmul.mubr.msk.bf16.gmra.mrb[20].mxu0 %vm99_vm0, %v6514_v39  ;;  %4840 = vmatmul.mubr.msk.bf16.gmra.mrb[20].mxu1 %vm99_vm0, %v6514_v39 }
 0x18a   :  { %1015 = vmatprep.mubr.bf16.mxu0 %v5981_v43  ;;  %1128 = vmatprep.mubr.bf16.mxu1 %v5981_v43 }
 0x191   :  { %4833 = vmatmul.mubr.msk.bf16.gmra.mrb[24].mxu0 %vm99_vm0, %v6524_v44  ;;  %4841 = vmatmul.mubr.msk.bf16.gmra.mrb[24].mxu1 %vm99_vm0, %v6524_v44 }
 0x192   :  { %1025 = vmatprep.mubr.bf16.mxu0 %v5981_v43  ;;  %1138 = vmatprep.mubr.bf16.mxu1 %v5981_v43 }
 0x199   :  { %4834 = vmatmul.mubr.msk.bf16.gmra.mrb[28].mxu0 %vm99_vm0, %v6534_v48  ;;  %4842 = vmatmul.mubr.msk.bf16.gmra.mrb[28].mxu1 %vm99_vm0, %v6534_v48 }
 0x19a   :  { %1181 = vmatprep.mubr.bf16.mxu0 %v5981_v43  ;;  %1294 = vmatprep.mubr.bf16.mxu1 %v5981_v43 }
 0x1a1   :  { %4843 = vmatmul.mubr.msk.bf16.vlgmr.msra.gmra.mrb[32].mxu0 %vm99_vm0, %v6464_v42  ;;  %4851 = vmatmul.mubr.msk.bf16.vlgmr.msra.gmra.mrb[32].mxu1 %vm99_vm0, %v6464_v42  ;;  %v5536_v42 = vld [vmem:[#allocation2 + $0x6c] ss:$16 sps:$4 sm:$0xff]  }
 0x1a2   :  { %1191 = vmatprep.mubr.bf16.mxu0 %v5981_v43  ;;  %1304 = vmatprep.mubr.bf16.mxu1 %v5981_v43 }
 0x1a3   :  { %2496 = vmatpush1.bf16.msra.mxu0 %v5513_v37  ;;  %2722 = vmatpush1.bf16.msra.mxu1 %v5516_v33  ;;  %v5614_v37 = vld [vmem:[#allocation2 + $0x20c] ss:$16 sps:$4 sm:$0xff]   ;;  %v1377_v33 = vlaneseq }
 0x1a4   :  { %2497 = vmatprep.subr.bf16.mxu0 %v5521_v0  ;;  %2723 = vmatprep.subr.bf16.mxu1 %v5524_v49 }
 0x1a5   :  { %v6588_v0 = vshrl.u32 %v1377_v33, 7 }
 0x1a7   :  { %2498 = vmatpush1.bf16.msra.mxu0 %v5519_v23  ;;  %2724 = vmatpush1.bf16.msra.mxu1 %v5522_v46  ;;  %v6591_v49 = vsub.s32 0, %v6588_v0  ;;  %v6599_v23 = vld [vmem:[%s7410_s4] sm:$0xff]  ;;  %v6602_v46 = vsub.s32 1, %v6588_v0 }
 0x1a8   :  { %2499 = vmatprep.subr.bf16.mxu0 %v5527_v20  ;;  %2725 = vmatprep.subr.bf16.mxu1 %v5530_v50  ;;  %v6605_v20 = vsub.s32 3, %v6588_v0 }
 0x1a9   :  { %4844 = vmatmul.mubr.msk.bf16.gmra.mrb[36].mxu0 %vm99_vm0, %v6474_v51  ;;  %4852 = vmatmul.mubr.msk.bf16.gmra.mrb[36].mxu1 %vm99_vm0, %v6474_v51  ;;  %v5548_v51 = vld [vmem:[#allocation2 + $0xac] ss:$16 sps:$4 sm:$0xff]   ;;  %v6609_v50 = vrot.slane %v6599_v23, %v6591_v49 }
 0x1aa   :  { %1201 = vmatprep.mubr.bf16.mxu0 %v5981_v43  ;;  %1314 = vmatprep.mubr.bf16.mxu1 %v5981_v43 }
 0x1ab   :  { %2500 = vmatpush1.bf16.msra.mxu0 %v5525_v26  ;;  %2726 = vmatpush1.bf16.msra.mxu1 %v5528_v27  ;;  %v6617_v27 = vrot.slane %v6599_v23, %v6602_v46 }
 0x1ac   :  { %2501 = vmatprep.subr.bf16.mxu0 %v5533_v52  ;;  %2727 = vmatprep.subr.bf16.mxu1 %v5536_v42  ;;  %v6621_v52 = vrot.slane %v6599_v23, %v6605_v20 }
 0x1af   :  { %2502 = vmatpush1.bf16.msra.mxu0 %v5531_v53  ;;  %2728 = vmatpush1.bf16.msra.mxu1 %v5534_v1 }
 0x1b0   :  { %2503 = vmatprep.subr.bf16.mxu0 %v5539_v25  ;;  %2729 = vmatprep.subr.bf16.mxu1 %v5542_v34 }
 0x1b1   :  { %4845 = vmatmul.mubr.msk.bf16.gmra.mrb[40].mxu0 %vm99_vm0, %v6484_v59  ;;  %4853 = vmatmul.mubr.msk.bf16.gmra.mrb[40].mxu1 %vm99_vm0, %v6484_v59  ;;  %v5560_v59 = vld [vmem:[#allocation2 + $0xec] ss:$16 sps:$4 sm:$0xff]  }
 0x1b2   :  { %1211 = vmatprep.mubr.bf16.mxu0 %v5981_v43  ;;  %1324 = vmatprep.mubr.bf16.mxu1 %v5981_v43 }
 0x1b3   :  { %2504 = vmatpush1.bf16.msra.mxu0 %v5537_v54  ;;  %2730 = vmatpush1.bf16.msra.mxu1 %v5540_v55 }
 0x1b4   :  { %2505 = vmatprep.subr.bf16.mxu0 %v5545_v56  ;;  %2731 = vmatprep.subr.bf16.mxu1 %v5548_v51 }
 0x1b7   :  { %2506 = vmatpush1.bf16.msra.mxu0 %v5543_v8  ;;  %2732 = vmatpush1.bf16.msra.mxu1 %v5546_v58 }
 0x1b8   :  { %2507 = vmatprep.subr.bf16.mxu0 %v5551_v60  ;;  %2733 = vmatprep.subr.bf16.mxu1 %v5554_v61 }
 0x1b9   :  { %4846 = vmatmul.mubr.msk.bf16.gmra.mrb[44].mxu0 %vm99_vm0, %v6494_v12  ;;  %4854 = vmatmul.mubr.msk.bf16.gmra.mrb[44].mxu1 %vm99_vm0, %v6494_v12  ;;  %v5572_v12 = vld [vmem:[#allocation2 + $0x12c] ss:$16 sps:$4 sm:$0xff]  }
 0x1ba   :  { %1221 = vmatprep.mubr.bf16.mxu0 %v5981_v43  ;;  %1334 = vmatprep.mubr.bf16.mxu1 %v5981_v43 }
 0x1bb   :  { %2508 = vmatpush1.bf16.msra.mxu0 %v5549_v62  ;;  %2734 = vmatpush1.bf16.msra.mxu1 %v5552_v63 }
 0x1bc   :  { %2509 = vmatprep.subr.bf16.mxu0 %v5557_v2  ;;  %2735 = vmatprep.subr.bf16.mxu1 %v5560_v59 }
 0x1bf   :  { %2510 = vmatpush1.bf16.msra.mxu0 %v5555_v5  ;;  %2736 = vmatpush1.bf16.msra.mxu1 %v5558_v3 }
 0x1c0   :  { %2511 = vmatprep.subr.bf16.mxu0 %v5563_v10  ;;  %2737 = vmatprep.subr.bf16.mxu1 %v5566_v6 }
 0x1c1   :  { %4847 = vmatmul.mubr.msk.bf16.gmra.mrb[48].mxu0 %vm99_vm0, %v6504_v32  ;;  %4855 = vmatmul.mubr.msk.bf16.gmra.mrb[48].mxu1 %vm99_vm0, %v6504_v32  ;;  %v5579_v32 = vld [vmem:[#allocation2 + $0x160] ss:$16 sps:$4 sm:$0xff]  }
 0x1c2   :  { %1231 = vmatprep.mubr.bf16.mxu0 %v5981_v43  ;;  %1344 = vmatprep.mubr.bf16.mxu1 %v5981_v43 }
 0x1c3   :  { %2512 = vmatpush1.bf16.msra.mxu0 %v5561_v7  ;;  %2738 = vmatpush1.bf16.msra.mxu1 %v5564_v16 }
 0x1c4   :  { %2513 = vmatprep.subr.bf16.mxu0 %v5569_v17  ;;  %2739 = vmatprep.subr.bf16.mxu1 %v5572_v12 }
 0x1c7   :  { %2514 = vmatpush1.bf16.msra.mxu0 %v5567_v21  ;;  %2740 = vmatpush1.bf16.msra.mxu1 %v5570_v24 }
 0x1c8   :  { %2515 = vmatprep.subr.bf16.mxu0 %v5575_v9  ;;  %2741 = vmatprep.subr.bf16.mxu1 %v5578_v57 }
 0x1c9   :  { %4848 = vmatmul.mubr.msk.bf16.gmra.mrb[52].mxu0 %vm99_vm0, %v6514_v39  ;;  %4856 = vmatmul.mubr.msk.bf16.gmra.mrb[52].mxu1 %vm99_vm0, %v6514_v39  ;;  %v5591_v39 = vld [vmem:[#allocation2 + $0x1a0] ss:$16 sps:$4 sm:$0xff]  }
 0x1ca   :  { %1241 = vmatprep.mubr.bf16.mxu0 %v5981_v43  ;;  %1354 = vmatprep.mubr.bf16.mxu1 %v5981_v43 }
 0x1cb   :  { %2516 = vmatpush1.bf16.msra.mxu0 %v5573_v14  ;;  %2742 = vmatpush1.bf16.msra.mxu1 %v5576_v29  ;;  %v5609_v29 = vld [vmem:[#allocation2 + $0x200] ss:$16 sps:$4 sm:$0xff]  }
 0x1cc   :  { %2517 = vmatprep.subr.bf16.mxu0 %v5581_v30  ;;  %2743 = vmatprep.subr.bf16.mxu1 %v5584_v31  ;;  %v5612_v30 = vld [vmem:[#allocation2 + $0x208] ss:$16 sps:$4 sm:$0xff]  }
 0x1cf   :  { %2518 = vmatpush1.bf16.msra.mxu0 %v5579_v32  ;;  %2744 = vmatpush1.bf16.msra.mxu1 %v5582_v35 }
 0x1d0   :  { %2519 = vmatprep.subr.bf16.mxu0 %v5587_v13  ;;  %2745 = vmatprep.subr.bf16.mxu1 %v5590_v36  ;;  %v5617_v36 = vld [vmem:[#allocation2 + $0x224] ss:$16 sps:$4 sm:$0xff]  }
 0x1d1   :  { %4849 = vmatmul.mubr.msk.bf16.gmra.mrb[56].mxu0 %vm99_vm0, %v6524_v44  ;;  %4857 = vmatmul.mubr.msk.bf16.gmra.mrb[56].mxu1 %vm99_vm0, %v6524_v44  ;;  %v5608_v44 = vld [vmem:[#allocation2 + $0x1ec] ss:$16 sps:$4 sm:$0xff]  }
 0x1d2   :  { %1251 = vmatprep.mubr.bf16.mxu0 %v5981_v43  ;;  %1364 = vmatprep.mubr.bf16.mxu1 %v5981_v43  ;;  %v5603_v43 = vld [vmem:[#allocation2 + $0x1e0] ss:$16 sps:$4 sm:$0xff]  }
 0x1d3   :  { %2520 = vmatpush1.bf16.msra.mxu0 %v5585_v18  ;;  %2746 = vmatpush1.bf16.msra.mxu1 %v5588_v4  ;;  %v5620_v18 = vld [vmem:[#allocation2 + $0x22c] ss:$16 sps:$4 sm:$0xff]  }
 0x1d4   :  { %2521 = vmatprep.subr.bf16.mxu0 %v5593_v11  ;;  %2747 = vmatprep.subr.bf16.mxu1 %v5596_v38 }
 0x1d7   :  { %2522 = vmatpush1.bf16.msra.mxu0 %v5591_v39  ;;  %2748 = vmatpush1.bf16.msra.mxu1 %v5594_v40 }
 0x1d8   :  { %2523 = vmatprep.subr.bf16.mxu0 %v5599_v41  ;;  %2749 = vmatprep.subr.bf16.mxu1 %v5602_v28 }
 0x1d9   :  { %4850 = vmatmul.mubr.msk.bf16.gmra.mrb[60].mxu0 %vm99_vm0, %v6534_v48  ;;  %4858 = vmatmul.mubr.msk.bf16.gmra.mrb[60].mxu1 %vm99_vm0, %v6534_v48  ;;  %v6594_v48 = vsub.s32 2, %v6588_v0 }
 0x1db   :  { %2524 = vmatpush1.bf16.msra.mxu0 %v5597_v15  ;;  %2750 = vmatpush1.bf16.msra.mxu1 %v5600_v45  ;;  %v6613_v26 = vrot.slane %v6599_v23, %v6594_v48 }
 0x1dc   :  { %2525 = vmatprep.subr.bf16.mxu0 %v5605_v22  ;;  %2751 = vmatprep.subr.bf16.mxu1 %v5608_v44  ;;  %v5615_v44 = vld [vmem:[#allocation2 + $0x220] ss:$16 sps:$4 sm:$0xff]  }
 0x1df   :  { %2526 = vmatpush1.bf16.msra.mxu0 %v5603_v43  ;;  %2752 = vmatpush1.bf16.msra.mxu1 %v5606_v47  ;;  %v5618_v43 = vld [vmem:[#allocation2 + $0x228] ss:$16 sps:$4 sm:$0xff]   ;;  %v5623_v47 = vld [vmem:[#allocation2 + $0x244] ss:$16 sps:$4 sm:$0xff]  }
 0x1e0   :  { %2608 = vmatprep.subr.bf16.mxu0 %v5611_v19  ;;  %2834 = vmatprep.subr.bf16.mxu1 %v5614_v37 }
 0x234   :  { %v957_v42 = vpop.f32.mrb[0].mxu0  ;;  %v1070_v53 = vpop.f32.mrb[0].mxu1 }
 0x235   :  { %v1417_v1 = vadd.f32 %v6609_v50, %v957_v42  ;;  %v1419_v25 = vadd.f32 %v6613_v26, %v1070_v53  ;;  %v959_v34 = vpop.f32.mrb[1].mxu0  ;;  %v1072_v54 = vpop.f32.mrb[1].mxu1  ;;  %v5626_v53 = vld [vmem:[#allocation2 + $0x24c] ss:$16 sps:$4 sm:$0xff]  }
 0x236   :  { %v1418_v55 = vadd.f32 %v6617_v27, %v959_v34  ;;  %v1420_v56 = vadd.f32 %v6621_v52, %v1072_v54  ;;  %v961_v51 = vpop.f32.mrb[2].mxu0  ;;  %v1074_v8 = vpop.f32.mrb[2].mxu1 }
 0x237   :  { %v1425_v58 = vadd.f32 %v6609_v50, %v961_v51  ;;  %v1427_v60 = vadd.f32 %v6613_v26, %v1074_v8  ;;  %v963_v61 = vpop.f32.mrb[3].mxu0  ;;  %v1076_v62 = vpop.f32.mrb[3].mxu1  ;;  %v1545_v59 = vmax.f32 %v1417_v1, 0.0  ;;  %v1547_v5 = vmax.f32 %v1419_v25, 0.0 }
 0x238   :  { %v1426_v63 = vadd.f32 %v6617_v27, %v963_v61  ;;  %v1428_v2 = vadd.f32 %v6621_v52, %v1076_v62  ;;  %v1546_v6 = vmax.f32 %v1418_v55, 0.0  ;;  %v1548_v7 = vmax.f32 %v1420_v56, 0.0  ;;  %v5621_v61 = vld [vmem:[#allocation2 + $0x240] ss:$16 sps:$4 sm:$0xff]   ;;  %v5624_v62 = vld [vmem:[#allocation2 + $0x248] ss:$16 sps:$4 sm:$0xff]  }
 0x239   :  { %v1553_v3 = vmax.f32 %v1425_v58, 0.0  ;;  %v1555_v10 = vmax.f32 %v1427_v60, 0.0 }
 0x23a   :  { %v1554_v16 = vmax.f32 %v1426_v63, 0.0  ;;  %v1556_v17 = vmax.f32 %v1428_v2, 0.0 }
 0x23b   :  { %v1673_v12 = vpack.c.bf16 %v1553_v3, %v1545_v59  ;;  %v6631_v21 = vpack.c.bf16 %v1555_v10, %v1547_v5  ;;  %v5629_v3 = vld [vmem:[#allocation2 + $0x264] ss:$16 sps:$4 sm:$0xff]   ;;  %v5632_v10 = vld [vmem:[#allocation2 + $0x26c] ss:$16 sps:$4 sm:$0xff]  }
 0x23c   :  { %v1674_v24 = vpack.c.bf16 %v1554_v16, %v1546_v6  ;;  %v6633_v9 = vpack.c.bf16 %v1556_v17, %v1548_v7  ;;  %v967_v57 = vpop.f32.mrb[4].mxu0  ;;  %v1080_v14 = vpop.f32.mrb[4].mxu1 }
 0x23d   :  { %v1433_v31 = vadd.f32 %v6609_v50, %v967_v57  ;;  %v1435_v32 = vadd.f32 %v6613_v26, %v1080_v14  ;;  %v969_v35 = vpop.f32.mrb[5].mxu0  ;;  %v1082_v13 = vpop.f32.mrb[5].mxu1 }
 0x23e   :  { %v1434_v4 = vadd.f32 %v6617_v27, %v969_v35  ;;  %v1436_v11 = vadd.f32 %v6621_v52, %v1082_v13  ;;  %v971_v38 = vpop.f32.mrb[6].mxu0  ;;  %v1084_v39 = vpop.f32.mrb[6].mxu1  ;;  %2527 = vmatprep.mubr.bf16.mxu0 %v1674_v24  ;;  %2753 = vmatprep.mubr.bf16.mxu1 %v1674_v24  ;;  %v5635_v35 = vld [vmem:[#allocation2 + $0x284] ss:$16 sps:$4 sm:$0xff]  }
 0x23f   :  { %v1441_v40 = vadd.f32 %v6609_v50, %v971_v38  ;;  %v1443_v41 = vadd.f32 %v6613_v26, %v1084_v39  ;;  %v973_v28 = vpop.f32.mrb[7].mxu0  ;;  %v1086_v15 = vpop.f32.mrb[7].mxu1  ;;  %2528 = vmatmul.mubr.bf16.vlgmr.msra.gmra.mrb[64].mxu0 %v1673_v12  ;;  %2754 = vmatmul.mubr.bf16.vlgmr.msra.gmra.mrb[64].mxu1 %v1673_v12  ;;  %v1561_v19 = vmax.f32 %v1433_v31, 0.0  ;;  %v1563_v37 = vmax.f32 %v1435_v32, 0.0  ;;  %v5627_v31 = vld [vmem:[#allocation2 + $0x260] ss:$16 sps:$4 sm:$0xff]  }
 0x240   :  { %v1442_v45 = vadd.f32 %v6617_v27, %v973_v28  ;;  %v1444_v22 = vadd.f32 %v6621_v52, %v1086_v15  ;;  %2609 = vmatpush1.bf16.msra.mxu0 %v5609_v29  ;;  %2835 = vmatpush1.bf16.msra.mxu1 %v5612_v30  ;;  %v1562_v1 = vmax.f32 %v1434_v4, 0.0  ;;  %v1564_v25 = vmax.f32 %v1436_v11, 0.0  ;;  %v5630_v32 = vld [vmem:[#allocation2 + $0x268] ss:$16 sps:$4 sm:$0xff]   ;;  %v5638_v11 = vld [vmem:[#allocation2 + $0x28c] ss:$16 sps:$4 sm:$0xff]  }
 0x241   :  { %v1569_v33 = vmax.f32 %v1441_v40, 0.0  ;;  %v1571_v42 = vmax.f32 %v1443_v41, 0.0  ;;  %2610 = vmatprep.subr.bf16.mxu0 %v5617_v36  ;;  %2836 = vmatprep.subr.bf16.mxu1 %v5620_v18 }
 0x242   :  { %v1570_v34 = vmax.f32 %v1442_v45, 0.0  ;;  %v1572_v54 = vmax.f32 %v1444_v22, 0.0 }
 0x243   :  { %v1677_v55 = vpack.c.bf16 %v1569_v33, %v1561_v19  ;;  %v6643_v56 = vpack.c.bf16 %v1571_v42, %v1563_v37  ;;  %v5636_v19 = vld [vmem:[#allocation2 + $0x288] ss:$16 sps:$4 sm:$0xff]  }
 0x244   :  { %v1678_v51 = vpack.c.bf16 %v1570_v34, %v1562_v1  ;;  %v6645_v8 = vpack.c.bf16 %v1572_v54, %v1564_v25  ;;  %2611 = vmatpush1.bf16.msra.mxu0 %v5615_v44  ;;  %v977_v58 = vpop.f32.mrb[8].mxu0  ;;  %v1090_v60 = vpop.f32.mrb[8].mxu1  ;;  %2837 = vmatpush1.bf16.msra.mxu1 %v5618_v43  ;;  %v5641_v1 = vld [vmem:[#allocation2 + $0x2a4] ss:$16 sps:$4 sm:$0xff]   ;;  %v5644_v25 = vld [vmem:[#allocation2 + $0x2ac] ss:$16 sps:$4 sm:$0xff]  }
 0x245   :  { %v1449_v63 = vadd.f32 %v6609_v50, %v977_v58  ;;  %v1451_v2 = vadd.f32 %v6613_v26, %v1090_v60  ;;  %v979_v59 = vpop.f32.mrb[9].mxu0  ;;  %v1092_v5 = vpop.f32.mrb[9].mxu1  ;;  %2612 = vmatprep.subr.bf16.mxu0 %v5623_v47  ;;  %2838 = vmatprep.subr.bf16.mxu1 %v5626_v53  ;;  %v5633_v47 = vld [vmem:[#allocation2 + $0x280] ss:$16 sps:$4 sm:$0xff]  }
 0x246   :  { %v1450_v6 = vadd.f32 %v6617_v27, %v979_v59  ;;  %v1452_v7 = vadd.f32 %v6621_v52, %v1092_v5  ;;  %v981_v16 = vpop.f32.mrb[10].mxu0  ;;  %v1094_v17 = vpop.f32.mrb[10].mxu1  ;;  %2537 = vmatprep.mubr.bf16.mxu0 %v1678_v51  ;;  %2763 = vmatprep.mubr.bf16.mxu1 %v1678_v51  ;;  %v5639_v59 = vld [vmem:[#allocation2 + $0x2a0] ss:$16 sps:$4 sm:$0xff]   ;;  %v5642_v5 = vld [vmem:[#allocation2 + $0x2a8] ss:$16 sps:$4 sm:$0xff]  }
 0x247   :  { %v1457_v12 = vadd.f32 %v6609_v50, %v981_v16  ;;  %v1459_v24 = vadd.f32 %v6613_v26, %v1094_v17  ;;  %v983_v57 = vpop.f32.mrb[11].mxu0  ;;  %v1096_v14 = vpop.f32.mrb[11].mxu1  ;;  %2538 = vmatmul.mubr.bf16.gmra.mrb[68].mxu0 %v1677_v55  ;;  %2764 = vmatmul.mubr.bf16.gmra.mrb[68].mxu1 %v1677_v55  ;;  %v1577_v13 = vmax.f32 %v1449_v63, 0.0  ;;  %v1579_v36 = vmax.f32 %v1451_v2, 0.0  ;;  %v5650_v17 = vld [vmem:[#allocation2 + $0x2cc] ss:$16 sps:$4 sm:$0xff]  }
 0x248   :  { %v1458_v29 = vadd.f32 %v6617_v27, %v983_v57  ;;  %v1460_v30 = vadd.f32 %v6621_v52, %v1096_v14  ;;  %2613 = vmatpush1.bf16.msra.mxu0 %v5621_v61  ;;  %2839 = vmatpush1.bf16.msra.mxu1 %v5624_v62  ;;  %v1578_v38 = vmax.f32 %v1450_v6, 0.0  ;;  %v1580_v39 = vmax.f32 %v1452_v7, 0.0 }
 0x249   :  { %v1585_v18 = vmax.f32 %v1457_v12, 0.0  ;;  %v1587_v4 = vmax.f32 %v1459_v24, 0.0  ;;  %2614 = vmatprep.subr.bf16.mxu0 %v5629_v3  ;;  %2840 = vmatprep.subr.bf16.mxu1 %v5632_v10  ;;  %v5647_v3 = vld [vmem:[#allocation2 + $0x2c4] ss:$16 sps:$4 sm:$0xff]  }
 0x24a   :  { %v1586_v40 = vmax.f32 %v1458_v29, 0.0  ;;  %v1588_v41 = vmax.f32 %v1460_v30, 0.0 }
 0x24b   :  { %v1681_v28 = vpack.c.bf16 %v1585_v18, %v1577_v13  ;;  %v6655_v15 = vpack.c.bf16 %v1587_v4, %v1579_v36  ;;  %v5645_v36 = vld [vmem:[#allocation2 + $0x2c0] ss:$16 sps:$4 sm:$0xff]   ;;  %v5648_v18 = vld [vmem:[#allocation2 + $0x2c8] ss:$16 sps:$4 sm:$0xff]  }
 0x24c   :  { %v1682_v45 = vpack.c.bf16 %v1586_v40, %v1578_v38  ;;  %v6657_v22 = vpack.c.bf16 %v1588_v41, %v1580_v39  ;;  %2615 = vmatpush1.bf16.msra.mxu0 %v5627_v31  ;;  %v987_v44 = vpop.f32.mrb[12].mxu0  ;;  %v1100_v43 = vpop.f32.mrb[12].mxu1  ;;  %2841 = vmatpush1.bf16.msra.mxu1 %v5630_v32  ;;  %v5653_v40 = vld [vmem:[#allocation2 + $0x2e4] ss:$16 sps:$4 sm:$0xff]   ;;  %v5656_v41 = vld [vmem:[#allocation2 + $0x2ec] ss:$16 sps:$4 sm:$0xff]  }
 0x24d   :  { %v1465_v37 = vadd.f32 %v6609_v50, %v987_v44  ;;  %v1467_v33 = vadd.f32 %v6613_v26, %v1100_v43  ;;  %v989_v42 = vpop.f32.mrb[13].mxu0  ;;  %v1102_v53 = vpop.f32.mrb[13].mxu1  ;;  %2616 = vmatprep.subr.bf16.mxu0 %v5635_v35  ;;  %2842 = vmatprep.subr.bf16.mxu1 %v5638_v11 }
 0x24e   :  { %v1466_v34 = vadd.f32 %v6617_v27, %v989_v42  ;;  %v1468_v54 = vadd.f32 %v6621_v52, %v1102_v53  ;;  %v991_v55 = vpop.f32.mrb[14].mxu0  ;;  %v1104_v51 = vpop.f32.mrb[14].mxu1  ;;  %2547 = vmatprep.mubr.bf16.mxu0 %v1682_v45  ;;  %2773 = vmatprep.mubr.bf16.mxu1 %v1682_v45 }
 0x24f   :  { %v1473_v58 = vadd.f32 %v6609_v50, %v991_v55  ;;  %v1475_v60 = vadd.f32 %v6613_v26, %v1104_v51  ;;  %v993_v61 = vpop.f32.mrb[15].mxu0  ;;  %v1106_v62 = vpop.f32.mrb[15].mxu1  ;;  %2548 = vmatmul.mubr.bf16.gmra.mrb[72].mxu0 %v1681_v28  ;;  %2774 = vmatmul.mubr.bf16.gmra.mrb[72].mxu1 %v1681_v28  ;;  %v1593_v10 = vmax.f32 %v1465_v37, 0.0  ;;  %v1595_v6 = vmax.f32 %v1467_v33, 0.0 }
 0x250   :  { %v1474_v63 = vadd.f32 %v6617_v27, %v993_v61  ;;  %v1476_v2 = vadd.f32 %v6621_v52, %v1106_v62  ;;  %2617 = vmatpush1.bf16.msra.mxu0 %v5633_v47  ;;  %2843 = vmatpush1.bf16.msra.mxu1 %v5636_v19  ;;  %v1594_v12 = vmax.f32 %v1466_v34, 0.0  ;;  %v1596_v24 = vmax.f32 %v1468_v54, 0.0  ;;  %v5659_v34 = vld [vmem:[#allocation2 + $0x304] ss:$16 sps:$4 sm:$0xff]  }
 0x251   :  { %v1601_v7 = vmax.f32 %v1473_v58, 0.0  ;;  %v1603_v16 = vmax.f32 %v1475_v60, 0.0  ;;  %2618 = vmatprep.subr.bf16.mxu0 %v5641_v1  ;;  %2844 = vmatprep.subr.bf16.mxu1 %v5644_v25  ;;  %v5651_v1 = vld [vmem:[#allocation2 + $0x2e0] ss:$16 sps:$4 sm:$0xff]   ;;  %v5654_v25 = vld [vmem:[#allocation2 + $0x2e8] ss:$16 sps:$4 sm:$0xff]  }
 0x252   :  { %v1602_v57 = vmax.f32 %v1474_v63, 0.0  ;;  %v1604_v14 = vmax.f32 %v1476_v2, 0.0  ;;  %v5662_v60 = vld [vmem:[#allocation2 + $0x30c] ss:$16 sps:$4 sm:$0xff]  }
 0x253   :  { %v1685_v29 = vpack.c.bf16 %v1601_v7, %v1593_v10  ;;  %v6667_v30 = vpack.c.bf16 %v1603_v16, %v1595_v6  ;;  %v5657_v16 = vld [vmem:[#allocation2 + $0x300] ss:$16 sps:$4 sm:$0xff]  }
 0x254   :  { %v1686_v31 = vpack.c.bf16 %v1602_v57, %v1594_v12  ;;  %v6669_v32 = vpack.c.bf16 %v1604_v14, %v1596_v24  ;;  %2619 = vmatpush1.bf16.msra.mxu0 %v5639_v59  ;;  %v997_v35 = vpop.f32.mrb[16].mxu0  ;;  %v1110_v13 = vpop.f32.mrb[16].mxu1  ;;  %2845 = vmatpush1.bf16.msra.mxu1 %v5642_v5 }
 0x255   :  { %v1481_v4 = vadd.f32 %v6609_v50, %v997_v35  ;;  %v1483_v11 = vadd.f32 %v6613_v26, %v1110_v13  ;;  %v999_v38 = vpop.f32.mrb[17].mxu0  ;;  %v1112_v39 = vpop.f32.mrb[17].mxu1  ;;  %2620 = vmatprep.subr.bf16.mxu0 %v5647_v3  ;;  %2846 = vmatprep.subr.bf16.mxu1 %v5650_v17  ;;  %v5660_v17 = vld [vmem:[#allocation2 + $0x308] ss:$16 sps:$4 sm:$0xff]  }
 0x256   :  { %v1482_v28 = vadd.f32 %v6617_v27, %v999_v38  ;;  %v1484_v45 = vadd.f32 %v6621_v52, %v1112_v39  ;;  %v1001_v44 = vpop.f32.mrb[18].mxu0  ;;  %v1114_v43 = vpop.f32.mrb[18].mxu1  ;;  %2557 = vmatprep.mubr.bf16.mxu0 %v1686_v31  ;;  %2783 = vmatprep.mubr.bf16.mxu1 %v1686_v31  ;;  %v5668_v31 = vld [vmem:[#allocation2 + $0x32c] ss:$16 sps:$4 sm:$0xff]  }
 0x257   :  { %v1489_v47 = vadd.f32 %v6609_v50, %v1001_v44  ;;  %v1491_v19 = vadd.f32 %v6613_v26, %v1114_v43  ;;  %v1003_v37 = vpop.f32.mrb[19].mxu0  ;;  %v1116_v33 = vpop.f32.mrb[19].mxu1  ;;  %2558 = vmatmul.mubr.bf16.gmra.mrb[76].mxu0 %v1685_v29  ;;  %2784 = vmatmul.mubr.bf16.gmra.mrb[76].mxu1 %v1685_v29  ;;  %v1609_v54 = vmax.f32 %v1481_v4, 0.0  ;;  %v1611_v55 = vmax.f32 %v1483_v11, 0.0  ;;  %v5665_v29 = vld [vmem:[#allocation2 + $0x324] ss:$16 sps:$4 sm:$0xff]  }
 0x258   :  { %v1490_v42 = vadd.f32 %v6617_v27, %v1003_v37  ;;  %v1492_v53 = vadd.f32 %v6621_v52, %v1116_v33  ;;  %2621 = vmatpush1.bf16.msra.mxu0 %v5645_v36  ;;  %2847 = vmatpush1.bf16.msra.mxu1 %v5648_v18  ;;  %v1610_v61 = vmax.f32 %v1482_v28, 0.0  ;;  %v1612_v62 = vmax.f32 %v1484_v45, 0.0  ;;  %v5663_v28 = vld [vmem:[#allocation2 + $0x320] ss:$16 sps:$4 sm:$0xff]   ;;  %v5666_v45 = vld [vmem:[#allocation2 + $0x328] ss:$16 sps:$4 sm:$0xff]  }
 0x259   :  { %v1617_v51 = vmax.f32 %v1489_v47, 0.0  ;;  %v1619_v58 = vmax.f32 %v1491_v19, 0.0  ;;  %2622 = vmatprep.subr.bf16.mxu0 %v5653_v40  ;;  %2848 = vmatprep.subr.bf16.mxu1 %v5656_v41  ;;  %v5671_v44 = vld [vmem:[#allocation2 + $0x344] ss:$16 sps:$4 sm:$0xff]   ;;  %v5674_v33 = vld [vmem:[#allocation2 + $0x34c] ss:$16 sps:$4 sm:$0xff]  }
 0x25a   :  { %v1618_v63 = vmax.f32 %v1490_v42, 0.0  ;;  %v1620_v2 = vmax.f32 %v1492_v53, 0.0 }
 0x25b   :  { %v1689_v59 = vpack.c.bf16 %v1617_v51, %v1609_v54  ;;  %v6679_v5 = vpack.c.bf16 %v1619_v58, %v1611_v55 }
 0x25c   :  { %v1690_v3 = vpack.c.bf16 %v1618_v63, %v1610_v61  ;;  %v6681_v10 = vpack.c.bf16 %v1620_v2, %v1612_v62  ;;  %2623 = vmatpush1.bf16.msra.mxu0 %v5651_v1  ;;  %v1007_v6 = vpop.f32.mrb[20].mxu0  ;;  %v1120_v7 = vpop.f32.mrb[20].mxu1  ;;  %2849 = vmatpush1.bf16.msra.mxu1 %v5654_v25  ;;  %v5669_v61 = vld [vmem:[#allocation2 + $0x340] ss:$16 sps:$4 sm:$0xff]   ;;  %v5672_v62 = vld [vmem:[#allocation2 + $0x348] ss:$16 sps:$4 sm:$0xff]  }
 0x25d   :  { %v1497_v12 = vadd.f32 %v6609_v50, %v1007_v6  ;;  %v1499_v24 = vadd.f32 %v6613_v26, %v1120_v7  ;;  %v1009_v57 = vpop.f32.mrb[21].mxu0  ;;  %v1122_v14 = vpop.f32.mrb[21].mxu1  ;;  %2624 = vmatprep.subr.bf16.mxu0 %v5659_v34  ;;  %2850 = vmatprep.subr.bf16.mxu1 %v5662_v60  ;;  %v5677_v6 = vld [vmem:[#allocation2 + $0x364] ss:$16 sps:$4 sm:$0xff]   ;;  %v5680_v7 = vld [vmem:[#allocation2 + $0x36c] ss:$16 sps:$4 sm:$0xff]  }
 0x25e   :  { %v1498_v35 = vadd.f32 %v6617_v27, %v1009_v57  ;;  %v1500_v13 = vadd.f32 %v6621_v52, %v1122_v14  ;;  %v1011_v36 = vpop.f32.mrb[22].mxu0  ;;  %v1124_v18 = vpop.f32.mrb[22].mxu1  ;;  %2567 = vmatprep.mubr.bf16.mxu0 %v1690_v3  ;;  %2793 = vmatprep.mubr.bf16.mxu1 %v1690_v3 }
 0x25f   :  { %v1505_v4 = vadd.f32 %v6609_v50, %v1011_v36  ;;  %v1507_v11 = vadd.f32 %v6613_v26, %v1124_v18  ;;  %v1013_v38 = vpop.f32.mrb[23].mxu0  ;;  %v1126_v39 = vpop.f32.mrb[23].mxu1  ;;  %2568 = vmatmul.mubr.bf16.gmra.mrb[80].mxu0 %v1689_v59  ;;  %2794 = vmatmul.mubr.bf16.gmra.mrb[80].mxu1 %v1689_v59  ;;  %v1625_v43 = vmax.f32 %v1497_v12, 0.0  ;;  %v1627_v47 = vmax.f32 %v1499_v24, 0.0  ;;  %v5678_v18 = vld [vmem:[#allocation2 + $0x368] ss:$16 sps:$4 sm:$0xff]  }
 0x260   :  { %v1506_v40 = vadd.f32 %v6617_v27, %v1013_v38  ;;  %v1508_v41 = vadd.f32 %v6621_v52, %v1126_v39  ;;  %2625 = vmatpush1.bf16.msra.mxu0 %v5657_v16  ;;  %2851 = vmatpush1.bf16.msra.mxu1 %v5660_v17  ;;  %v1626_v42 = vmax.f32 %v1498_v35, 0.0  ;;  %v1628_v53 = vmax.f32 %v1500_v13, 0.0  ;;  %v5675_v35 = vld [vmem:[#allocation2 + $0x360] ss:$16 sps:$4 sm:$0xff]  }
 0x261   :  { %v1633_v19 = vmax.f32 %v1505_v4, 0.0  ;;  %v1635_v37 = vmax.f32 %v1507_v11, 0.0  ;;  %2626 = vmatprep.subr.bf16.mxu0 %v5665_v29  ;;  %2852 = vmatprep.subr.bf16.mxu1 %v5668_v31  ;;  %v5683_v4 = vld [vmem:[#allocation2 + $0x384] ss:$16 sps:$4 sm:$0xff]   ;;  %v1395_v11 = vsub.s32 4, %v6588_v0  ;;  %v1403_v38 = vsub.s32 6, %v6588_v0 }
 0x262   :  { %v1634_v1 = vmax.f32 %v1506_v40, 0.0  ;;  %v1636_v25 = vmax.f32 %v1508_v41, 0.0 }
 0x263   :  { %v1693_v34 = vpack.c.bf16 %v1633_v19, %v1625_v43  ;;  %v6691_v54 = vpack.c.bf16 %v1635_v37, %v1627_v47 }
 0x264   :  { %v1694_v55 = vpack.c.bf16 %v1634_v1, %v1626_v42  ;;  %v6693_v51 = vpack.c.bf16 %v1636_v25, %v1628_v53  ;;  %2627 = vmatpush1.bf16.msra.mxu0 %v5663_v28  ;;  %v1017_v58 = vpop.f32.mrb[24].mxu0  ;;  %v1130_v60 = vpop.f32.mrb[24].mxu1  ;;  %2853 = vmatpush1.bf16.msra.mxu1 %v5666_v45  ;;  %v5686_v45 = vld [vmem:[#allocation2 + $0x38c] ss:$16 sps:$4 sm:$0xff]   ;;  %v5681_v42 = vld [vmem:[#allocation2 + $0x380] ss:$16 sps:$4 sm:$0xff]  }
 0x265   :  { %v1513_v63 = vadd.f32 %v6609_v50, %v1017_v58  ;;  %v1515_v2 = vadd.f32 %v6613_v26, %v1130_v60  ;;  %v1019_v59 = vpop.f32.mrb[25].mxu0  ;;  %v1132_v3 = vpop.f32.mrb[25].mxu1  ;;  %2628 = vmatprep.subr.bf16.mxu0 %v5671_v44  ;;  %2854 = vmatprep.subr.bf16.mxu1 %v5674_v33  ;;  %v7419_v53 = vsub.s32 5, %v6588_v0  ;;  %v5684_v58 = vld [vmem:[#allocation2 + $0x388] ss:$16 sps:$4 sm:$0xff]   ;;  %v7418_v60 = vsub.s32 7, %v6588_v0 }
 0x266   :  { %v1514_v16 = vadd.f32 %v6617_v27, %v1019_v59  ;;  %v1516_v17 = vadd.f32 %v6621_v52, %v1132_v3  ;;  %v1021_v12 = vpop.f32.mrb[26].mxu0  ;;  %v1134_v24 = vpop.f32.mrb[26].mxu1  ;;  %2577 = vmatprep.mubr.bf16.mxu0 %v1694_v55  ;;  %2803 = vmatprep.mubr.bf16.mxu1 %v1694_v55  ;;  %v5689_v59 = vld [vmem:[#allocation2 + $0x3a4] ss:$16 sps:$4 sm:$0xff]   ;;  %v5692_v3 = vld [vmem:[#allocation2 + $0x3ac] ss:$16 sps:$4 sm:$0xff]  }
 0x267   :  { %v1521_v57 = vadd.f32 %v6609_v50, %v1021_v12  ;;  %v1523_v14 = vadd.f32 %v6613_v26, %v1134_v24  ;;  %v1023_v29 = vpop.f32.mrb[27].mxu0  ;;  %v1136_v31 = vpop.f32.mrb[27].mxu1  ;;  %2578 = vmatmul.mubr.bf16.gmra.mrb[84].mxu0 %v1693_v34  ;;  %2804 = vmatmul.mubr.bf16.gmra.mrb[84].mxu1 %v1693_v34  ;;  %v1641_v39 = vmax.f32 %v1513_v63, 0.0  ;;  %v1643_v40 = vmax.f32 %v1515_v2, 0.0 }
 0x268   :  { %v1522_v13 = vadd.f32 %v6617_v27, %v1023_v29  ;;  %v1524_v36 = vadd.f32 %v6621_v52, %v1136_v31  ;;  %2629 = vmatpush1.bf16.msra.mxu0 %v5669_v61  ;;  %2855 = vmatpush1.bf16.msra.mxu1 %v5672_v62  ;;  %v1642_v44 = vmax.f32 %v1514_v16, 0.0  ;;  %v1644_v43 = vmax.f32 %v1516_v17, 0.0 }
 0x269   :  { %v1649_v41 = vmax.f32 %v1521_v57, 0.0  ;;  %v1651_v28 = vmax.f32 %v1523_v14, 0.0  ;;  %2630 = vmatprep.subr.bf16.mxu0 %v5677_v6  ;;  %2856 = vmatprep.subr.bf16.mxu1 %v5680_v7  ;;  %v6716_v6 = vrot.slane %v6599_v23, %v1395_v11  ;;  %v6723_v24 = vrot.slane %v6599_v23, %v1403_v38 }
 0x26a   :  { %v1650_v47 = vmax.f32 %v1522_v13, 0.0  ;;  %v1652_v19 = vmax.f32 %v1524_v36, 0.0 }
 0x26b   :  { %v1697_v37 = vpack.c.bf16 %v1649_v41, %v1641_v39  ;;  %v6705_v33 = vpack.c.bf16 %v1651_v28, %v1643_v40 }
 0x26c   :  { %v1698_v1 = vpack.c.bf16 %v1650_v47, %v1642_v44  ;;  %v6708_v25 = vpack.c.bf16 %v1652_v19, %v1644_v43  ;;  %2631 = vmatpush1.bf16.msra.mxu0 %v5675_v35  ;;  %v1027_v34 = vpop.f32.mrb[28].mxu0  ;;  %v1140_v55 = vpop.f32.mrb[28].mxu1  ;;  %2857 = vmatpush1.bf16.msra.mxu1 %v5678_v18  ;;  %v6730_v35 = vrot.slane %v6599_v23, %v7419_v53  ;;  %v5687_v18 = vld [vmem:[#allocation2 + $0x3a0] ss:$16 sps:$4 sm:$0xff]  }
 0x26d   :  { %v1529_v61 = vadd.f32 %v6609_v50, %v1027_v34  ;;  %v1531_v62 = vadd.f32 %v6613_v26, %v1140_v55  ;;  %v1029_v63 = vpop.f32.mrb[29].mxu0  ;;  %v1142_v2 = vpop.f32.mrb[29].mxu1  ;;  %2632 = vmatprep.subr.bf16.mxu0 %v5683_v4  ;;  %2858 = vmatprep.subr.bf16.mxu1 %v5686_v45  ;;  %v5690_v4 = vld [vmem:[#allocation2 + $0x3a8] ss:$16 sps:$4 sm:$0xff]   ;;  %v5698_v45 = vld [vmem:[#allocation2 + $0x3cc] ss:$16 sps:$4 sm:$0xff]  }
 0x26e   :  { %v1530_v7 = vadd.f32 %v6617_v27, %v1029_v63  ;;  %v1532_v16 = vadd.f32 %v6621_v52, %v1142_v2  ;;  %v1031_v17 = vpop.f32.mrb[30].mxu0  ;;  %v1144_v12 = vpop.f32.mrb[30].mxu1  ;;  %2587 = vmatprep.mubr.bf16.mxu0 %v1698_v1  ;;  %2813 = vmatprep.mubr.bf16.mxu1 %v1698_v1  ;;  %v5693_v34 = vld [vmem:[#allocation2 + $0x3c0] ss:$16 sps:$4 sm:$0xff]   ;;  %v5696_v63 = vld [vmem:[#allocation2 + $0x3c8] ss:$16 sps:$4 sm:$0xff]  }
 0x26f   :  { %v1537_v57 = vadd.f32 %v6609_v50, %v1031_v17  ;;  %v1539_v14 = vadd.f32 %v6613_v26, %v1144_v12  ;;  %v1033_v29 = vpop.f32.mrb[31].mxu0  ;;  %v1146_v31 = vpop.f32.mrb[31].mxu1  ;;  %2588 = vmatmul.mubr.bf16.gmra.mrb[88].mxu0 %v1697_v37  ;;  %2814 = vmatmul.mubr.bf16.gmra.mrb[88].mxu1 %v1697_v37  ;;  %v6737_v50 = vrot.slane %v6599_v23, %v7418_v60  ;;  %v5695_v26 = vld [vmem:[#allocation2 + $0x3c4] ss:$16 sps:$4 sm:$0xff]   ;;  %v1657_v39 = vmax.f32 %v1529_v61, 0.0 }
 0x270   :  { %v1538_v13 = vadd.f32 %v6617_v27, %v1033_v29  ;;  %v1540_v36 = vadd.f32 %v6621_v52, %v1146_v31  ;;  %2633 = vmatpush1.bf16.msra.mxu0 %v5681_v42  ;;  %2859 = vmatpush1.bf16.msra.mxu1 %v5684_v58  ;;  %v1659_v40 = vmax.f32 %v1531_v62, 0.0  ;;  %v1658_v27 = vmax.f32 %v1530_v7, 0.0  ;;  %v5704_v17 = vld [vmem:[#allocation2 + $0x3ec] ss:$16 sps:$4 sm:$0xff]  }
 0x271   :  { %v1665_v41 = vmax.f32 %v1537_v57, 0.0  ;;  %v1667_v28 = vmax.f32 %v1539_v14, 0.0  ;;  %2634 = vmatprep.subr.bf16.mxu0 %v5689_v59  ;;  %2860 = vmatprep.subr.bf16.mxu1 %v5692_v3  ;;  %v1660_v44 = vmax.f32 %v1532_v16, 0.0  ;;  %v5701_v16 = vld [vmem:[#allocation2 + $0x3e4] ss:$16 sps:$4 sm:$0xff]  }
 0x272   :  { %v1666_v52 = vmax.f32 %v1538_v13, 0.0  ;;  %v1668_v43 = vmax.f32 %v1540_v36, 0.0  ;;  %v5699_v36 = vld [vmem:[#allocation2 + $0x3e0] ss:$16 sps:$4 sm:$0xff]  }
 0x273   :  { %v1701_v47 = vpack.c.bf16 %v1665_v41, %v1657_v39  ;;  %v6739_v19 = vpack.c.bf16 %v1667_v28, %v1659_v40  ;;  %v5707_v41 = vld [vmem:[#allocation4 + $0x4] ss:$16 sps:$4 sm:$0xff]  }
 0x274   :  { %v1702_v37 = vpack.c.bf16 %v1666_v52, %v1658_v27  ;;  %v6741_v42 = vpack.c.bf16 %v1668_v43, %v1660_v44  ;;  %2635 = vmatpush1.bf16.msra.mxu0 %v5687_v18  ;;  %v1183_v23 = vpop.f32.mrb[32].mxu0  ;;  %v1296_v1 = vpop.f32.mrb[32].mxu1  ;;  %2861 = vmatpush1.bf16.msra.mxu1 %v5690_v4  ;;  %v5702_v18 = vld [vmem:[#allocation2 + $0x3e8] ss:$16 sps:$4 sm:$0xff]   ;;  %v5710_v52 = vld [vmem:[#allocation4 + $0xc] ss:$16 sps:$4 sm:$0xff]  }
 0x275   :  { %v1421_v55 = vadd.f32 %v6716_v6, %v1183_v23  ;;  %v1423_v58 = vadd.f32 %v6723_v24, %v1296_v1  ;;  %v1185_v61 = vpop.f32.mrb[33].mxu0  ;;  %v1298_v62 = vpop.f32.mrb[33].mxu1  ;;  %2636 = vmatprep.subr.bf16.mxu0 %v5695_v26  ;;  %2862 = vmatprep.subr.bf16.mxu1 %v5698_v45 }
 0x276   :  { %v1422_v2 = vadd.f32 %v6730_v35, %v1185_v61  ;;  %v1424_v59 = vadd.f32 %v6737_v50, %v1298_v62  ;;  %v1187_v3 = vpop.f32.mrb[34].mxu0  ;;  %v1300_v7 = vpop.f32.mrb[34].mxu1  ;;  %2597 = vmatprep.mubr.bf16.mxu0 %v1702_v37  ;;  %2823 = vmatprep.mubr.bf16.mxu1 %v1702_v37 }
 0x277   :  { %v1429_v12 = vadd.f32 %v6716_v6, %v1187_v3  ;;  %v1431_v57 = vadd.f32 %v6723_v24, %v1300_v7  ;;  %v1189_v14 = vpop.f32.mrb[35].mxu0  ;;  %v1302_v29 = vpop.f32.mrb[35].mxu1  ;;  %2598 = vmatmul.mubr.bf16.gmra.mrb[92].mxu0 %v1701_v47  ;;  %2824 = vmatmul.mubr.bf16.gmra.mrb[92].mxu1 %v1701_v47  ;;  %v1549_v4 = vmax.f32 %v1421_v55, 0.0  ;;  %v1551_v26 = vmax.f32 %v1423_v58, 0.0  ;;  %v5708_v7 = vld [vmem:[#allocation4 + $0x8] ss:$16 sps:$4 sm:$0xff]  }
 0x278   :  { %v1430_v31 = vadd.f32 %v6730_v35, %v1189_v14  ;;  %v1432_v13 = vadd.f32 %v6737_v50, %v1302_v29  ;;  %2637 = vmatpush1.bf16.msra.mxu0 %v5693_v34  ;;  %2640 = vmatprep.mubr.bf16.mxu0 %v6633_v9  ;;  %v1550_v28 = vmax.f32 %v1422_v2, 0.0  ;;  %v1552_v45 = vmax.f32 %v1424_v59, 0.0  ;;  %v5716_v29 = vld [vmem:[#allocation4 + $0x2c] ss:$16 sps:$4 sm:$0xff]  }
 0x279   :  { %v1557_v39 = vmax.f32 %v1429_v12, 0.0  ;;  %v1559_v40 = vmax.f32 %v1431_v57, 0.0  ;;  %2863 = vmatpush1.bf16.msra.mxu1 %v5696_v63  ;;  %2866 = vmatprep.mubr.bf16.mxu1 %v6633_v9  ;;  %v5705_v9 = vld [vmem:[#allocation4] ss:$16 sps:$4 sm:$0xff]  }
 0x27a   :  { %v1558_v27 = vmax.f32 %v1430_v31, 0.0  ;;  %v1560_v44 = vmax.f32 %v1432_v13, 0.0  ;;  %2638 = vmatprep.subr.bf16.mxu0 %v5701_v16  ;;  %2864 = vmatprep.subr.bf16.mxu1 %v5704_v17  ;;  %v5713_v16 = vld [vmem:[#allocation4 + $0x24] ss:$16 sps:$4 sm:$0xff]  }
 0x27b   :  { %v6753_v43 = vpack.c.bf16 %v1557_v39, %v1549_v4  ;;  %v6755_v47 = vpack.c.bf16 %v1559_v40, %v1551_v26  ;;  %v5719_v40 = vld [vmem:[#allocation4 + $0x44] ss:$16 sps:$4 sm:$0xff]  }
 0x27c   :  { %v6757_v37 = vpack.c.bf16 %v1558_v27, %v1550_v28  ;;  %v6759_v23 = vpack.c.bf16 %v1560_v44, %v1552_v45  ;;  %2639 = vmatpush1.bf16.msra.mxu0 %v5699_v36  ;;  %v1193_v1 = vpop.f32.mrb[36].mxu0  ;;  %v1306_v34 = vpop.f32.mrb[36].mxu1  ;;  %v5711_v36 = vld [vmem:[#allocation4 + $0x20] ss:$16 sps:$4 sm:$0xff]   ;;  %v5714_v44 = vld [vmem:[#allocation4 + $0x28] ss:$16 sps:$4 sm:$0xff]  }
 0x27d   :  { %v1437_v55 = vadd.f32 %v6716_v6, %v1193_v1  ;;  %v1439_v58 = vadd.f32 %v6723_v24, %v1306_v34  ;;  %2865 = vmatpush1.bf16.msra.mxu1 %v5702_v18  ;;  %v1195_v61 = vpop.f32.mrb[37].mxu0  ;;  %v1308_v62 = vpop.f32.mrb[37].mxu1  ;;  %3833 = vmatprep.subr.bf16.mxu0 %v5707_v41  ;;  %v5722_v1 = vld [vmem:[#allocation4 + $0x4c] ss:$16 sps:$4 sm:$0xff]  }
 0x27e   :  { %v1438_v63 = vadd.f32 %v6730_v35, %v1195_v61  ;;  %v1440_v2 = vadd.f32 %v6737_v50, %v1308_v62  ;;  %v1197_v59 = vpop.f32.mrb[38].mxu0  ;;  %v1310_v3 = vpop.f32.mrb[38].mxu1  ;;  %4059 = vmatprep.subr.bf16.mxu1 %v5710_v52 }
 0x27f   :  { %v1445_v17 = vadd.f32 %v6716_v6, %v1197_v59  ;;  %v1447_v12 = vadd.f32 %v6723_v24, %v1310_v3  ;;  %v1199_v57 = vpop.f32.mrb[39].mxu0  ;;  %v1312_v14 = vpop.f32.mrb[39].mxu1  ;;  %2641 = vmatmul.mubr.bf16.vlgmr.msra.gmra.mrb[64].mxu0 %v6631_v21  ;;  %v1565_v18 = vmax.f32 %v1437_v55, 0.0  ;;  %v1567_v4 = vmax.f32 %v1439_v58, 0.0  ;;  %v5717_v58 = vld [vmem:[#allocation4 + $0x40] ss:$16 sps:$4 sm:$0xff]  }
 0x280   :  { %v1446_v31 = vadd.f32 %v6730_v35, %v1199_v57  ;;  %v1448_v13 = vadd.f32 %v6737_v50, %v1312_v14  ;;  %2867 = vmatmul.mubr.bf16.vlgmr.msra.gmra.mrb[64].mxu1 %v6631_v21  ;;  %3834 = vmatpush1.bf16.msra.mxu0 %v5705_v9  ;;  %v1566_v41 = vmax.f32 %v1438_v63, 0.0  ;;  %v1568_v28 = vmax.f32 %v1440_v2, 0.0 }
 0x281   :  { %v1573_v26 = vmax.f32 %v1445_v17, 0.0  ;;  %v1575_v39 = vmax.f32 %v1447_v12, 0.0  ;;  %2650 = vmatprep.mubr.bf16.mxu0 %v6645_v8  ;;  %2876 = vmatprep.mubr.bf16.mxu1 %v6645_v8  ;;  %v5720_v17 = vld [vmem:[#allocation4 + $0x48] ss:$16 sps:$4 sm:$0xff]   ;;  %v5725_v12 = vld [vmem:[#allocation4 + $0x64] ss:$16 sps:$4 sm:$0xff]  }
 0x282   :  { %v1574_v45 = vmax.f32 %v1446_v31, 0.0  ;;  %v1576_v27 = vmax.f32 %v1448_v13, 0.0  ;;  %4060 = vmatpush1.bf16.msra.mxu1 %v5708_v7  ;;  %3835 = vmatprep.subr.bf16.mxu0 %v5713_v16  ;;  %v5728_v13 = vld [vmem:[#allocation4 + $0x6c] ss:$16 sps:$4 sm:$0xff]  }
 0x283   :  { %v6773_v52 = vpack.c.bf16 %v1573_v26, %v1565_v18  ;;  %v6775_v21 = vpack.c.bf16 %v1575_v39, %v1567_v4  ;;  %4061 = vmatprep.subr.bf16.mxu1 %v5716_v29  ;;  %v5723_v4 = vld [vmem:[#allocation4 + $0x60] ss:$16 sps:$4 sm:$0xff]  }
 0x284   :  { %v6777_v34 = vpack.c.bf16 %v1574_v45, %v1566_v41  ;;  %v6779_v9 = vpack.c.bf16 %v1576_v27, %v1568_v28  ;;  %3836 = vmatpush1.bf16.msra.mxu0 %v5711_v36  ;;  %v1203_v8 = vpop.f32.mrb[40].mxu0  ;;  %v1316_v55 = vpop.f32.mrb[40].mxu1  ;;  %v5731_v28 = vld [vmem:[#allocation4 + $0x84] ss:$16 sps:$4 sm:$0xff]  }
 0x285   :  { %v1453_v61 = vadd.f32 %v6716_v6, %v1203_v8  ;;  %v1455_v62 = vadd.f32 %v6723_v24, %v1316_v55  ;;  %v1205_v63 = vpop.f32.mrb[41].mxu0  ;;  %v1318_v2 = vpop.f32.mrb[41].mxu1  ;;  %3837 = vmatprep.subr.bf16.mxu0 %v5719_v40  ;;  %v5726_v8 = vld [vmem:[#allocation4 + $0x68] ss:$16 sps:$4 sm:$0xff]  }
 0x286   :  { %4062 = vmatpush1.bf16.msra.mxu1 %v5714_v44  ;;  %v1454_v59 = vadd.f32 %v6730_v35, %v1205_v63  ;;  %v1456_v3 = vadd.f32 %v6737_v50, %v1318_v2  ;;  %v1207_v7 = vpop.f32.mrb[42].mxu0  ;;  %v1320_v16 = vpop.f32.mrb[42].mxu1  ;;  %v5729_v2 = vld [vmem:[#allocation4 + $0x80] ss:$16 sps:$4 sm:$0xff]  }
 0x287   :  { %v1461_v57 = vadd.f32 %v6716_v6, %v1207_v7  ;;  %v1463_v14 = vadd.f32 %v6723_v24, %v1320_v16  ;;  %v1209_v29 = vpop.f32.mrb[43].mxu0  ;;  %v1322_v31 = vpop.f32.mrb[43].mxu1  ;;  %2651 = vmatmul.mubr.bf16.gmra.mrb[68].mxu0 %v6643_v56  ;;  %4063 = vmatprep.subr.bf16.mxu1 %v5722_v1  ;;  %v1581_v26 = vmax.f32 %v1453_v61, 0.0  ;;  %v1583_v39 = vmax.f32 %v1455_v62, 0.0 }
 0x288   :  { %v1462_v36 = vadd.f32 %v6730_v35, %v1209_v29  ;;  %v1464_v18 = vadd.f32 %v6737_v50, %v1322_v31  ;;  %2877 = vmatmul.mubr.bf16.gmra.mrb[68].mxu1 %v6643_v56  ;;  %3838 = vmatpush1.bf16.msra.mxu0 %v5717_v58  ;;  %v1582_v45 = vmax.f32 %v1454_v59, 0.0  ;;  %v1584_v27 = vmax.f32 %v1456_v3, 0.0  ;;  %v5734_v58 = vld [vmem:[#allocation4 + $0x8c] ss:$16 sps:$4 sm:$0xff]   ;;  %v5732_v29 = vld [vmem:[#allocation4 + $0x88] ss:$16 sps:$4 sm:$0xff]  }
 0x289   :  { %v1589_v40 = vmax.f32 %v1461_v57, 0.0  ;;  %v1591_v41 = vmax.f32 %v1463_v14, 0.0  ;;  %2660 = vmatprep.mubr.bf16.mxu0 %v6657_v22  ;;  %2886 = vmatprep.mubr.bf16.mxu1 %v6657_v22  ;;  %v5737_v31 = vld [vmem:[#allocation4 + $0xa4] ss:$16 sps:$4 sm:$0xff]  }
 0x28a   :  { %v1590_v44 = vmax.f32 %v1462_v36, 0.0  ;;  %v1592_v1 = vmax.f32 %v1464_v18, 0.0  ;;  %4064 = vmatpush1.bf16.msra.mxu1 %v5720_v17  ;;  %3839 = vmatprep.subr.bf16.mxu0 %v5725_v12 }
 0x28b   :  { %v6793_v55 = vpack.c.bf16 %v1589_v40, %v1581_v26  ;;  %v6795_v56 = vpack.c.bf16 %v1591_v41, %v1583_v39  ;;  %4065 = vmatprep.subr.bf16.mxu1 %v5728_v13  ;;  %v5740_v26 = vld [vmem:[#allocation4 + $0xac] ss:$16 sps:$4 sm:$0xff]   ;;  %v5735_v41 = vld [vmem:[#allocation4 + $0xa0] ss:$16 sps:$4 sm:$0xff]  }
 0x28c   :  { %v6797_v61 = vpack.c.bf16 %v1590_v44, %v1582_v45  ;;  %v6799_v62 = vpack.c.bf16 %v1592_v1, %v1584_v27  ;;  %3840 = vmatpush1.bf16.msra.mxu0 %v5723_v4  ;;  %v1213_v22 = vpop.f32.mrb[44].mxu0  ;;  %v1326_v63 = vpop.f32.mrb[44].mxu1  ;;  %v5743_v1 = vld [vmem:[#allocation4 + $0xc4] ss:$16 sps:$4 sm:$0xff]  }
 0x28d   :  { %v1469_v59 = vadd.f32 %v6716_v6, %v1213_v22  ;;  %v1471_v3 = vadd.f32 %v6723_v24, %v1326_v63  ;;  %v1215_v7 = vpop.f32.mrb[45].mxu0  ;;  %v1328_v16 = vpop.f32.mrb[45].mxu1  ;;  %3841 = vmatprep.subr.bf16.mxu0 %v5731_v28 }
 0x28e   :  { %4066 = vmatpush1.bf16.msra.mxu1 %v5726_v8  ;;  %v1470_v17 = vadd.f32 %v6730_v35, %v1215_v7  ;;  %v1472_v12 = vadd.f32 %v6737_v50, %v1328_v16  ;;  %v1217_v57 = vpop.f32.mrb[46].mxu0  ;;  %v1330_v14 = vpop.f32.mrb[46].mxu1  ;;  %v5738_v7 = vld [vmem:[#allocation4 + $0xa8] ss:$16 sps:$4 sm:$0xff]  }
 0x28f   :  { %v1477_v13 = vadd.f32 %v6716_v6, %v1217_v57  ;;  %v1479_v36 = vadd.f32 %v6723_v24, %v1330_v14  ;;  %v1219_v18 = vpop.f32.mrb[47].mxu0  ;;  %v1332_v4 = vpop.f32.mrb[47].mxu1  ;;  %2661 = vmatmul.mubr.bf16.gmra.mrb[72].mxu0 %v6655_v15  ;;  %4067 = vmatprep.subr.bf16.mxu1 %v5734_v58  ;;  %v1597_v28 = vmax.f32 %v1469_v59, 0.0  ;;  %v1599_v45 = vmax.f32 %v1471_v3, 0.0 }
 0x290   :  { %v1478_v39 = vadd.f32 %v6730_v35, %v1219_v18  ;;  %v1480_v40 = vadd.f32 %v6737_v50, %v1332_v4  ;;  %2887 = vmatmul.mubr.bf16.gmra.mrb[72].mxu1 %v6655_v15  ;;  %3842 = vmatpush1.bf16.msra.mxu0 %v5729_v2  ;;  %v1598_v8 = vmax.f32 %v1470_v17, 0.0  ;;  %v1600_v58 = vmax.f32 %v1472_v12, 0.0  ;;  %v5746_v2 = vld [vmem:[#allocation4 + $0xcc] ss:$16 sps:$4 sm:$0xff]   ;;  %v5741_v17 = vld [vmem:[#allocation4 + $0xc0] ss:$16 sps:$4 sm:$0xff]  }
 0x291   :  { %v1605_v27 = vmax.f32 %v1477_v13, 0.0  ;;  %v1607_v44 = vmax.f32 %v1479_v36, 0.0  ;;  %2670 = vmatprep.mubr.bf16.mxu0 %v6669_v32  ;;  %2896 = vmatprep.mubr.bf16.mxu1 %v6669_v32 }
 0x292   :  { %v1606_v22 = vmax.f32 %v1478_v39, 0.0  ;;  %v1608_v63 = vmax.f32 %v1480_v40, 0.0  ;;  %4068 = vmatpush1.bf16.msra.mxu1 %v5732_v29  ;;  %3843 = vmatprep.subr.bf16.mxu0 %v5737_v31  ;;  %v5749_v39 = vld [vmem:[#allocation4 + $0xe4] ss:$16 sps:$4 sm:$0xff]  }
 0x293   :  { %v6813_v16 = vpack.c.bf16 %v1605_v27, %v1597_v28  ;;  %v6815_v15 = vpack.c.bf16 %v1607_v44, %v1599_v45  ;;  %4069 = vmatprep.subr.bf16.mxu1 %v5740_v26  ;;  %v5744_v26 = vld [vmem:[#allocation4 + $0xc8] ss:$16 sps:$4 sm:$0xff]   ;;  %v5752_v27 = vld [vmem:[#allocation4 + $0xec] ss:$16 sps:$4 sm:$0xff]  }
 0x294   :  { %v6817_v59 = vpack.c.bf16 %v1606_v22, %v1598_v8  ;;  %v6819_v3 = vpack.c.bf16 %v1608_v63, %v1600_v58  ;;  %3844 = vmatpush1.bf16.msra.mxu0 %v5735_v41  ;;  %v1223_v32 = vpop.f32.mrb[48].mxu0  ;;  %v1336_v57 = vpop.f32.mrb[48].mxu1  ;;  %v5747_v8 = vld [vmem:[#allocation4 + $0xe0] ss:$16 sps:$4 sm:$0xff]  }
 0x295   :  { %v1485_v12 = vadd.f32 %v6716_v6, %v1223_v32  ;;  %v1487_v14 = vadd.f32 %v6723_v24, %v1336_v57  ;;  %v1225_v29 = vpop.f32.mrb[49].mxu0  ;;  %v1338_v31 = vpop.f32.mrb[49].mxu1  ;;  %3845 = vmatprep.subr.bf16.mxu0 %v5743_v1  ;;  %v5755_v32 = vld [vmem:[#allocation4 + $0x104] ss:$16 sps:$4 sm:$0xff]  }
 0x296   :  { %4070 = vmatpush1.bf16.msra.mxu1 %v5738_v7  ;;  %v1486_v13 = vadd.f32 %v6730_v35, %v1225_v29  ;;  %v1488_v36 = vadd.f32 %v6737_v50, %v1338_v31  ;;  %v1227_v18 = vpop.f32.mrb[50].mxu0  ;;  %v1340_v4 = vpop.f32.mrb[50].mxu1 }
 0x297   :  { %v1493_v40 = vadd.f32 %v6716_v6, %v1227_v18  ;;  %v1495_v41 = vadd.f32 %v6723_v24, %v1340_v4  ;;  %v1229_v28 = vpop.f32.mrb[51].mxu0  ;;  %v1342_v45 = vpop.f32.mrb[51].mxu1  ;;  %2671 = vmatmul.mubr.bf16.gmra.mrb[76].mxu0 %v6667_v30  ;;  %4071 = vmatprep.subr.bf16.mxu1 %v5746_v2  ;;  %v1613_v58 = vmax.f32 %v1485_v12, 0.0  ;;  %v1615_v22 = vmax.f32 %v1487_v14, 0.0  ;;  %v5750_v18 = vld [vmem:[#allocation4 + $0xe8] ss:$16 sps:$4 sm:$0xff]  }
 0x298   :  { %v1494_v44 = vadd.f32 %v6730_v35, %v1229_v28  ;;  %v1496_v1 = vadd.f32 %v6737_v50, %v1342_v45  ;;  %2897 = vmatmul.mubr.bf16.gmra.mrb[76].mxu1 %v6667_v30  ;;  %3846 = vmatpush1.bf16.msra.mxu0 %v5741_v17  ;;  %v1614_v57 = vmax.f32 %v1486_v13, 0.0  ;;  %v1616_v2 = vmax.f32 %v1488_v36, 0.0  ;;  %v5758_v17 = vld [vmem:[#allocation4 + $0x10c] ss:$16 sps:$4 sm:$0xff]   ;;  %v5753_v13 = vld [vmem:[#allocation4 + $0x100] ss:$16 sps:$4 sm:$0xff]  }
 0x299   :  { %v1621_v63 = vmax.f32 %v1493_v40, 0.0  ;;  %v1623_v7 = vmax.f32 %v1495_v41, 0.0  ;;  %2680 = vmatprep.mubr.bf16.mxu0 %v6681_v10  ;;  %2906 = vmatprep.mubr.bf16.mxu1 %v6681_v10 }
 0x29a   :  { %v1622_v29 = vmax.f32 %v1494_v44, 0.0  ;;  %v1624_v31 = vmax.f32 %v1496_v1, 0.0  ;;  %4072 = vmatpush1.bf16.msra.mxu1 %v5744_v26  ;;  %3847 = vmatprep.subr.bf16.mxu0 %v5749_v39  ;;  %v5756_v1 = vld [vmem:[#allocation4 + $0x108] ss:$16 sps:$4 sm:$0xff]  }
 0x29b   :  { %v6833_v4 = vpack.c.bf16 %v1621_v63, %v1613_v58  ;;  %v6835_v30 = vpack.c.bf16 %v1623_v7, %v1615_v22  ;;  %4073 = vmatprep.subr.bf16.mxu1 %v5752_v27  ;;  %v5761_v58 = vld [vmem:[#allocation4 + $0x124] ss:$16 sps:$4 sm:$0xff]  }
 0x29c   :  { %v6837_v12 = vpack.c.bf16 %v1622_v29, %v1614_v57  ;;  %v6839_v14 = vpack.c.bf16 %v1624_v31, %v1616_v2  ;;  %3848 = vmatpush1.bf16.msra.mxu0 %v5747_v8  ;;  %v1233_v10 = vpop.f32.mrb[52].mxu0  ;;  %v1346_v40 = vpop.f32.mrb[52].mxu1  ;;  %v5764_v57 = vld [vmem:[#allocation4 + $0x12c] ss:$16 sps:$4 sm:$0xff]   ;;  %v5759_v29 = vld [vmem:[#allocation4 + $0x120] ss:$16 sps:$4 sm:$0xff]  }
 0x29d   :  { %v1501_v36 = vadd.f32 %v6716_v6, %v1233_v10  ;;  %v1503_v26 = vadd.f32 %v6723_v24, %v1346_v40  ;;  %v1235_v39 = vpop.f32.mrb[53].mxu0  ;;  %v1348_v41 = vpop.f32.mrb[53].mxu1  ;;  %3849 = vmatprep.subr.bf16.mxu0 %v5755_v32 }
 0x29e   :  { %4074 = vmatpush1.bf16.msra.mxu1 %v5750_v18  ;;  %v1502_v28 = vadd.f32 %v6730_v35, %v1235_v39  ;;  %v1504_v45 = vadd.f32 %v6737_v50, %v1348_v41  ;;  %v1237_v27 = vpop.f32.mrb[54].mxu0  ;;  %v1350_v44 = vpop.f32.mrb[54].mxu1  ;;  %v5767_v39 = vld [vmem:[#allocation4 + $0x144] ss:$16 sps:$4 sm:$0xff]  }
 0x29f   :  { %v1509_v8 = vadd.f32 %v6716_v6, %v1237_v27  ;;  %v1511_v22 = vadd.f32 %v6723_v24, %v1350_v44  ;;  %v1239_v63 = vpop.f32.mrb[55].mxu0  ;;  %v1352_v7 = vpop.f32.mrb[55].mxu1  ;;  %2681 = vmatmul.mubr.bf16.gmra.mrb[80].mxu0 %v6679_v5  ;;  %4075 = vmatprep.subr.bf16.mxu1 %v5758_v17  ;;  %v1629_v31 = vmax.f32 %v1501_v36, 0.0  ;;  %v1631_v18 = vmax.f32 %v1503_v26, 0.0 }
 0x2a0   :  { %v1510_v32 = vadd.f32 %v6730_v35, %v1239_v63  ;;  %v1512_v2 = vadd.f32 %v6737_v50, %v1352_v7  ;;  %2907 = vmatmul.mubr.bf16.gmra.mrb[80].mxu1 %v6679_v5  ;;  %3850 = vmatpush1.bf16.msra.mxu0 %v5753_v13  ;;  %v1630_v41 = vmax.f32 %v1502_v28, 0.0  ;;  %v1632_v17 = vmax.f32 %v1504_v45, 0.0  ;;  %v5762_v63 = vld [vmem:[#allocation4 + $0x128] ss:$16 sps:$4 sm:$0xff]   ;;  %v5770_v13 = vld [vmem:[#allocation4 + $0x14c] ss:$16 sps:$4 sm:$0xff]  }
 0x2a1   :  { %v1637_v10 = vmax.f32 %v1509_v8, 0.0  ;;  %v1639_v40 = vmax.f32 %v1511_v22, 0.0  ;;  %2690 = vmatprep.mubr.bf16.mxu0 %v6693_v51  ;;  %2916 = vmatprep.mubr.bf16.mxu1 %v6693_v51  ;;  %v5765_v28 = vld [vmem:[#allocation4 + $0x140] ss:$16 sps:$4 sm:$0xff]  }
 0x2a2   :  { %v1638_v27 = vmax.f32 %v1510_v32, 0.0  ;;  %v1640_v44 = vmax.f32 %v1512_v2, 0.0  ;;  %4076 = vmatpush1.bf16.msra.mxu1 %v5756_v1  ;;  %3851 = vmatprep.subr.bf16.mxu0 %v5761_v58 }
 0x2a3   :  { %v6853_v7 = vpack.c.bf16 %v1637_v10, %v1629_v31  ;;  %v6855_v5 = vpack.c.bf16 %v1639_v40, %v1631_v18  ;;  %4077 = vmatprep.subr.bf16.mxu1 %v5764_v57  ;;  %v5768_v18 = vld [vmem:[#allocation4 + $0x148] ss:$16 sps:$4 sm:$0xff]   ;;  %v5773_v10 = vld [vmem:[#allocation4 + $0x164] ss:$16 sps:$4 sm:$0xff]  }
 0x2a4   :  { %v6857_v36 = vpack.c.bf16 %v1638_v27, %v1630_v41  ;;  %v6859_v26 = vpack.c.bf16 %v1640_v44, %v1632_v17  ;;  %3852 = vmatpush1.bf16.msra.mxu0 %v5759_v29  ;;  %v1243_v51 = vpop.f32.mrb[56].mxu0  ;;  %v1356_v8 = vpop.f32.mrb[56].mxu1  ;;  %v5776_v27 = vld [vmem:[#allocation4 + $0x16c] ss:$16 sps:$4 sm:$0xff]  }
 0x2a5   :  { %v1517_v45 = vadd.f32 %v6716_v6, %v1243_v51  ;;  %v1519_v1 = vadd.f32 %v6723_v24, %v1356_v8  ;;  %v1245_v58 = vpop.f32.mrb[57].mxu0  ;;  %v1358_v22 = vpop.f32.mrb[57].mxu1  ;;  %3853 = vmatprep.subr.bf16.mxu0 %v5767_v39 }
 0x2a6   :  { %4078 = vmatpush1.bf16.msra.mxu1 %v5762_v63  ;;  %v1518_v32 = vadd.f32 %v6730_v35, %v1245_v58  ;;  %v1520_v57 = vadd.f32 %v6737_v50, %v1358_v22  ;;  %v1247_v2 = vpop.f32.mrb[58].mxu0  ;;  %v1360_v31 = vpop.f32.mrb[58].mxu1  ;;  %v5771_v63 = vld [vmem:[#allocation4 + $0x160] ss:$16 sps:$4 sm:$0xff]  }
 0x2a7   :  { %v1525_v29 = vadd.f32 %v6716_v6, %v1247_v2  ;;  %v1527_v40 = vadd.f32 %v6723_v24, %v1360_v31  ;;  %v1249_v41 = vpop.f32.mrb[59].mxu0  ;;  %v1362_v17 = vpop.f32.mrb[59].mxu1  ;;  %2691 = vmatmul.mubr.bf16.gmra.mrb[84].mxu0 %v6691_v54  ;;  %4079 = vmatprep.subr.bf16.mxu1 %v5770_v13  ;;  %v1645_v51 = vmax.f32 %v1517_v45, 0.0  ;;  %v1647_v8 = vmax.f32 %v1519_v1, 0.0  ;;  %v5779_v2 = vld [vmem:[#allocation4 + $0x184] ss:$16 sps:$4 sm:$0xff]  }
 0x2a8   :  { %v1526_v39 = vadd.f32 %v6730_v35, %v1249_v41  ;;  %v1528_v44 = vadd.f32 %v6737_v50, %v1362_v17  ;;  %2917 = vmatmul.mubr.bf16.gmra.mrb[84].mxu1 %v6691_v54  ;;  %3854 = vmatpush1.bf16.msra.mxu0 %v5765_v28  ;;  %v1646_v31 = vmax.f32 %v1518_v32, 0.0  ;;  %v1648_v13 = vmax.f32 %v1520_v57, 0.0  ;;  %v5774_v41 = vld [vmem:[#allocation4 + $0x168] ss:$16 sps:$4 sm:$0xff]   ;;  %v5782_v28 = vld [vmem:[#allocation4 + $0x18c] ss:$16 sps:$4 sm:$0xff]  }
 0x2a9   :  { %v1653_v58 = vmax.f32 %v1525_v29, 0.0  ;;  %v1655_v22 = vmax.f32 %v1527_v40, 0.0  ;;  %2700 = vmatprep.mubr.bf16.mxu0 %v6708_v25  ;;  %2926 = vmatprep.mubr.bf16.mxu1 %v6708_v25  ;;  %v5777_v32 = vld [vmem:[#allocation4 + $0x180] ss:$16 sps:$4 sm:$0xff]  }
 0x2aa   :  { %v1654_v60 = vmax.f32 %v1526_v39, 0.0  ;;  %v1656_v53 = vmax.f32 %v1528_v44, 0.0  ;;  %4080 = vmatpush1.bf16.msra.mxu1 %v5768_v18  ;;  %3855 = vmatprep.subr.bf16.mxu0 %v5773_v10 }
 0x2ab   :  { %v6873_v17 = vpack.c.bf16 %v1653_v58, %v1645_v51  ;;  %v6875_v54 = vpack.c.bf16 %v1655_v22, %v1647_v8  ;;  %4081 = vmatprep.subr.bf16.mxu1 %v5776_v27  ;;  %v5785_v51 = vld [vmem:[#allocation4 + $0x1a4] ss:$16 sps:$4 sm:$0xff]  }
 0x2ac   :  { %v6877_v45 = vpack.c.bf16 %v1654_v60, %v1646_v31  ;;  %v6879_v1 = vpack.c.bf16 %v1656_v53, %v1648_v13  ;;  %3856 = vmatpush1.bf16.msra.mxu0 %v5771_v63  ;;  %v1253_v25 = vpop.f32.mrb[60].mxu0  ;;  %v1366_v29 = vpop.f32.mrb[60].mxu1  ;;  %v5780_v53 = vld [vmem:[#allocation4 + $0x188] ss:$16 sps:$4 sm:$0xff]   ;;  %v5788_v31 = vld [vmem:[#allocation4 + $0x1ac] ss:$16 sps:$4 sm:$0xff]  }
 0x2ad   :  { %v1533_v57 = vadd.f32 %v6716_v6, %v1253_v25  ;;  %v1535_v18 = vadd.f32 %v6723_v24, %v1366_v29  ;;  %v1255_v10 = vpop.f32.mrb[61].mxu0  ;;  %v1368_v40 = vpop.f32.mrb[61].mxu1  ;;  %3857 = vmatprep.subr.bf16.mxu0 %v5779_v2 }
 0x2ae   :  { %4082 = vmatpush1.bf16.msra.mxu1 %v5774_v41  ;;  %v1534_v39 = vadd.f32 %v6730_v35, %v1255_v10  ;;  %v1536_v27 = vadd.f32 %v6737_v50, %v1368_v40  ;;  %v1257_v60 = vpop.f32.mrb[62].mxu0  ;;  %v1370_v44 = vpop.f32.mrb[62].mxu1  ;;  %v5783_v41 = vld [vmem:[#allocation4 + $0x1a0] ss:$16 sps:$4 sm:$0xff]  }
 0x2af   :  { %v1541_v63 = vadd.f32 %v6716_v6, %v1257_v60  ;;  %v1543_v8 = vadd.f32 %v6723_v24, %v1370_v44  ;;  %v1259_v58 = vpop.f32.mrb[63].mxu0  ;;  %v1372_v22 = vpop.f32.mrb[63].mxu1  ;;  %2701 = vmatmul.mubr.bf16.gmra.mrb[88].mxu0 %v6705_v33  ;;  %4083 = vmatprep.subr.bf16.mxu1 %v5782_v28  ;;  %v1661_v25 = vmax.f32 %v1533_v57, 0.0  ;;  %v1663_v29 = vmax.f32 %v1535_v18, 0.0  ;;  %v5791_v24 = vld [vmem:[#allocation4 + $0x1c4] ss:$16 sps:$4 sm:$0xff]  }
 0x2b0   :  { %v1542_v2 = vadd.f32 %v6730_v35, %v1259_v58  ;;  %v1544_v13 = vadd.f32 %v6737_v50, %v1372_v22  ;;  %2927 = vmatmul.mubr.bf16.gmra.mrb[88].mxu1 %v6705_v33  ;;  %3858 = vmatpush1.bf16.msra.mxu0 %v5777_v32  ;;  %v1662_v40 = vmax.f32 %v1534_v39, 0.0  ;;  %v1664_v28 = vmax.f32 %v1536_v27, 0.0  ;;  %v5786_v35 = vld [vmem:[#allocation4 + $0x1a8] ss:$16 sps:$4 sm:$0xff]   ;;  %v5794_v32 = vld [vmem:[#allocation4 + $0x1cc] ss:$16 sps:$4 sm:$0xff]  }
 0x2b1   :  { %v1669_v10 = vmax.f32 %v1541_v63, 0.0  ;;  %v1671_v6 = vmax.f32 %v1543_v8, 0.0  ;;  %2710 = vmatprep.mubr.bf16.mxu0 %v6741_v42  ;;  %2936 = vmatprep.mubr.bf16.mxu1 %v6741_v42  ;;  %v5789_v42 = vld [vmem:[#allocation4 + $0x1c0] ss:$16 sps:$4 sm:$0xff]   ;;  %v5792_v39 = vld [vmem:[#allocation4 + $0x1c8] ss:$16 sps:$4 sm:$0xff]  }
 0x2b2   :  { %v1670_v60 = vmax.f32 %v1542_v2, 0.0  ;;  %v1672_v44 = vmax.f32 %v1544_v13, 0.0  ;;  %4084 = vmatpush1.bf16.msra.mxu1 %v5780_v53  ;;  %3859 = vmatprep.subr.bf16.mxu0 %v5785_v51  ;;  %v5797_v27 = vld [vmem:[#allocation4 + $0x1e4] ss:$16 sps:$4 sm:$0xff]   ;;  %v5800_v53 = vld [vmem:[#allocation4 + $0x1ec] ss:$16 sps:$4 sm:$0xff]  }
 0x2b3   :  { %v6893_v50 = vpack.c.bf16 %v1669_v10, %v1661_v25  ;;  %v6895_v33 = vpack.c.bf16 %v1671_v6, %v1663_v29  ;;  %4085 = vmatprep.subr.bf16.mxu1 %v5788_v31  ;;  %v5795_v51 = vld [vmem:[#allocation4 + $0x1e0] ss:$16 sps:$4 sm:$0xff]   ;;  %v5803_v63 = vld [vmem:[#allocation4 + $0x204] ss:$16 sps:$4 sm:$0xff]   ;;  %v5798_v8 = vld [vmem:[#allocation4 + $0x1e8] ss:$16 sps:$4 sm:$0xff]  }
 0x2b4   :  { %v6897_v57 = vpack.c.bf16 %v1670_v60, %v1662_v40  ;;  %v6899_v18 = vpack.c.bf16 %v1672_v44, %v1664_v28  ;;  %3860 = vmatpush1.bf16.msra.mxu0 %v5783_v41  ;;  %v5806_v58 = vld [vmem:[#allocation4 + $0x20c] ss:$16 sps:$4 sm:$0xff]   ;;  %v5801_v22 = vld [vmem:[#allocation4 + $0x200] ss:$16 sps:$4 sm:$0xff]   ;;  %v5809_v31 = vld [vmem:[#allocation4 + $0x224] ss:$16 sps:$4 sm:$0xff]  }
 0x2b5   :  { %3861 = vmatprep.subr.bf16.mxu0 %v5791_v24  ;;  %v5804_v2 = vld [vmem:[#allocation4 + $0x208] ss:$16 sps:$4 sm:$0xff]   ;;  %v5815_v13 = vld [vmem:[#allocation4 + $0x244] ss:$16 sps:$4 sm:$0xff]   ;;  %v5818_v25 = vld [vmem:[#allocation4 + $0x24c] ss:$16 sps:$4 sm:$0xff]  }
 0x2b6   :  { %4086 = vmatpush1.bf16.msra.mxu1 %v5786_v35  ;;  %v5810_v41 = vld [vmem:[#allocation4 + $0x228] ss:$16 sps:$4 sm:$0xff]   ;;  %v5813_v29 = vld [vmem:[#allocation4 + $0x240] ss:$16 sps:$4 sm:$0xff]   ;;  %v5821_v10 = vld [vmem:[#allocation4 + $0x264] ss:$16 sps:$4 sm:$0xff]  }
 0x2b7   :  { %2711 = vmatmul.mubr.bf16.gmra.mrb[92].mxu0 %v6739_v19  ;;  %4087 = vmatprep.subr.bf16.mxu1 %v5794_v32  ;;  %v5816_v6 = vld [vmem:[#allocation4 + $0x248] ss:$16 sps:$4 sm:$0xff]   ;;  %v5824_v24 = vld [vmem:[#allocation4 + $0x26c] ss:$16 sps:$4 sm:$0xff]   ;;  %v5825_v60 = vld [vmem:[#allocation4 + $0x280] ss:$16 sps:$4 sm:$0xff]  }
 0x2b8   :  { %2937 = vmatmul.mubr.bf16.gmra.mrb[92].mxu1 %v6739_v19  ;;  %3862 = vmatpush1.bf16.msra.mxu0 %v5789_v42  ;;  %v5812_v19 = vld [vmem:[#allocation4 + $0x22c] ss:$16 sps:$4 sm:$0xff]   ;;  %v5822_v40 = vld [vmem:[#allocation4 + $0x268] ss:$16 sps:$4 sm:$0xff]   ;;  %v5833_v44 = vld [vmem:[#allocation4 + $0x2a4] ss:$16 sps:$4 sm:$0xff]  }
 0x2b9   :  { %3865 = vmatprep.mubr.bf16.mxu0 %v6757_v37  ;;  %4091 = vmatprep.mubr.bf16.mxu1 %v6757_v37  ;;  %v5807_v37 = vld [vmem:[#allocation4 + $0x220] ss:$16 sps:$4 sm:$0xff]   ;;  %v5830_v28 = vld [vmem:[#allocation4 + $0x28c] ss:$16 sps:$4 sm:$0xff]   ;;  %v5828_v35 = vld [vmem:[#allocation4 + $0x288] ss:$16 sps:$4 sm:$0xff]  }
 0x2ba   :  { %4088 = vmatpush1.bf16.msra.mxu1 %v5792_v39  ;;  %3863 = vmatprep.subr.bf16.mxu0 %v5797_v27  ;;  %v5836_v32 = vld [vmem:[#allocation4 + $0x2ac] ss:$16 sps:$4 sm:$0xff]   ;;  %v5834_v42 = vld [vmem:[#allocation4 + $0x2a8] ss:$16 sps:$4 sm:$0xff]   ;;  %v5837_v27 = vld [vmem:[#allocation4 + $0x2c0] ss:$16 sps:$4 sm:$0xff]  }
 0x2bb   :  { %4089 = vmatprep.subr.bf16.mxu1 %v5800_v53  ;;  %v5842_v39 = vld [vmem:[#allocation4 + $0x2cc] ss:$16 sps:$4 sm:$0xff]   ;;  %v5845_v53 = vld [vmem:[#allocation4 + $0x2e4] ss:$16 sps:$4 sm:$0xff]  }
 0x2bc   :  { %3864 = vmatpush1.bf16.msra.mxu0 %v5795_v51  ;;  %v5840_v51 = vld [vmem:[#allocation4 + $0x2c8] ss:$16 sps:$4 sm:$0xff]  }
 0x2bd   :  { %3946 = vmatprep.subr.bf16.mxu0 %v5803_v63  ;;  %v5848_v63 = vld [vmem:[#allocation4 + $0x2ec] ss:$16 sps:$4 sm:$0xff]  }
 0x2be   :  { %4090 = vmatpush1.bf16.msra.mxu1 %v5798_v8  ;;  %v5846_v8 = vld [vmem:[#allocation4 + $0x2e8] ss:$16 sps:$4 sm:$0xff]  }
 0x2bf   :  { %3866 = vmatmul.mubr.bf16.vlgmr.msra.gmra.mrb[96].mxu0 %v6753_v43  ;;  %4172 = vmatprep.subr.bf16.mxu1 %v5806_v58  ;;  %v5854_v58 = vld [vmem:[#allocation4 + $0x30c] ss:$16 sps:$4 sm:$0xff]  }
 0x2c0   :  { %3947 = vmatpush1.bf16.msra.mxu0 %v5801_v22  ;;  %3875 = vmatprep.mubr.bf16.mxu0 %v6777_v34  ;;  %v5849_v22 = vld [vmem:[#allocation4 + $0x300] ss:$16 sps:$4 sm:$0xff]  }
 0x2c1   :  { %4092 = vmatmul.mubr.bf16.vlgmr.msra.gmra.mrb[96].mxu1 %v6753_v43  ;;  %3948 = vmatprep.subr.bf16.mxu0 %v5809_v31  ;;  %v5819_v43 = vld [vmem:[#allocation4 + $0x260] ss:$16 sps:$4 sm:$0xff]   ;;  %v5857_v31 = vld [vmem:[#allocation4 + $0x324] ss:$16 sps:$4 sm:$0xff]  }
 0x2c2   :  { %4101 = vmatprep.mubr.bf16.mxu1 %v6777_v34  ;;  %4173 = vmatpush1.bf16.msra.mxu1 %v5804_v2  ;;  %v5827_v34 = vld [vmem:[#allocation4 + $0x284] ss:$16 sps:$4 sm:$0xff]   ;;  %v5852_v2 = vld [vmem:[#allocation4 + $0x308] ss:$16 sps:$4 sm:$0xff]  }
 0x2c3   :  { %4174 = vmatprep.subr.bf16.mxu1 %v5812_v19  ;;  %v5860_v19 = vld [vmem:[#allocation4 + $0x32c] ss:$16 sps:$4 sm:$0xff]  }
 0x2c4   :  { %3949 = vmatpush1.bf16.msra.mxu0 %v5807_v37  ;;  %v5858_v37 = vld [vmem:[#allocation4 + $0x328] ss:$16 sps:$4 sm:$0xff]  }
 0x2c5   :  { %3950 = vmatprep.subr.bf16.mxu0 %v5815_v13  ;;  %v5866_v13 = vld [vmem:[#allocation4 + $0x34c] ss:$16 sps:$4 sm:$0xff]  }
 0x2c6   :  { %4175 = vmatpush1.bf16.msra.mxu1 %v5810_v41  ;;  %v5861_v41 = vld [vmem:[#allocation4 + $0x340] ss:$16 sps:$4 sm:$0xff]  }
 0x2c7   :  { %3876 = vmatmul.mubr.bf16.gmra.mrb[100].mxu0 %v6773_v52  ;;  %4176 = vmatprep.subr.bf16.mxu1 %v5818_v25  ;;  %v5869_v25 = vld [vmem:[#allocation4 + $0x364] ss:$16 sps:$4 sm:$0xff]  }
 0x2c8   :  { %3951 = vmatpush1.bf16.msra.mxu0 %v5813_v29  ;;  %3885 = vmatprep.mubr.bf16.mxu0 %v6797_v61  ;;  %v5864_v29 = vld [vmem:[#allocation4 + $0x348] ss:$16 sps:$4 sm:$0xff]  }
 0x2c9   :  { %4102 = vmatmul.mubr.bf16.gmra.mrb[100].mxu1 %v6773_v52  ;;  %3952 = vmatprep.subr.bf16.mxu0 %v5821_v10  ;;  %v5831_v52 = vld [vmem:[#allocation4 + $0x2a0] ss:$16 sps:$4 sm:$0xff]   ;;  %v5872_v10 = vld [vmem:[#allocation4 + $0x36c] ss:$16 sps:$4 sm:$0xff]  }
 0x2ca   :  { %4111 = vmatprep.mubr.bf16.mxu1 %v6797_v61  ;;  %4177 = vmatpush1.bf16.msra.mxu1 %v5816_v6  ;;  %v5839_v61 = vld [vmem:[#allocation4 + $0x2c4] ss:$16 sps:$4 sm:$0xff]   ;;  %v5870_v6 = vld [vmem:[#allocation4 + $0x368] ss:$16 sps:$4 sm:$0xff]  }
 0x2cb   :  { %4178 = vmatprep.subr.bf16.mxu1 %v5824_v24  ;;  %v5878_v24 = vld [vmem:[#allocation4 + $0x38c] ss:$16 sps:$4 sm:$0xff]  }
 0x2cc   :  { %3953 = vmatpush1.bf16.msra.mxu0 %v5819_v43  ;;  %v5873_v43 = vld [vmem:[#allocation4 + $0x380] ss:$16 sps:$4 sm:$0xff]  }
 0x2cd   :  { %3954 = vmatprep.subr.bf16.mxu0 %v5827_v34  ;;  %v5881_v34 = vld [vmem:[#allocation4 + $0x3a4] ss:$16 sps:$4 sm:$0xff]  }
 0x2ce   :  { %4179 = vmatpush1.bf16.msra.mxu1 %v5822_v40  ;;  %v5876_v40 = vld [vmem:[#allocation4 + $0x388] ss:$16 sps:$4 sm:$0xff]  }
 0x2cf   :  { %3886 = vmatmul.mubr.bf16.gmra.mrb[104].mxu0 %v6793_v55  ;;  %4180 = vmatprep.subr.bf16.mxu1 %v5830_v28  ;;  %v5884_v28 = vld [vmem:[#allocation4 + $0x3ac] ss:$16 sps:$4 sm:$0xff]  }
 0x2d0   :  { %3955 = vmatpush1.bf16.msra.mxu0 %v5825_v60  ;;  %3895 = vmatprep.mubr.bf16.mxu0 %v6817_v59  ;;  %v5882_v60 = vld [vmem:[#allocation4 + $0x3a8] ss:$16 sps:$4 sm:$0xff]  }
 0x2d1   :  { %4112 = vmatmul.mubr.bf16.gmra.mrb[104].mxu1 %v6793_v55  ;;  %3956 = vmatprep.subr.bf16.mxu0 %v5833_v44  ;;  %v5843_v55 = vld [vmem:[#allocation4 + $0x2e0] ss:$16 sps:$4 sm:$0xff]   ;;  %v5890_v44 = vld [vmem:[#allocation4 + $0x3cc] ss:$16 sps:$4 sm:$0xff]  }
 0x2d2   :  { %4121 = vmatprep.mubr.bf16.mxu1 %v6817_v59  ;;  %4181 = vmatpush1.bf16.msra.mxu1 %v5828_v35  ;;  %v5851_v59 = vld [vmem:[#allocation4 + $0x304] ss:$16 sps:$4 sm:$0xff]   ;;  %v5885_v35 = vld [vmem:[#allocation4 + $0x3c0] ss:$16 sps:$4 sm:$0xff]  }
 0x2d3   :  { %4182 = vmatprep.subr.bf16.mxu1 %v5836_v32  ;;  %v5893_v32 = vld [vmem:[#allocation4 + $0x3e4] ss:$16 sps:$4 sm:$0xff]  }
 0x2d4   :  { %3957 = vmatpush1.bf16.msra.mxu0 %v5831_v52  ;;  %v5888_v52 = vld [vmem:[#allocation4 + $0x3c8] ss:$16 sps:$4 sm:$0xff]  }
 0x2d5   :  { %3958 = vmatprep.subr.bf16.mxu0 %v5839_v61  ;;  %v5896_v61 = vld [vmem:[#allocation4 + $0x3ec] ss:$16 sps:$4 sm:$0xff]  }
 0x2d6   :  { %4183 = vmatpush1.bf16.msra.mxu1 %v5834_v42 }
 0x2d7   :  { %3896 = vmatmul.mubr.bf16.gmra.mrb[108].mxu0 %v6813_v16  ;;  %4184 = vmatprep.subr.bf16.mxu1 %v5842_v39 }
 0x2d8   :  { %3959 = vmatpush1.bf16.msra.mxu0 %v5837_v27  ;;  %3905 = vmatprep.mubr.bf16.mxu0 %v6837_v12 }
 0x2d9   :  { %4122 = vmatmul.mubr.bf16.gmra.mrb[108].mxu1 %v6813_v16  ;;  %3960 = vmatprep.subr.bf16.mxu0 %v5845_v53  ;;  %v5855_v16 = vld [vmem:[#allocation4 + $0x320] ss:$16 sps:$4 sm:$0xff]  }
 0x2da   :  { %4131 = vmatprep.mubr.bf16.mxu1 %v6837_v12  ;;  %4185 = vmatpush1.bf16.msra.mxu1 %v5840_v51  ;;  %v5863_v12 = vld [vmem:[#allocation4 + $0x344] ss:$16 sps:$4 sm:$0xff]  }
 0x2db   :  { %4186 = vmatprep.subr.bf16.mxu1 %v5848_v63 }
 0x2dc   :  { %3961 = vmatpush1.bf16.msra.mxu0 %v5843_v55 }
 0x2dd   :  { %3962 = vmatprep.subr.bf16.mxu0 %v5851_v59 }
 0x2de   :  { %4187 = vmatpush1.bf16.msra.mxu1 %v5846_v8 }
 0x2df   :  { %3906 = vmatmul.mubr.bf16.gmra.mrb[112].mxu0 %v6833_v4  ;;  %4188 = vmatprep.subr.bf16.mxu1 %v5854_v58 }
 0x2e0   :  { %3963 = vmatpush1.bf16.msra.mxu0 %v5849_v22  ;;  %3915 = vmatprep.mubr.bf16.mxu0 %v6857_v36 }
 0x2e1   :  { %4132 = vmatmul.mubr.bf16.gmra.mrb[112].mxu1 %v6833_v4  ;;  %3964 = vmatprep.subr.bf16.mxu0 %v5857_v31  ;;  %v5867_v4 = vld [vmem:[#allocation4 + $0x360] ss:$16 sps:$4 sm:$0xff]  }
 0x2e2   :  { %4141 = vmatprep.mubr.bf16.mxu1 %v6857_v36  ;;  %4189 = vmatpush1.bf16.msra.mxu1 %v5852_v2  ;;  %v5875_v36 = vld [vmem:[#allocation4 + $0x384] ss:$16 sps:$4 sm:$0xff]  }
 0x2e3   :  { %4190 = vmatprep.subr.bf16.mxu1 %v5860_v19 }
 0x2e4   :  { %3965 = vmatpush1.bf16.msra.mxu0 %v5855_v16 }
 0x2e5   :  { %3966 = vmatprep.subr.bf16.mxu0 %v5863_v12 }
 0x2e6   :  { %4191 = vmatpush1.bf16.msra.mxu1 %v5858_v37 }
 0x2e7   :  { %3916 = vmatmul.mubr.bf16.gmra.mrb[116].mxu0 %v6853_v7  ;;  %4192 = vmatprep.subr.bf16.mxu1 %v5866_v13 }
 0x2e8   :  { %3967 = vmatpush1.bf16.msra.mxu0 %v5861_v41  ;;  %3925 = vmatprep.mubr.bf16.mxu0 %v6877_v45 }
 0x2e9   :  { %4142 = vmatmul.mubr.bf16.gmra.mrb[116].mxu1 %v6853_v7  ;;  %3968 = vmatprep.subr.bf16.mxu0 %v5869_v25  ;;  %v5879_v7 = vld [vmem:[#allocation4 + $0x3a0] ss:$16 sps:$4 sm:$0xff]  }
 0x2ea   :  { %4151 = vmatprep.mubr.bf16.mxu1 %v6877_v45  ;;  %4193 = vmatpush1.bf16.msra.mxu1 %v5864_v29  ;;  %v5887_v45 = vld [vmem:[#allocation4 + $0x3c4] ss:$16 sps:$4 sm:$0xff]  }
 0x2eb   :  { %4194 = vmatprep.subr.bf16.mxu1 %v5872_v10 }
 0x2ec   :  { %3969 = vmatpush1.bf16.msra.mxu0 %v5867_v4 }
 0x2ed   :  { %3970 = vmatprep.subr.bf16.mxu0 %v5875_v36 }
 0x2ee   :  { %4195 = vmatpush1.bf16.msra.mxu1 %v5870_v6 }
 0x2ef   :  { %3926 = vmatmul.mubr.bf16.gmra.mrb[120].mxu0 %v6873_v17  ;;  %4196 = vmatprep.subr.bf16.mxu1 %v5878_v24 }
 0x2f0   :  { %3971 = vmatpush1.bf16.msra.mxu0 %v5873_v43  ;;  %3935 = vmatprep.mubr.bf16.mxu0 %v6897_v57 }
 0x2f1   :  { %4152 = vmatmul.mubr.bf16.gmra.mrb[120].mxu1 %v6873_v17  ;;  %3972 = vmatprep.subr.bf16.mxu0 %v5881_v34  ;;  %v5891_v17 = vld [vmem:[#allocation4 + $0x3e0] ss:$16 sps:$4 sm:$0xff]  }
 0x2f2   :  { %4161 = vmatprep.mubr.bf16.mxu1 %v6897_v57  ;;  %4197 = vmatpush1.bf16.msra.mxu1 %v5876_v40  ;;  %v5894_v57 = vld [vmem:[#allocation4 + $0x3e8] ss:$16 sps:$4 sm:$0xff]  }
 0x2f3   :  { %4198 = vmatprep.subr.bf16.mxu1 %v5884_v28 }
 0x2f4   :  { %3973 = vmatpush1.bf16.msra.mxu0 %v5879_v7 }
 0x2f5   :  { %3974 = vmatprep.subr.bf16.mxu0 %v5887_v45 }
 0x2f6   :  { %4199 = vmatpush1.bf16.msra.mxu1 %v5882_v60 }
 0x2f7   :  { %3936 = vmatmul.mubr.bf16.gmra.mrb[124].mxu0 %v6893_v50  ;;  %4200 = vmatprep.subr.bf16.mxu1 %v5890_v44 }
 0x2f8   :  { %3975 = vmatpush1.bf16.msra.mxu0 %v5885_v35  ;;  %3978 = vmatprep.mubr.bf16.mxu0 %v6759_v23 }
 0x2f9   :  { %4162 = vmatmul.mubr.bf16.gmra.mrb[124].mxu1 %v6893_v50  ;;  %3976 = vmatprep.subr.bf16.mxu0 %v5893_v32 }
 0x2fa   :  { %4201 = vmatpush1.bf16.msra.mxu1 %v5888_v52  ;;  %4204 = vmatprep.mubr.bf16.mxu1 %v6759_v23 }
 0x2fb   :  { %4202 = vmatprep.subr.bf16.mxu1 %v5896_v61 }
 0x2fc   :  { %3977 = vmatpush1.bf16.msra.mxu0 %v5891_v17 }
 0x2fe   :  { %4203 = vmatpush1.bf16.msra.mxu1 %v5894_v57 }
 0x2ff   :  { %3979 = vmatmul.mubr.bf16.vlgmr.msra.gmra.mrb[96].mxu0 %v6755_v47 }
 0x300   :  { %3988 = vmatprep.mubr.bf16.mxu0 %v6779_v9 }
 0x301   :  { %4205 = vmatmul.mubr.bf16.vlgmr.msra.gmra.mrb[96].mxu1 %v6755_v47  ;;  %v4349_v47 = vld [vmem:[%s7415_s9] sm:$0xf] }
 0x302   :  { %4214 = vmatprep.mubr.bf16.mxu1 %v6779_v9  ;;  %v6970_v23 = vunpack.c.l.bf16 %v4349_v47 }
 0x307   :  { %3989 = vmatmul.mubr.bf16.gmra.mrb[100].mxu0 %v6775_v21 }
 0x308   :  { %3998 = vmatprep.mubr.bf16.mxu0 %v6799_v62 }
 0x309   :  { %4215 = vmatmul.mubr.bf16.gmra.mrb[100].mxu1 %v6775_v21  ;;  %v1833_v21 = vld [vmem:[%s7412_s6] sm:$0xf] }
 0x30a   :  { %4224 = vmatprep.mubr.bf16.mxu1 %v6799_v62  ;;  %v6976_v9 = vrot.slane %v1833_v21, %v6591_v49  ;;  %v4363_v62 = vrot.slane %v6970_v23, %v1395_v11 }
 0x30f   :  { %3999 = vmatmul.mubr.bf16.gmra.mrb[104].mxu0 %v6795_v56 }
 0x310   :  { %4008 = vmatprep.mubr.bf16.mxu0 %v6819_v3 }
 0x311   :  { %4225 = vmatmul.mubr.bf16.gmra.mrb[104].mxu1 %v6795_v56  ;;  %v4355_v56 = vrot.slane %v6970_v23, %v6591_v49 }
 0x312   :  { %4234 = vmatprep.mubr.bf16.mxu1 %v6819_v3  ;;  %v6987_v3 = vrot.slane %v1833_v21, %v6602_v46 }
 0x313   :  { %v6999_v11 = vrot.slane %v4355_v56, %v6591_v49 }
 0x317   :  { %4009 = vmatmul.mubr.bf16.gmra.mrb[108].mxu0 %v6815_v15 }
 0x318   :  { %4018 = vmatprep.mubr.bf16.mxu0 %v6839_v14 }
 0x319   :  { %4235 = vmatmul.mubr.bf16.gmra.mrb[108].mxu1 %v6815_v15  ;;  %v6984_v15 = vrot.slane %v1833_v21, %v6594_v48 }
 0x31a   :  { %4244 = vmatprep.mubr.bf16.mxu1 %v6839_v14  ;;  %v4367_v14 = vrot.slane %v6970_v23, %v1403_v38 }
 0x31c   :  { %v7011_v63 = vrot.slane %v4367_v14, %v6591_v49 }
 0x31f   :  { %4019 = vmatmul.mubr.bf16.gmra.mrb[112].mxu0 %v6835_v30 }
 0x320   :  { %4028 = vmatprep.mubr.bf16.mxu0 %v6859_v26 }
 0x321   :  { %4245 = vmatmul.mubr.bf16.gmra.mrb[112].mxu1 %v6835_v30  ;;  %v4359_v30 = vrot.slane %v6970_v23, %v6594_v48 }
 0x322   :  { %4254 = vmatprep.mubr.bf16.mxu1 %v6859_v26 }
 0x323   :  { %v7007_v38 = vrot.slane %v4359_v30, %v6591_v49 }
 0x327   :  { %4029 = vmatmul.mubr.bf16.gmra.mrb[116].mxu0 %v6855_v5 }
 0x328   :  { %4038 = vmatprep.mubr.bf16.mxu0 %v6879_v1 }
 0x329   :  { %4255 = vmatmul.mubr.bf16.gmra.mrb[116].mxu1 %v6855_v5  ;;  %v6995_v5 = vrot.slane %v1833_v21, %v6605_v20 }
 0x32a   :  { %4264 = vmatprep.mubr.bf16.mxu1 %v6879_v1 }
 0x32f   :  { %4039 = vmatmul.mubr.bf16.gmra.mrb[120].mxu0 %v6875_v54 }
 0x330   :  { %4048 = vmatprep.mubr.bf16.mxu0 %v6899_v18 }
 0x331   :  { %4265 = vmatmul.mubr.bf16.gmra.mrb[120].mxu1 %v6875_v54 }
 0x332   :  { %4274 = vmatprep.mubr.bf16.mxu1 %v6899_v18  ;;  %v7003_v18 = vrot.slane %v4363_v62, %v6591_v49 }
 0x337   :  { %4049 = vmatmul.mubr.bf16.gmra.mrb[124].mxu0 %v6895_v33 }
 0x339   :  { %4275 = vmatmul.mubr.bf16.gmra.mrb[124].mxu1 %v6895_v33 }
 0x352   :  { %v2642_v26 = vpop.f32.mrb[64].mxu0 }
 0x353   :  { %v5116_v54 = vadd.f32 %v2642_v26, %v6976_v9  ;;  %v2868_v1 = vpop.f32.mrb[64].mxu1  ;;  %v2644_v50 = vpop.f32.mrb[65].mxu0 }
 0x354   :  { %v5148_v33 = vadd.f32 %v2868_v1, %v6984_v15  ;;  %v5117_v42 = vadd.f32 %v2644_v50, %v6987_v3  ;;  %v2870_v39 = vpop.f32.mrb[65].mxu1  ;;  %v2646_v27 = vpop.f32.mrb[66].mxu0 }
 0x355   :  { %v2947_v53 = vmax.f32 %v5116_v54, 0.0  ;;  %v5149_v51 = vadd.f32 %v2870_v39, %v6995_v5  ;;  %v5118_v55 = vadd.f32 %v2646_v27, %v6976_v9  ;;  %v2872_v59 = vpop.f32.mrb[66].mxu1  ;;  %v2648_v8 = vpop.f32.mrb[67].mxu0 }
 0x356   :  { %v2949_v58 = vmax.f32 %v5148_v33, 0.0  ;;  %v2948_v22 = vmax.f32 %v5117_v42, 0.0  ;;  %v5150_v31 = vadd.f32 %v2872_v59, %v6984_v15  ;;  %v5119_v2 = vadd.f32 %v2648_v8, %v6987_v3  ;;  %v2874_v19 = vpop.f32.mrb[67].mxu1 }
 0x357   :  { %v4388_v16 = vmul.f32 %v6999_v11, %v2947_v53  ;;  %v2950_v12 = vmax.f32 %v5149_v51, 0.0  ;;  %v2951_v37 = vmax.f32 %v5118_v55, 0.0  ;;  %v5151_v13 = vadd.f32 %v2874_v19, %v6995_v5 }
 0x358   :  { %v4390_v41 = vmul.f32 %v7003_v18, %v2949_v58  ;;  %v4389_v25 = vmul.f32 %v7007_v38, %v2948_v22  ;;  %v2953_v29 = vmax.f32 %v5150_v31, 0.0  ;;  %v2952_v10 = vmax.f32 %v5119_v2, 0.0 }
 0x359   :  { %v4391_v4 = vmul.f32 %v7011_v63, %v2950_v12  ;;  %v4392_v36 = vmul.f32 %v6999_v11, %v2951_v37  ;;  %v2954_v6 = vmax.f32 %v5151_v13, 0.0 }
 0x35a   :  { %v4452_v24 = vadd.f32 %v4389_v25, %v4388_v16  ;;  %v4394_v43 = vmul.f32 %v7003_v18, %v2953_v29  ;;  %v4393_v34 = vmul.f32 %v7007_v38, %v2952_v10  ;;  %v2652_v40 = vpop.f32.mrb[68].mxu0 }
 0x35b   :  { %v4395_v28 = vmul.f32 %v7011_v63, %v2954_v6  ;;  %v5120_v7 = vadd.f32 %v2652_v40, %v6976_v9  ;;  %v2878_v45 = vpop.f32.mrb[68].mxu1  ;;  %v2654_v60 = vpop.f32.mrb[69].mxu0 }
 0x35c   :  { %v4457_v44 = vadd.f32 %v4393_v34, %v4392_v36  ;;  %v5152_v35 = vadd.f32 %v2878_v45, %v6984_v15  ;;  %v5121_v32 = vadd.f32 %v2654_v60, %v6987_v3  ;;  %v2880_v52 = vpop.f32.mrb[69].mxu1  ;;  %v2656_v61 = vpop.f32.mrb[70].mxu0  ;;  %v4453_v17 = vadd.f32 %v4452_v24, %v4390_v41 }
 0x35d   :  { %v2955_v57 = vmax.f32 %v5120_v7, 0.0  ;;  %v5153_v47 = vadd.f32 %v2880_v52, %v6995_v5  ;;  %v5122_v21 = vadd.f32 %v2656_v61, %v6976_v9  ;;  %v2882_v56 = vpop.f32.mrb[70].mxu1  ;;  %v2658_v62 = vpop.f32.mrb[71].mxu0 }
 0x35e   :  { %v2957_v30 = vmax.f32 %v5152_v35, 0.0  ;;  %v2956_v14 = vmax.f32 %v5121_v32, 0.0  ;;  %v5154_v26 = vadd.f32 %v2882_v56, %v6984_v15  ;;  %v5123_v54 = vadd.f32 %v2658_v62, %v6987_v3  ;;  %v2884_v1 = vpop.f32.mrb[71].mxu1 }
 0x35f   :  { %v4396_v50 = vmul.f32 %v6999_v11, %v2955_v57  ;;  %v2958_v33 = vmax.f32 %v5153_v47, 0.0  ;;  %v2959_v42 = vmax.f32 %v5122_v21, 0.0  ;;  %v5155_v39 = vadd.f32 %v2884_v1, %v6995_v5 }
 0x360   :  { %v4398_v27 = vmul.f32 %v7003_v18, %v2957_v30  ;;  %v4397_v53 = vmul.f32 %v7007_v38, %v2956_v14  ;;  %v2961_v51 = vmax.f32 %v5154_v26, 0.0  ;;  %v2960_v55 = vmax.f32 %v5123_v54, 0.0 }
 0x361   :  { %v4399_v59 = vmul.f32 %v7011_v63, %v2958_v33  ;;  %v4400_v8 = vmul.f32 %v6999_v11, %v2959_v42  ;;  %v2962_v58 = vmax.f32 %v5155_v39, 0.0  ;;  %v4454_v22 = vadd.f32 %v4453_v17, %v4391_v4 }
 0x362   :  { %v4462_v31 = vadd.f32 %v4397_v53, %v4396_v50  ;;  %v4402_v2 = vmul.f32 %v7003_v18, %v2961_v51  ;;  %v4401_v19 = vmul.f32 %v7007_v38, %v2960_v55  ;;  %v2662_v16 = vpop.f32.mrb[72].mxu0  ;;  %v4458_v12 = vadd.f32 %v4457_v44, %v4394_v43 }
 0x363   :  { %v4403_v37 = vmul.f32 %v7011_v63, %v2962_v58  ;;  %4455 = vadd.xlane.f32.xlu0 %v4454_v22  ;;  %v5124_v13 = vadd.f32 %v2662_v16, %v6976_v9  ;;  %v2888_v41 = vpop.f32.mrb[72].mxu1  ;;  %v2664_v25 = vpop.f32.mrb[73].mxu0 }
 0x364   :  { %v4467_v29 = vadd.f32 %v4401_v19, %v4400_v8  ;;  %v5156_v10 = vadd.f32 %v2888_v41, %v6984_v15  ;;  %v4459_v36 = vadd.f32 %v4458_v12, %v4395_v28  ;;  %v5125_v4 = vadd.f32 %v2664_v25, %v6987_v3  ;;  %v2890_v6 = vpop.f32.mrb[73].mxu1  ;;  %v2666_v24 = vpop.f32.mrb[74].mxu0 }
 0x365   :  { %v2963_v34 = vmax.f32 %v5124_v13, 0.0  ;;  %v5157_v40 = vadd.f32 %v2890_v6, %v6995_v5  ;;  %v5126_v43 = vadd.f32 %v2666_v24, %v6976_v9  ;;  %v2892_v7 = vpop.f32.mrb[74].mxu1  ;;  %v2668_v45 = vpop.f32.mrb[75].mxu0  ;;  %v4463_v60 = vadd.f32 %v4462_v31, %v4398_v27 }
 0x366   :  { %v2965_v44 = vmax.f32 %v5156_v10, 0.0  ;;  %4460 = vadd.xlane.f32.xlu1 %v4459_v36  ;;  %v2964_v35 = vmax.f32 %v5125_v4, 0.0  ;;  %v5158_v32 = vadd.f32 %v2892_v7, %v6984_v15  ;;  %v5127_v52 = vadd.f32 %v2668_v45, %v6987_v3  ;;  %v2894_v28 = vpop.f32.mrb[75].mxu1 }
 0x367   :  { %v4404_v61 = vmul.f32 %v6999_v11, %v2963_v34  ;;  %v2966_v17 = vmax.f32 %v5157_v40, 0.0  ;;  %v2967_v57 = vmax.f32 %v5126_v43, 0.0  ;;  %v5159_v47 = vadd.f32 %v2894_v28, %v6995_v5 }
 0x368   :  { %v4406_v21 = vmul.f32 %v7003_v18, %v2965_v44  ;;  %v4405_v56 = vmul.f32 %v7007_v38, %v2964_v35  ;;  %v2969_v62 = vmax.f32 %v5158_v32, 0.0  ;;  %v2968_v30 = vmax.f32 %v5127_v52, 0.0 }
 0x369   :  { %v4407_v14 = vmul.f32 %v7011_v63, %v2966_v17  ;;  %v4408_v26 = vmul.f32 %v6999_v11, %v2967_v57  ;;  %v2970_v54 = vmax.f32 %v5159_v47, 0.0  ;;  %v4464_v1 = vadd.f32 %v4463_v60, %v4399_v59 }
 0x36a   :  { %v4472_v50 = vadd.f32 %v4405_v56, %v4404_v61  ;;  %v4410_v33 = vmul.f32 %v7003_v18, %v2969_v62  ;;  %v4409_v42 = vmul.f32 %v7007_v38, %v2968_v30  ;;  %v2672_v39 = vpop.f32.mrb[76].mxu0  ;;  %v4468_v27 = vadd.f32 %v4467_v29, %v4402_v2 }
 0x36b   :  { %v4411_v53 = vmul.f32 %v7011_v63, %v2970_v54  ;;  %4465 = vadd.xlane.f32.xlu0 %v4464_v1  ;;  %v5128_v51 = vadd.f32 %v2672_v39, %v6976_v9  ;;  %v2898_v55 = vpop.f32.mrb[76].mxu1  ;;  %v2674_v8 = vpop.f32.mrb[77].mxu0 }
 0x36c   :  { %v4477_v58 = vadd.f32 %v4409_v42, %v4408_v26  ;;  %v5160_v22 = vadd.f32 %v2898_v55, %v6984_v15  ;;  %v4469_v31 = vadd.f32 %v4468_v27, %v4403_v37  ;;  %v5129_v59 = vadd.f32 %v2674_v8, %v6987_v3  ;;  %v2900_v19 = vpop.f32.mrb[77].mxu1  ;;  %v2676_v16 = vpop.f32.mrb[78].mxu0 }
 0x36d   :  { %v2971_v12 = vmax.f32 %v5128_v51, 0.0  ;;  %v5161_v13 = vadd.f32 %v2900_v19, %v6995_v5  ;;  %v5130_v2 = vadd.f32 %v2676_v16, %v6976_v9  ;;  %v2902_v41 = vpop.f32.mrb[78].mxu1  ;;  %v2678_v25 = vpop.f32.mrb[79].mxu0  ;;  %v4473_v29 = vadd.f32 %v4472_v50, %v4406_v21 }
 0x36e   :  { %v2973_v10 = vmax.f32 %v5160_v22, 0.0  ;;  %4470 = vadd.xlane.f32.xlu1 %v4469_v31  ;;  %v2972_v36 = vmax.f32 %v5129_v59, 0.0  ;;  %v5162_v4 = vadd.f32 %v2902_v41, %v6984_v15  ;;  %v5131_v6 = vadd.f32 %v2678_v25, %v6987_v3  ;;  %v2904_v37 = vpop.f32.mrb[79].mxu1 }
 0x36f   :  { %v4412_v24 = vmul.f32 %v6999_v11, %v2971_v12  ;;  %v2974_v34 = vmax.f32 %v5161_v13, 0.0  ;;  %v2975_v40 = vmax.f32 %v5130_v2, 0.0  ;;  %v5163_v43 = vadd.f32 %v2904_v37, %v6995_v5 }
 0x370   :  { %v4414_v7 = vmul.f32 %v7003_v18, %v2973_v10  ;;  %v4413_v45 = vmul.f32 %v7007_v38, %v2972_v36  ;;  %v2977_v60 = vmax.f32 %v5162_v4, 0.0  ;;  %v2976_v44 = vmax.f32 %v5131_v6, 0.0 }
 0x371   :  { %v4415_v35 = vmul.f32 %v7011_v63, %v2974_v34  ;;  %v4416_v32 = vmul.f32 %v6999_v11, %v2975_v40  ;;  %v2978_v52 = vmax.f32 %v5163_v43, 0.0  ;;  %v4474_v28 = vadd.f32 %v4473_v29, %v4407_v14 }
 0x372   :  { %v4482_v61 = vadd.f32 %v4413_v45, %v4412_v24  ;;  %v4418_v17 = vmul.f32 %v7003_v18, %v2977_v60  ;;  %v4417_v57 = vmul.f32 %v7007_v38, %v2976_v44  ;;  %v2682_v47 = vpop.f32.mrb[80].mxu0  ;;  %v4478_v21 = vadd.f32 %v4477_v58, %v4410_v33 }
 0x373   :  { %v4419_v56 = vmul.f32 %v7011_v63, %v2978_v52  ;;  %4475 = vadd.xlane.f32.xlu0 %v4474_v28  ;;  %v5132_v62 = vadd.f32 %v2682_v47, %v6976_v9  ;;  %v2908_v30 = vpop.f32.mrb[80].mxu1  ;;  %v2684_v26 = vpop.f32.mrb[81].mxu0 }
 0x374   :  { %v4487_v54 = vadd.f32 %v4417_v57, %v4416_v32  ;;  %v5164_v1 = vadd.f32 %v2908_v30, %v6984_v15  ;;  %v4479_v50 = vadd.f32 %v4478_v21, %v4411_v53  ;;  %v5133_v14 = vadd.f32 %v2684_v26, %v6987_v3  ;;  %v2910_v42 = vpop.f32.mrb[81].mxu1  ;;  %v2686_v39 = vpop.f32.mrb[82].mxu0 }
 0x375   :  { %v2979_v27 = vmax.f32 %v5132_v62, 0.0  ;;  %v5165_v51 = vadd.f32 %v2910_v42, %v6995_v5  ;;  %v5134_v33 = vadd.f32 %v2686_v39, %v6976_v9  ;;  %v2912_v55 = vpop.f32.mrb[82].mxu1  ;;  %v2688_v8 = vpop.f32.mrb[83].mxu0  ;;  %v4483_v58 = vadd.f32 %v4482_v61, %v4414_v7 }
 0x376   :  { %v2981_v22 = vmax.f32 %v5164_v1, 0.0  ;;  %4480 = vadd.xlane.f32.xlu1 %v4479_v50  ;;  %v2980_v31 = vmax.f32 %v5133_v14, 0.0  ;;  %v5166_v59 = vadd.f32 %v2912_v55, %v6984_v15  ;;  %v5135_v19 = vadd.f32 %v2688_v8, %v6987_v3  ;;  %v2914_v53 = vpop.f32.mrb[83].mxu1 }
 0x377   :  { %v4420_v16 = vmul.f32 %v6999_v11, %v2979_v27  ;;  %v2982_v12 = vmax.f32 %v5165_v51, 0.0  ;;  %v2983_v13 = vmax.f32 %v5134_v33, 0.0  ;;  %v5167_v2 = vadd.f32 %v2914_v53, %v6995_v5 }
 0x378   :  { %v4422_v41 = vmul.f32 %v7003_v18, %v2981_v22  ;;  %v4421_v25 = vmul.f32 %v7007_v38, %v2980_v31  ;;  %v2985_v29 = vmax.f32 %v5166_v59, 0.0  ;;  %v2984_v10 = vmax.f32 %v5135_v19, 0.0 }
 0x379   :  { %v4423_v36 = vmul.f32 %v7011_v63, %v2982_v12  ;;  %v4424_v4 = vmul.f32 %v6999_v11, %v2983_v13  ;;  %v2986_v6 = vmax.f32 %v5167_v2, 0.0  ;;  %v4484_v37 = vadd.f32 %v4483_v58, %v4415_v35 }
 0x37a   :  { %v4492_v24 = vadd.f32 %v4421_v25, %v4420_v16  ;;  %v4426_v34 = vmul.f32 %v7003_v18, %v2985_v29  ;;  %v4425_v40 = vmul.f32 %v7007_v38, %v2984_v10  ;;  %v2692_v43 = vpop.f32.mrb[84].mxu0  ;;  %v4488_v7 = vadd.f32 %v4487_v54, %v4418_v17 }
 0x37b   :  { %v4427_v45 = vmul.f32 %v7011_v63, %v2986_v6  ;;  %4485 = vadd.xlane.f32.xlu0 %v4484_v37  ;;  %v5136_v60 = vadd.f32 %v2692_v43, %v6976_v9  ;;  %v2918_v44 = vpop.f32.mrb[84].mxu1  ;;  %v2694_v32 = vpop.f32.mrb[85].mxu0 }
 0x37c   :  { %v4497_v52 = vadd.f32 %v4425_v40, %v4424_v4  ;;  %v5168_v28 = vadd.f32 %v2918_v44, %v6984_v15  ;;  %v4489_v61 = vadd.f32 %v4488_v7, %v4419_v56  ;;  %v5137_v35 = vadd.f32 %v2694_v32, %v6987_v3  ;;  %v2920_v57 = vpop.f32.mrb[85].mxu1  ;;  %v2696_v47 = vpop.f32.mrb[86].mxu0 }
 0x37d   :  { %v2987_v21 = vmax.f32 %v5136_v60, 0.0  ;;  %v5169_v62 = vadd.f32 %v2920_v57, %v6995_v5  ;;  %v5138_v17 = vadd.f32 %v2696_v47, %v6976_v9  ;;  %v2922_v30 = vpop.f32.mrb[86].mxu1  ;;  %v2698_v26 = vpop.f32.mrb[87].mxu0  ;;  %v4493_v54 = vadd.f32 %v4492_v24, %v4422_v41 }
 0x37e   :  { %v2989_v1 = vmax.f32 %v5168_v28, 0.0  ;;  %4490 = vadd.xlane.f32.xlu1 %v4489_v61  ;;  %v2988_v50 = vmax.f32 %v5137_v35, 0.0  ;;  %v5170_v14 = vadd.f32 %v2922_v30, %v6984_v15  ;;  %v5139_v42 = vadd.f32 %v2698_v26, %v6987_v3  ;;  %v2924_v56 = vpop.f32.mrb[87].mxu1 }
 0x37f   :  { %v4428_v39 = vmul.f32 %v6999_v11, %v2987_v21  ;;  %v2990_v27 = vmax.f32 %v5169_v62, 0.0  ;;  %v2991_v51 = vmax.f32 %v5138_v17, 0.0  ;;  %v5171_v33 = vadd.f32 %v2924_v56, %v6995_v5 }
 0x380   :  { %v4430_v55 = vmul.f32 %v7003_v18, %v2989_v1  ;;  %v4429_v8 = vmul.f32 %v7007_v38, %v2988_v50  ;;  %v2993_v58 = vmax.f32 %v5170_v14, 0.0  ;;  %v2992_v22 = vmax.f32 %v5139_v42, 0.0 }
 0x381   :  { %v4431_v31 = vmul.f32 %v7011_v63, %v2990_v27  ;;  %v4432_v59 = vmul.f32 %v6999_v11, %v2991_v51  ;;  %v2994_v19 = vmax.f32 %v5171_v33, 0.0  ;;  %v4494_v53 = vadd.f32 %v4493_v54, %v4423_v36 }
 0x382   :  { %v4502_v16 = vadd.f32 %v4429_v8, %v4428_v39  ;;  %v4434_v12 = vmul.f32 %v7003_v18, %v2993_v58  ;;  %v4433_v13 = vmul.f32 %v7007_v38, %v2992_v22  ;;  %v2702_v2 = vpop.f32.mrb[88].mxu0  ;;  %v4498_v41 = vadd.f32 %v4497_v52, %v4426_v34 }
 0x383   :  { %v4435_v25 = vmul.f32 %v7011_v63, %v2994_v19  ;;  %4495 = vadd.xlane.f32.xlu0 %v4494_v53  ;;  %v5140_v29 = vadd.f32 %v2702_v2, %v6976_v9  ;;  %v2928_v10 = vpop.f32.mrb[88].mxu1  ;;  %v2704_v4 = vpop.f32.mrb[89].mxu0 }
 0x384   :  { %v4507_v6 = vadd.f32 %v4433_v13, %v4432_v59  ;;  %v5172_v37 = vadd.f32 %v2928_v10, %v6984_v15  ;;  %v4499_v24 = vadd.f32 %v4498_v41, %v4427_v45  ;;  %v5141_v36 = vadd.f32 %v2704_v4, %v6987_v3  ;;  %v2930_v40 = vpop.f32.mrb[89].mxu1  ;;  %v2706_v43 = vpop.f32.mrb[90].mxu0 }
 0x385   :  { %v2995_v7 = vmax.f32 %v5140_v29, 0.0  ;;  %v5173_v60 = vadd.f32 %v2930_v40, %v6995_v5  ;;  %v5142_v34 = vadd.f32 %v2706_v43, %v6976_v9  ;;  %v2932_v44 = vpop.f32.mrb[90].mxu1  ;;  %v2708_v32 = vpop.f32.mrb[91].mxu0  ;;  %v4503_v52 = vadd.f32 %v4502_v16, %v4430_v55 }
 0x386   :  { %v2997_v28 = vmax.f32 %v5172_v37, 0.0  ;;  %4500 = vadd.xlane.f32.xlu1 %v4499_v24  ;;  %v2996_v61 = vmax.f32 %v5141_v36, 0.0  ;;  %v5174_v35 = vadd.f32 %v2932_v44, %v6984_v15  ;;  %v5143_v57 = vadd.f32 %v2708_v32, %v6987_v3  ;;  %v2934_v45 = vpop.f32.mrb[91].mxu1 }
 0x387   :  { %v4436_v47 = vmul.f32 %v6999_v11, %v2995_v7  ;;  %v2998_v21 = vmax.f32 %v5173_v60, 0.0  ;;  %v2999_v62 = vmax.f32 %v5142_v34, 0.0  ;;  %v5175_v17 = vadd.f32 %v2934_v45, %v6995_v5 }
 0x388   :  { %v4438_v30 = vmul.f32 %v7003_v18, %v2997_v28  ;;  %v4437_v26 = vmul.f32 %v7007_v38, %v2996_v61  ;;  %v3001_v54 = vmax.f32 %v5174_v35, 0.0  ;;  %v3000_v1 = vmax.f32 %v5143_v57, 0.0 }
 0x389   :  { %v4439_v50 = vmul.f32 %v7011_v63, %v2998_v21  ;;  %v4440_v14 = vmul.f32 %v6999_v11, %v2999_v62  ;;  %v3002_v42 = vmax.f32 %v5175_v17, 0.0  ;;  %v4504_v56 = vadd.f32 %v4503_v52, %v4431_v31 }
 0x38a   :  { %v4512_v39 = vadd.f32 %v4437_v26, %v4436_v47  ;;  %v4442_v27 = vmul.f32 %v7003_v18, %v3001_v54  ;;  %v4441_v51 = vmul.f32 %v7007_v38, %v3000_v1  ;;  %v2712_v33 = vpop.f32.mrb[92].mxu0  ;;  %v4508_v55 = vadd.f32 %v4507_v6, %v4434_v12 }
 0x38b   :  { %v4443_v8 = vmul.f32 %v7011_v63, %v3002_v42  ;;  %4505 = vadd.xlane.f32.xlu0 %v4504_v56  ;;  %v5144_v58 = vadd.f32 %v2712_v33, %v6976_v9  ;;  %v2938_v22 = vpop.f32.mrb[92].mxu1  ;;  %v2714_v59 = vpop.f32.mrb[93].mxu0  ;;  %v4539_v1 = vrot.slane %v6970_v23, %v6605_v20  ;;  %v7421_v56 = vsub.s32 7, %v6588_v0 }
 0x38c   :  { %v4517_v19 = vadd.f32 %v4441_v51, %v4440_v14  ;;  %v5176_v53 = vadd.f32 %v2938_v22, %v6984_v15  ;;  %v4509_v16 = vadd.f32 %v4508_v55, %v4435_v25  ;;  %v5145_v31 = vadd.f32 %v2714_v59, %v6987_v3  ;;  %v2940_v13 = vpop.f32.mrb[93].mxu1  ;;  %v2716_v2 = vpop.f32.mrb[94].mxu0 }
 0x38d   :  { %v3003_v41 = vmax.f32 %v5144_v58, 0.0  ;;  %v5177_v29 = vadd.f32 %v2940_v13, %v6995_v5  ;;  %v5146_v12 = vadd.f32 %v2716_v2, %v6976_v9  ;;  %v2942_v10 = vpop.f32.mrb[94].mxu1  ;;  %v2718_v4 = vpop.f32.mrb[95].mxu0  ;;  %v4513_v6 = vadd.f32 %v4512_v39, %v4438_v30 }
 0x38e   :  { %v3005_v37 = vmax.f32 %v5176_v53, 0.0  ;;  %4510 = vadd.xlane.f32.xlu1 %v4509_v16  ;;  %v3004_v24 = vmax.f32 %v5145_v31, 0.0  ;;  %v5178_v36 = vadd.f32 %v2942_v10, %v6984_v15  ;;  %v5147_v40 = vadd.f32 %v2718_v4, %v6987_v3  ;;  %v2944_v25 = vpop.f32.mrb[95].mxu1 }
 0x38f   :  { %v4444_v43 = vmul.f32 %v6999_v11, %v3003_v41  ;;  %v3006_v7 = vmax.f32 %v5177_v29, 0.0  ;;  %v3007_v60 = vmax.f32 %v5146_v12, 0.0  ;;  %v5179_v34 = vadd.f32 %v2944_v25, %v6995_v5 }
 0x390   :  { %v4446_v44 = vmul.f32 %v7003_v18, %v3005_v37  ;;  %v4445_v9 = vmul.f32 %v7007_v38, %v3004_v24  ;;  %v3009_v32 = vmax.f32 %v5178_v36, 0.0  ;;  %v3008_v52 = vmax.f32 %v5147_v40, 0.0 }
 0x391   :  { %v4447_v28 = vmul.f32 %v7011_v63, %v3006_v7  ;;  %v4448_v61 = vmul.f32 %v6999_v11, %v3007_v60  ;;  %v3010_v15 = vmax.f32 %v5179_v34, 0.0  ;;  %v4514_v35 = vadd.f32 %v4513_v6, %v4439_v50  ;;  %v3171_v11 = vld [vmem:[%s7414_s8] sm:$0xf] }
 0x392   :  { %v4522_v3 = vadd.f32 %v4445_v9, %v4444_v43  ;;  %v4450_v57 = vmul.f32 %v7003_v18, %v3009_v32  ;;  %v4449_v45 = vmul.f32 %v7007_v38, %v3008_v52  ;;  %v4518_v47 = vadd.f32 %v4517_v19, %v4442_v27 }
 0x393   :  { %v4451_v5 = vmul.f32 %v7011_v63, %v3010_v15  ;;  %4515 = vadd.xlane.f32.xlu0 %v4514_v35  ;;  %v7141_v18 = vrot.slane %v3171_v11, %v6591_v49  ;;  %v4535_v38 = vrot.slane %v6970_v23, %v6602_v46  ;;  %v7146_v63 = vrot.slane %v3171_v11, %v6602_v46 }
 0x394   :  { %v4527_v21 = vadd.f32 %v4449_v45, %v4448_v61  ;;  %v4519_v62 = vadd.f32 %v4518_v47, %v4443_v8  ;;  %v4523_v17 = vadd.f32 %v4522_v3, %v4446_v44  ;;  %v7420_v50 = vsub.s32 5, %v6588_v0 }
 0x395   :  { %v7154_v42 = vrot.slane %v3171_v11, %v6594_v48  ;;  %v4547_v49 = vrot.slane %v6970_v23, %v7421_v56  ;;  %v7160_v27 = vrot.slane %v3171_v11, %v6605_v20  ;;  %v7164_v33 = vrot.slane %v4535_v38, %v6602_v46 }
 0x396   :  { %4520 = vadd.xlane.f32.xlu1 %v4519_v62  ;;  %v4524_v30 = vadd.f32 %v4523_v17, %v4447_v28  ;;  %v4528_v26 = vadd.f32 %v4527_v21, %v4450_v57  ;;  %v4543_v14 = vrot.slane %v6970_v23, %v7420_v50  ;;  %v7168_v48 = vrot.slane %v4539_v1, %v6602_v46 }
 0x397   :  { %v7177_v13 = vrot.slane %v4547_v49, %v6602_v46 }
 0x398   :  { %4525 = vadd.xlane.f32.xlu0 %v4524_v30  ;;  %v4529_v54 = vadd.f32 %v4528_v26, %v4451_v5  ;;  %v7172_v59 = vrot.slane %v4543_v14, %v6602_v46 }
 0x39a   :  { %4530 = vadd.xlane.f32.xlu1 %v4529_v54 }
 0x3d2   :  { %v3980_v39 = vpop.f32.mrb[96].mxu0 }
 0x3d3   :  { %v5180_v51 = vadd.f32 %v3980_v39, %v7141_v18  ;;  %v3982_v55 = vpop.f32.mrb[97].mxu0 }
 0x3d4   :  { %v4206_v8 = vpop.f32.mrb[96].mxu1  ;;  %v5181_v58 = vadd.f32 %v3982_v55, %v7146_v63  ;;  %v3984_v22 = vpop.f32.mrb[98].mxu0 }
 0x3d5   :  { %v4285_v0 = vmax.f32 %v5180_v51, 0.0  ;;  %v5212_v23 = vadd.f32 %v4206_v8, %v7154_v42  ;;  %v4208_v20 = vpop.f32.mrb[97].mxu1  ;;  %v5182_v19 = vadd.f32 %v3984_v22, %v7141_v18  ;;  %v3986_v53 = vpop.f32.mrb[99].mxu0 }
 0x3d6   :  { %v4286_v16 = vmax.f32 %v5181_v58, 0.0  ;;  %v5213_v31 = vadd.f32 %v4208_v20, %v7160_v27  ;;  %v4210_v2 = vpop.f32.mrb[98].mxu1  ;;  %v5183_v41 = vadd.f32 %v3986_v53, %v7146_v63 }
 0x3d7   :  { %v4568_v29 = vmul.f32 %v7164_v33, %v4285_v0  ;;  %v4287_v12 = vmax.f32 %v5212_v23, 0.0  ;;  %v4289_v10 = vmax.f32 %v5182_v19, 0.0  ;;  %v5214_v4 = vadd.f32 %v4210_v2, %v7154_v42  ;;  %v4212_v6 = vpop.f32.mrb[99].mxu1 }
 0x3d8   :  { %v4569_v37 = vmul.f32 %v7168_v48, %v4286_v16  ;;  %v4288_v24 = vmax.f32 %v5213_v31, 0.0  ;;  %v4290_v36 = vmax.f32 %v5183_v41, 0.0  ;;  %v5215_v40 = vadd.f32 %v4212_v6, %v7160_v27 }
 0x3d9   :  { %v4570_v25 = vmul.f32 %v7172_v59, %v4287_v12  ;;  %v4572_v46 = vmul.f32 %v7164_v33, %v4289_v10  ;;  %v4291_v43 = vmax.f32 %v5214_v4, 0.0 }
 0x3da   :  { %v4632_v7 = vadd.f32 %v4569_v37, %v4568_v29  ;;  %v4571_v60 = vmul.f32 %v7177_v13, %v4288_v24  ;;  %v4573_v34 = vmul.f32 %v7168_v48, %v4290_v36  ;;  %v4292_v44 = vmax.f32 %v5215_v40, 0.0  ;;  %v3990_v9 = vpop.f32.mrb[100].mxu0 }
 0x3db   :  { %v4574_v32 = vmul.f32 %v7172_v59, %v4291_v43  ;;  %v5184_v52 = vadd.f32 %v3990_v9, %v7141_v18  ;;  %v3992_v28 = vpop.f32.mrb[101].mxu0 }
 0x3dc   :  { %v4637_v61 = vadd.f32 %v4573_v34, %v4572_v46  ;;  %v4575_v15 = vmul.f32 %v7177_v13, %v4292_v44  ;;  %v4216_v35 = vpop.f32.mrb[100].mxu1  ;;  %v5185_v3 = vadd.f32 %v3992_v28, %v7146_v63  ;;  %v3994_v57 = vpop.f32.mrb[102].mxu0  ;;  %v4633_v45 = vadd.f32 %v4632_v7, %v4570_v25 }
 0x3dd   :  { %v4293_v47 = vmax.f32 %v5184_v52, 0.0  ;;  %v5216_v5 = vadd.f32 %v4216_v35, %v7154_v42  ;;  %v4218_v21 = vpop.f32.mrb[101].mxu1  ;;  %v5186_v62 = vadd.f32 %v3994_v57, %v7141_v18  ;;  %v3996_v17 = vpop.f32.mrb[103].mxu0 }
 0x3de   :  { %v4294_v30 = vmax.f32 %v5185_v3, 0.0  ;;  %v5217_v26 = vadd.f32 %v4218_v21, %v7160_v27  ;;  %v4220_v54 = vpop.f32.mrb[102].mxu1  ;;  %v5187_v11 = vadd.f32 %v3996_v17, %v7146_v63  ;;  %v4634_v38 = vadd.f32 %v4633_v45, %v4571_v60 }
 0x3df   :  { %v4576_v1 = vmul.f32 %v7164_v33, %v4293_v47  ;;  %v4295_v50 = vmax.f32 %v5216_v5, 0.0  ;;  %v4297_v14 = vmax.f32 %v5186_v62, 0.0  ;;  %v5218_v56 = vadd.f32 %v4220_v54, %v7154_v42  ;;  %v4222_v49 = vpop.f32.mrb[103].mxu1 }
 0x3e0   :  { %v4577_v39 = vmul.f32 %v7168_v48, %v4294_v30  ;;  %v4296_v51 = vmax.f32 %v5217_v26, 0.0  ;;  %v4298_v55 = vmax.f32 %v5187_v11, 0.0  ;;  %v5219_v8 = vadd.f32 %v4222_v49, %v7160_v27  ;;  %4635 = vadd.xlane.f32.xlu0 %v4634_v38 }
 0x3e1   :  { %v4578_v58 = vmul.f32 %v7172_v59, %v4295_v50  ;;  %v4580_v22 = vmul.f32 %v7164_v33, %v4297_v14  ;;  %v4299_v0 = vmax.f32 %v5218_v56, 0.0  ;;  %v4638_v23 = vadd.f32 %v4637_v61, %v4574_v32 }
 0x3e2   :  { %v4642_v20 = vadd.f32 %v4577_v39, %v4576_v1  ;;  %v4579_v19 = vmul.f32 %v7177_v13, %v4296_v51  ;;  %v4581_v53 = vmul.f32 %v7168_v48, %v4298_v55  ;;  %v4300_v16 = vmax.f32 %v5219_v8, 0.0  ;;  %v4000_v31 = vpop.f32.mrb[104].mxu0 }
 0x3e3   :  { %v4582_v2 = vmul.f32 %v7172_v59, %v4299_v0  ;;  %v5188_v41 = vadd.f32 %v4000_v31, %v7141_v18  ;;  %v4639_v29 = vadd.f32 %v4638_v23, %v4575_v15  ;;  %v4002_v12 = vpop.f32.mrb[105].mxu0 }
 0x3e4   :  { %v4647_v10 = vadd.f32 %v4581_v53, %v4580_v22  ;;  %v4583_v4 = vmul.f32 %v7177_v13, %v4300_v16  ;;  %v4226_v6 = vpop.f32.mrb[104].mxu1  ;;  %v5189_v37 = vadd.f32 %v4002_v12, %v7146_v63  ;;  %v4004_v24 = vpop.f32.mrb[106].mxu0  ;;  %v4643_v36 = vadd.f32 %v4642_v20, %v4578_v58 }
 0x3e5   :  { %v4301_v40 = vmax.f32 %v5188_v41, 0.0  ;;  %v5220_v25 = vadd.f32 %v4226_v6, %v7154_v42  ;;  %4640 = vadd.xlane.f32.xlu1 %v4639_v29  ;;  %v4228_v46 = vpop.f32.mrb[105].mxu1  ;;  %v5190_v43 = vadd.f32 %v4004_v24, %v7141_v18  ;;  %v4006_v7 = vpop.f32.mrb[107].mxu0 }
 0x3e6   :  { %v4302_v60 = vmax.f32 %v5189_v37, 0.0  ;;  %v5221_v34 = vadd.f32 %v4228_v46, %v7160_v27  ;;  %v4230_v44 = vpop.f32.mrb[106].mxu1  ;;  %v5191_v9 = vadd.f32 %v4006_v7, %v7146_v63  ;;  %v4644_v32 = vadd.f32 %v4643_v36, %v4579_v19 }
 0x3e7   :  { %v4584_v52 = vmul.f32 %v7164_v33, %v4301_v40  ;;  %v4303_v28 = vmax.f32 %v5220_v25, 0.0  ;;  %v4305_v61 = vmax.f32 %v5190_v43, 0.0  ;;  %v5222_v15 = vadd.f32 %v4230_v44, %v7154_v42  ;;  %v4232_v35 = vpop.f32.mrb[107].mxu1 }
 0x3e8   :  { %v4585_v3 = vmul.f32 %v7168_v48, %v4302_v60  ;;  %v4304_v57 = vmax.f32 %v5221_v34, 0.0  ;;  %v4306_v45 = vmax.f32 %v5191_v9, 0.0  ;;  %v5223_v47 = vadd.f32 %v4232_v35, %v7160_v27  ;;  %4645 = vadd.xlane.f32.xlu0 %v4644_v32 }
 0x3e9   :  { %v4586_v5 = vmul.f32 %v7172_v59, %v4303_v28  ;;  %v4588_v21 = vmul.f32 %v7164_v33, %v4305_v61  ;;  %v4307_v62 = vmax.f32 %v5222_v15, 0.0  ;;  %v4648_v17 = vadd.f32 %v4647_v10, %v4582_v2 }
 0x3ea   :  { %v4652_v30 = vadd.f32 %v4585_v3, %v4584_v52  ;;  %v4587_v26 = vmul.f32 %v7177_v13, %v4304_v57  ;;  %v4589_v54 = vmul.f32 %v7168_v48, %v4306_v45  ;;  %v4308_v11 = vmax.f32 %v5223_v47, 0.0  ;;  %v4010_v38 = vpop.f32.mrb[108].mxu0 }
 0x3eb   :  { %v4590_v1 = vmul.f32 %v7172_v59, %v4307_v62  ;;  %v5192_v50 = vadd.f32 %v4010_v38, %v7141_v18  ;;  %v4649_v14 = vadd.f32 %v4648_v17, %v4583_v4  ;;  %v4012_v56 = vpop.f32.mrb[109].mxu0 }
 0x3ec   :  { %v4657_v49 = vadd.f32 %v4589_v54, %v4588_v21  ;;  %v4591_v39 = vmul.f32 %v7177_v13, %v4308_v11  ;;  %v4236_v51 = vpop.f32.mrb[108].mxu1  ;;  %v5193_v55 = vadd.f32 %v4012_v56, %v7146_v63  ;;  %v4014_v8 = vpop.f32.mrb[110].mxu0  ;;  %v4653_v58 = vadd.f32 %v4652_v30, %v4586_v5 }
 0x3ed   :  { %v4309_v22 = vmax.f32 %v5192_v50, 0.0  ;;  %v5224_v0 = vadd.f32 %v4236_v51, %v7154_v42  ;;  %4650 = vadd.xlane.f32.xlu1 %v4649_v14  ;;  %v4238_v23 = vpop.f32.mrb[109].mxu1  ;;  %v5194_v20 = vadd.f32 %v4014_v8, %v7141_v18  ;;  %v4016_v19 = vpop.f32.mrb[111].mxu0 }
 0x3ee   :  { %v4310_v53 = vmax.f32 %v5193_v55, 0.0  ;;  %v5225_v16 = vadd.f32 %v4238_v23, %v7160_v27  ;;  %v4240_v31 = vpop.f32.mrb[110].mxu1  ;;  %v5195_v2 = vadd.f32 %v4016_v19, %v7146_v63  ;;  %v4654_v41 = vadd.f32 %v4653_v58, %v4587_v26 }
 0x3ef   :  { %v4592_v29 = vmul.f32 %v7164_v33, %v4309_v22  ;;  %v4311_v12 = vmax.f32 %v5224_v0, 0.0  ;;  %v4313_v10 = vmax.f32 %v5194_v20, 0.0  ;;  %v5226_v4 = vadd.f32 %v4240_v31, %v7154_v42  ;;  %v4242_v6 = vpop.f32.mrb[111].mxu1 }
 0x3f0   :  { %v4593_v37 = vmul.f32 %v7168_v48, %v4310_v53  ;;  %v4312_v24 = vmax.f32 %v5225_v16, 0.0  ;;  %v4314_v36 = vmax.f32 %v5195_v2, 0.0  ;;  %v5227_v40 = vadd.f32 %v4242_v6, %v7160_v27  ;;  %4655 = vadd.xlane.f32.xlu0 %v4654_v41 }
 0x3f1   :  { %v4594_v25 = vmul.f32 %v7172_v59, %v4311_v12  ;;  %v4596_v46 = vmul.f32 %v7164_v33, %v4313_v10  ;;  %v4315_v43 = vmax.f32 %v5226_v4, 0.0  ;;  %v4658_v7 = vadd.f32 %v4657_v49, %v4590_v1 }
 0x3f2   :  { %v4662_v60 = vadd.f32 %v4593_v37, %v4592_v29  ;;  %v4595_v34 = vmul.f32 %v7177_v13, %v4312_v24  ;;  %v4597_v44 = vmul.f32 %v7168_v48, %v4314_v36  ;;  %v4316_v9 = vmax.f32 %v5227_v40, 0.0  ;;  %v4020_v32 = vpop.f32.mrb[112].mxu0 }
 0x3f3   :  { %v4598_v52 = vmul.f32 %v7172_v59, %v4315_v43  ;;  %v5196_v28 = vadd.f32 %v4020_v32, %v7141_v18  ;;  %v4659_v61 = vadd.f32 %v4658_v7, %v4591_v39  ;;  %v4022_v15 = vpop.f32.mrb[113].mxu0 }
 0x3f4   :  { %v4667_v35 = vadd.f32 %v4597_v44, %v4596_v46  ;;  %v4599_v3 = vmul.f32 %v7177_v13, %v4316_v9  ;;  %v4246_v57 = vpop.f32.mrb[112].mxu1  ;;  %v5197_v45 = vadd.f32 %v4022_v15, %v7146_v63  ;;  %v4024_v47 = vpop.f32.mrb[114].mxu0  ;;  %v4663_v5 = vadd.f32 %v4662_v60, %v4594_v25 }
 0x3f5   :  { %v4317_v21 = vmax.f32 %v5196_v28, 0.0  ;;  %v5228_v62 = vadd.f32 %v4246_v57, %v7154_v42  ;;  %4660 = vadd.xlane.f32.xlu1 %v4659_v61  ;;  %v4248_v17 = vpop.f32.mrb[113].mxu1  ;;  %v5198_v30 = vadd.f32 %v4024_v47, %v7141_v18  ;;  %v4026_v26 = vpop.f32.mrb[115].mxu0 }
 0x3f6   :  { %v4318_v54 = vmax.f32 %v5197_v45, 0.0  ;;  %v5229_v11 = vadd.f32 %v4248_v17, %v7160_v27  ;;  %v4250_v38 = vpop.f32.mrb[114].mxu1  ;;  %v5199_v1 = vadd.f32 %v4026_v26, %v7146_v63  ;;  %v4664_v50 = vadd.f32 %v4663_v5, %v4595_v34 }
 0x3f7   :  { %v4600_v14 = vmul.f32 %v7164_v33, %v4317_v21  ;;  %v4319_v56 = vmax.f32 %v5228_v62, 0.0  ;;  %v4321_v49 = vmax.f32 %v5198_v30, 0.0  ;;  %v5230_v39 = vadd.f32 %v4250_v38, %v7154_v42  ;;  %v4252_v51 = vpop.f32.mrb[115].mxu1 }
 0x3f8   :  { %v4601_v55 = vmul.f32 %v7168_v48, %v4318_v54  ;;  %v4320_v8 = vmax.f32 %v5229_v11, 0.0  ;;  %v4322_v58 = vmax.f32 %v5199_v1, 0.0  ;;  %v5231_v22 = vadd.f32 %v4252_v51, %v7160_v27  ;;  %4665 = vadd.xlane.f32.xlu0 %v4664_v50 }
 0x3f9   :  { %v4602_v0 = vmul.f32 %v7172_v59, %v4319_v56  ;;  %v4604_v23 = vmul.f32 %v7164_v33, %v4321_v49  ;;  %v4323_v20 = vmax.f32 %v5230_v39, 0.0  ;;  %v4668_v19 = vadd.f32 %v4667_v35, %v4598_v52 }
 0x3fa   :  { %v4672_v53 = vadd.f32 %v4601_v55, %v4600_v14  ;;  %v4603_v16 = vmul.f32 %v7177_v13, %v4320_v8  ;;  %v4605_v31 = vmul.f32 %v7168_v48, %v4322_v58  ;;  %v4324_v2 = vmax.f32 %v5231_v22, 0.0  ;;  %v4030_v41 = vpop.f32.mrb[116].mxu0 }
 0x3fb   :  { %v4606_v29 = vmul.f32 %v7172_v59, %v4323_v20  ;;  %v5200_v12 = vadd.f32 %v4030_v41, %v7141_v18  ;;  %v4669_v10 = vadd.f32 %v4668_v19, %v4599_v3  ;;  %v4032_v4 = vpop.f32.mrb[117].mxu0 }
 0x3fc   :  { %v4677_v6 = vadd.f32 %v4605_v31, %v4604_v23  ;;  %v4607_v37 = vmul.f32 %v7177_v13, %v4324_v2  ;;  %v4256_v24 = vpop.f32.mrb[116].mxu1  ;;  %v5201_v36 = vadd.f32 %v4032_v4, %v7146_v63  ;;  %v4034_v40 = vpop.f32.mrb[118].mxu0  ;;  %v4673_v25 = vadd.f32 %v4672_v53, %v4602_v0 }
 0x3fd   :  { %v4325_v46 = vmax.f32 %v5200_v12, 0.0  ;;  %v5232_v43 = vadd.f32 %v4256_v24, %v7154_v42  ;;  %4670 = vadd.xlane.f32.xlu1 %v4669_v10  ;;  %v4258_v7 = vpop.f32.mrb[117].mxu1  ;;  %v5202_v60 = vadd.f32 %v4034_v40, %v7141_v18  ;;  %v4036_v34 = vpop.f32.mrb[119].mxu0 }
 0x3fe   :  { %v4326_v44 = vmax.f32 %v5201_v36, 0.0  ;;  %v5233_v9 = vadd.f32 %v4258_v7, %v7160_v27  ;;  %v4260_v32 = vpop.f32.mrb[118].mxu1  ;;  %v5203_v52 = vadd.f32 %v4036_v34, %v7146_v63  ;;  %v4674_v28 = vadd.f32 %v4673_v25, %v4603_v16 }
 0x3ff   :  { %v4608_v61 = vmul.f32 %v7164_v33, %v4325_v46  ;;  %v4327_v15 = vmax.f32 %v5232_v43, 0.0  ;;  %v4329_v35 = vmax.f32 %v5202_v60, 0.0  ;;  %v5234_v3 = vadd.f32 %v4260_v32, %v7154_v42  ;;  %v4262_v57 = vpop.f32.mrb[119].mxu1 }
 0x400   :  { %v4609_v45 = vmul.f32 %v7168_v48, %v4326_v44  ;;  %v4328_v47 = vmax.f32 %v5233_v9, 0.0  ;;  %v4330_v5 = vmax.f32 %v5203_v52, 0.0  ;;  %v5235_v21 = vadd.f32 %v4262_v57, %v7160_v27  ;;  %4675 = vadd.xlane.f32.xlu0 %v4674_v28 }
 0x401   :  { %v4610_v62 = vmul.f32 %v7172_v59, %v4327_v15  ;;  %v4612_v17 = vmul.f32 %v7164_v33, %v4329_v35  ;;  %v4331_v30 = vmax.f32 %v5234_v3, 0.0  ;;  %v4678_v26 = vadd.f32 %v4677_v6, %v4606_v29 }
 0x402   :  { %v4682_v54 = vadd.f32 %v4609_v45, %v4608_v61  ;;  %v4611_v11 = vmul.f32 %v7177_v13, %v4328_v47  ;;  %v4613_v38 = vmul.f32 %v7168_v48, %v4330_v5  ;;  %v4332_v1 = vmax.f32 %v5235_v21, 0.0  ;;  %v4040_v50 = vpop.f32.mrb[120].mxu0 }
 0x403   :  { %v4614_v14 = vmul.f32 %v7172_v59, %v4331_v30  ;;  %v5204_v56 = vadd.f32 %v4040_v50, %v7141_v18  ;;  %v4679_v49 = vadd.f32 %v4678_v26, %v4607_v37  ;;  %v4042_v39 = vpop.f32.mrb[121].mxu0 }
 0x404   :  { %v4687_v51 = vadd.f32 %v4613_v38, %v4612_v17  ;;  %v4615_v55 = vmul.f32 %v7177_v13, %v4332_v1  ;;  %v4266_v8 = vpop.f32.mrb[120].mxu1  ;;  %v5205_v58 = vadd.f32 %v4042_v39, %v7146_v63  ;;  %v4044_v22 = vpop.f32.mrb[122].mxu0  ;;  %v4683_v0 = vadd.f32 %v4682_v54, %v4610_v62 }
 0x405   :  { %v4333_v23 = vmax.f32 %v5204_v56, 0.0  ;;  %v5236_v20 = vadd.f32 %v4266_v8, %v7154_v42  ;;  %4680 = vadd.xlane.f32.xlu1 %v4679_v49  ;;  %v4268_v19 = vpop.f32.mrb[121].mxu1  ;;  %v5206_v53 = vadd.f32 %v4044_v22, %v7141_v18  ;;  %v4046_v16 = vpop.f32.mrb[123].mxu0 }
 0x406   :  { %v4334_v31 = vmax.f32 %v5205_v58, 0.0  ;;  %v5237_v2 = vadd.f32 %v4268_v19, %v7160_v27  ;;  %v4270_v41 = vpop.f32.mrb[122].mxu1  ;;  %v5207_v29 = vadd.f32 %v4046_v16, %v7146_v63  ;;  %v4684_v12 = vadd.f32 %v4683_v0, %v4611_v11 }
 0x407   :  { %v4616_v10 = vmul.f32 %v7164_v33, %v4333_v23  ;;  %v4335_v4 = vmax.f32 %v5236_v20, 0.0  ;;  %v4337_v6 = vmax.f32 %v5206_v53, 0.0  ;;  %v5238_v37 = vadd.f32 %v4270_v41, %v7154_v42  ;;  %v4272_v24 = vpop.f32.mrb[123].mxu1 }
 0x408   :  { %v4617_v36 = vmul.f32 %v7168_v48, %v4334_v31  ;;  %v4336_v40 = vmax.f32 %v5237_v2, 0.0  ;;  %v4338_v25 = vmax.f32 %v5207_v29, 0.0  ;;  %v5239_v46 = vadd.f32 %v4272_v24, %v7160_v27  ;;  %4685 = vadd.xlane.f32.xlu0 %v4684_v12  ;;  %v4461_v24 = vpop.xlane.xlu1 %4460 }
 0x409   :  { %v4618_v43 = vmul.f32 %v7172_v59, %v4335_v4  ;;  %v4620_v7 = vmul.f32 %v7164_v33, %v4337_v6  ;;  %v4339_v60 = vmax.f32 %v5238_v37, 0.0  ;;  %v4688_v34 = vadd.f32 %v4687_v51, %v4614_v14  ;;  %v4456_v6 = vpop.xlane.xlu0 %4455 }
 0x40a   :  { %v4692_v44 = vadd.f32 %v4617_v36, %v4616_v10  ;;  %v4619_v9 = vmul.f32 %v7177_v13, %v4336_v40  ;;  %v4621_v32 = vmul.f32 %v7168_v48, %v4338_v25  ;;  %v4340_v52 = vmax.f32 %v5239_v46, 0.0  ;;  %v4050_v28 = vpop.f32.mrb[124].mxu0 }
 0x40b   :  { %v4622_v61 = vmul.f32 %v7172_v59, %v4339_v60  ;;  %v5208_v15 = vadd.f32 %v4050_v28, %v7141_v18  ;;  %v4689_v35 = vadd.f32 %v4688_v34, %v4615_v55  ;;  %v4052_v3 = vpop.f32.mrb[125].mxu0 }
 0x40c   :  { %v4697_v57 = vadd.f32 %v4621_v32, %v4620_v7  ;;  %v4623_v45 = vmul.f32 %v7177_v13, %v4340_v52  ;;  %v4276_v47 = vpop.f32.mrb[124].mxu1  ;;  %v5209_v5 = vadd.f32 %v4052_v3, %v7146_v63  ;;  %v4054_v21 = vpop.f32.mrb[126].mxu0  ;;  %v4693_v62 = vadd.f32 %v4692_v44, %v4618_v43 }
 0x40d   :  { %v4341_v17 = vmax.f32 %v5208_v15, 0.0  ;;  %v5240_v30 = vadd.f32 %v4276_v47, %v7154_v42  ;;  %4690 = vadd.xlane.f32.xlu1 %v4689_v35  ;;  %v4278_v26 = vpop.f32.mrb[125].mxu1  ;;  %v5210_v54 = vadd.f32 %v4054_v21, %v7141_v18  ;;  %v4056_v11 = vpop.f32.mrb[127].mxu0 }
 0x40e   :  { %v4342_v38 = vmax.f32 %v5209_v5, 0.0  ;;  %v5241_v1 = vadd.f32 %v4278_v26, %v7160_v27  ;;  %v4280_v50 = vpop.f32.mrb[126].mxu1  ;;  %v5211_v14 = vadd.f32 %v4056_v11, %v7146_v63  ;;  %v4694_v56 = vadd.f32 %v4693_v62, %v4619_v9  ;;  %v4466_v37 = vpop.xlane.xlu0 %4465  ;;  %v7307_v9 = vld [vmem:[%s7416_s10] ss:$0 sm:$0xff] }
 0x40f   :  { %v4624_v49 = vmul.f32 %v7164_v33, %v4341_v17  ;;  %v4343_v39 = vmax.f32 %v5240_v30, 0.0  ;;  %v4345_v51 = vmax.f32 %v5210_v54, 0.0  ;;  %v5242_v55 = vadd.f32 %v4280_v50, %v7154_v42  ;;  %v4282_v8 = vpop.f32.mrb[127].mxu1  ;;  %v4471_v40 = vpop.xlane.xlu1 %4470 }
 0x410   :  { %v4625_v58 = vmul.f32 %v7168_v48, %v4342_v38  ;;  %v4344_v22 = vmax.f32 %v5241_v1, 0.0  ;;  %v4346_v0 = vmax.f32 %v5211_v14, 0.0  ;;  %v5243_v18 = vadd.f32 %v4282_v8, %v7160_v27  ;;  %4695 = vadd.xlane.f32.xlu0 %v4694_v56 }
 0x411   :  { %v4626_v23 = vmul.f32 %v7172_v59, %v4343_v39  ;;  %v4628_v20 = vmul.f32 %v7164_v33, %v4345_v51  ;;  %v4347_v63 = vmax.f32 %v5242_v55, 0.0  ;;  %v4698_v19 = vadd.f32 %v4697_v57, %v4622_v61 }
 0x412   :  { %v4702_v53 = vadd.f32 %v4625_v58, %v4624_v49  ;;  %v4627_v16 = vmul.f32 %v7177_v13, %v4344_v22  ;;  %v4629_v31 = vmul.f32 %v7168_v48, %v4346_v0  ;;  %v4348_v42 = vmax.f32 %v5243_v18, 0.0  ;;  %v4476_v36 = vpop.xlane.xlu0 %4475 }
 0x413   :  { %v4630_v2 = vmul.f32 %v7172_v59, %v4347_v63  ;;  %v4699_v41 = vadd.f32 %v4698_v19, %v4623_v45  ;;  %v4481_v25 = vpop.xlane.xlu1 %4480 }
 0x414   :  { %v4707_v29 = vadd.f32 %v4629_v31, %v4628_v20  ;;  %v4631_v12 = vmul.f32 %v7177_v13, %v4348_v42  ;;  %v4703_v27 = vadd.f32 %v4702_v53, %v4626_v23 }
 0x415   :  { %4700 = vadd.xlane.f32.xlu1 %v4699_v41 }
 0x416   :  { %v4704_v10 = vadd.f32 %v4703_v27, %v4627_v16  ;;  %v4708_v4 = vadd.f32 %v4707_v29, %v4630_v2  ;;  %v4486_v48 = vpop.xlane.xlu0 %4485 }
 0x417   :  { %v4491_v59 = vpop.xlane.xlu1 %4490 }
 0x418   :  { %4705 = vadd.xlane.f32.xlu0 %v4704_v10  ;;  %v4709_v33 = vadd.f32 %v4708_v4, %v4631_v12 }
 0x41a   :  { %4710 = vadd.xlane.f32.xlu1 %v4709_v33  ;;  %v4496_v46 = vpop.xlane.xlu0 %4495 }
 0x41b   :  { %v4501_v7 = vpop.xlane.xlu1 %4500 }
 0x41e   :  { %v4506_v43 = vpop.xlane.xlu0 %4505 }
 0x41f   :  { %v4511_v13 = vpop.xlane.xlu1 %4510 }
 0x422   :  { %v4516_v60 = vpop.xlane.xlu0 %4515 }
 0x423   :  { %v4521_v44 = vpop.xlane.xlu1 %4520 }
 0x426   :  { %v7302_v34 = vpop.xlane.xlu0 %4525 }
 0x427   :  { %v4531_v52 = vpop.xlane.xlu1 %4530 }
 0x46d   :  { %v4636_v32 = vpop.xlane.xlu0 %4635 }
 0x46e   :  { %v4713_v28 = vsel %vm4712_vm3, %v4456_v6, %v4636_v32 }
 0x46f   :  { %v4736_v61 = vadd.f32 %v7307_v9, %v4713_v28 }
 0x471   :  { %4753 = vst.msk [vmem:[%s7417_s11] sm:$0xff] %vm4752_vm4, %v4736_v61 }
 0x472   :  { %v4641_v15 = vpop.xlane.xlu1 %4640 }
 0x473   :  { %v4714_v35 = vsel %vm4712_vm3, %v4461_v24, %v4641_v15 }
 0x474   :  { %v4737_v3 = vadd.f32 %v7307_v9, %v4714_v35 }
 0x475   :  { %v4646_v57 = vpop.xlane.xlu0 %4645 }
 0x476   :  { %4754 = vst.msk [vmem:[%s7417_s11 + $0x8] sm:$0xff] %vm4752_vm4, %v4737_v3  ;;  %v4715_v45 = vsel %vm4712_vm3, %v4466_v37, %v4646_v57 }
 0x477   :  { %v4738_v47 = vadd.f32 %v7307_v9, %v4715_v45 }
 0x479   :  { %4755 = vst.msk [vmem:[%s7417_s11 + $0x10] sm:$0xff] %vm4752_vm4, %v4738_v47 }
 0x47a   :  { %v4651_v5 = vpop.xlane.xlu1 %4650 }
 0x47b   :  { %v4716_v21 = vsel %vm4712_vm3, %v4471_v40, %v4651_v5 }
 0x47c   :  { %v4739_v62 = vadd.f32 %v7307_v9, %v4716_v21 }
 0x47d   :  { %v4656_v17 = vpop.xlane.xlu0 %4655 }
 0x47e   :  { %4756 = vst.msk [vmem:[%s7417_s11 + $0x18] sm:$0xff] %vm4752_vm4, %v4739_v62  ;;  %v4717_v30 = vsel %vm4712_vm3, %v4476_v36, %v4656_v17 }
 0x47f   :  { %v4740_v26 = vadd.f32 %v7307_v9, %v4717_v30 }
 0x481   :  { %4757 = vst.msk [vmem:[%s7417_s11 + $0x20] sm:$0xff] %vm4752_vm4, %v4740_v26 }
 0x482   :  { %v4661_v54 = vpop.xlane.xlu1 %4660 }
 0x483   :  { %v4718_v11 = vsel %vm4712_vm3, %v4481_v25, %v4661_v54 }
 0x484   :  { %v4741_v38 = vadd.f32 %v7307_v9, %v4718_v11 }
 0x485   :  { %v4666_v1 = vpop.xlane.xlu0 %4665 }
 0x486   :  { %4758 = vst.msk [vmem:[%s7417_s11 + $0x28] sm:$0xff] %vm4752_vm4, %v4741_v38  ;;  %v4719_v50 = vsel %vm4712_vm3, %v4486_v48, %v4666_v1 }
 0x487   :  { %v4742_v14 = vadd.f32 %v7307_v9, %v4719_v50 }
 0x489   :  { %4759 = vst.msk [vmem:[%s7417_s11 + $0x30] sm:$0xff] %vm4752_vm4, %v4742_v14 }
 0x48a   :  { %v4671_v56 = vpop.xlane.xlu1 %4670 }
 0x48b   :  { %v4720_v49 = vsel %vm4712_vm3, %v4491_v59, %v4671_v56 }
 0x48c   :  { %v4743_v39 = vadd.f32 %v7307_v9, %v4720_v49 }
 0x48d   :  { %v4676_v51 = vpop.xlane.xlu0 %4675 }
 0x48e   :  { %4760 = vst.msk [vmem:[%s7417_s11 + $0x38] sm:$0xff] %vm4752_vm4, %v4743_v39  ;;  %v4721_v55 = vsel %vm4712_vm3, %v4496_v46, %v4676_v51 }
 0x48f   :  { %v4744_v8 = vadd.f32 %v7307_v9, %v4721_v55 }
 0x491   :  { %4761 = vst.msk [vmem:[%s7417_s11 + $0x40] sm:$0xff] %vm4752_vm4, %v4744_v8 }
 0x492   :  { %v4681_v58 = vpop.xlane.xlu1 %4680 }
 0x493   :  { %v4722_v22 = vsel %vm4712_vm3, %v4501_v7, %v4681_v58 }
 0x494   :  { %v4745_v0 = vadd.f32 %v7307_v9, %v4722_v22 }
 0x495   :  { %v4686_v18 = vpop.xlane.xlu0 %4685 }
 0x496   :  { %4762 = vst.msk [vmem:[%s7417_s11 + $0x48] sm:$0xff] %vm4752_vm4, %v4745_v0  ;;  %v4723_v23 = vsel %vm4712_vm3, %v4506_v43, %v4686_v18 }
 0x497   :  { %v4746_v20 = vadd.f32 %v7307_v9, %v4723_v23 }
 0x499   :  { %4763 = vst.msk [vmem:[%s7417_s11 + $0x50] sm:$0xff] %vm4752_vm4, %v4746_v20 }
 0x49a   :  { %v4691_v63 = vpop.xlane.xlu1 %4690 }
 0x49b   :  { %v4724_v19 = vsel %vm4712_vm3, %v4511_v13, %v4691_v63 }
 0x49c   :  { %v4747_v53 = vadd.f32 %v7307_v9, %v4724_v19 }
 0x49d   :  { %v4696_v16 = vpop.xlane.xlu0 %4695 }
 0x49e   :  { %4764 = vst.msk [vmem:[%s7417_s11 + $0x58] sm:$0xff] %vm4752_vm4, %v4747_v53  ;;  %v4725_v31 = vsel %vm4712_vm3, %v4516_v60, %v4696_v16 }
 0x49f   :  { %v4748_v42 = vadd.f32 %v7307_v9, %v4725_v31 }
 0x4a1   :  { %4765 = vst.msk [vmem:[%s7417_s11 + $0x60] sm:$0xff] %vm4752_vm4, %v4748_v42 }
 0x4a2   :  { %v4701_v2 = vpop.xlane.xlu1 %4700 }
 0x4a3   :  { %v4726_v41 = vsel %vm4712_vm3, %v4521_v44, %v4701_v2 }
 0x4a4   :  { %v4749_v29 = vadd.f32 %v7307_v9, %v4726_v41 }
 0x4a5   :  { %v4706_v12 = vpop.xlane.xlu0 %4705 }
 0x4a6   :  { %4766 = vst.msk [vmem:[%s7417_s11 + $0x68] sm:$0xff] %vm4752_vm4, %v4749_v29  ;;  %v4727_v27 = vsel %vm4712_vm3, %v7302_v34, %v4706_v12 }
 0x4a7   :  { %v4750_v10 = vadd.f32 %v7307_v9, %v4727_v27  ;;  %v4711_v4 = vpop.xlane.xlu1 %4710 }
 0x4a8   :  { %v4728_v33 = vsel %vm4712_vm3, %v4531_v52, %v4711_v4 }
 0x4a9   :  { %4767 = vst.msk [vmem:[%s7417_s11 + $0x70] sm:$0xff] %vm4752_vm4, %v4750_v10  ;;  %v4751_v6 = vadd.f32 %v7307_v9, %v4728_v33 }
 0x4ab   :  { %4768 = vst.msk [vmem:[%s7417_s11 + $0x78] sm:$0xff] %vm4752_vm4, %v4751_v6 }
 0x4ac   :  { %4773 = vsyncpa [#allocation3], 1 }
 0x4ad   :  { %4774 = vsyncpa [#allocation5], 1 }

</bundles_post_ra>
